<compile_context>
chip_gen: v6e
topology: v6e:2x2x1
jax: 0.10.0
libtpu: 0.0.40
codegen_flags: <defaults>
</compile_context>

<pallas_src>
import functools

import jax
import jax.numpy as jnp
from jax.experimental import pallas as pl
from jax.experimental.pallas import tpu as pltpu

# Keep plain-JAX reference matmuls at full f32 precision so the correctness check is tight.
jax.config.update("jax_default_matmul_precision", "highest")


# ----------------------------------------------------------------------------
# The single fused Pallas kernel
# ----------------------------------------------------------------------------
def _sg_encoder_kernel(
    xtok_ref, etok_ref,          # (N, Tn) int32, (E, Te) int32 token ids
    row_c_ref, col_c_ref,        # (E, 1) int32 edge endpoints
    col_r_ref,                   # (1, E) int32 (for the transposed scatter mask)
    bat_c_ref, bat_r_ref,        # (N, 1) / (1, N) int32 graph assignment
    sym_ref,                     # (1, K) int32 indices of added symmetric edges
    emb_ref,                     # (V, D) f32 embedding table (pad row is zero)
    w_ref,                       # (10*D, D) f32 packed weights [w1e|w2e|w1n|w2n|w1m|w2m]
    b_ref,                       # (8, D) f32 packed [b1e,b2e,b1n,b2n,b1m,b2m,gamma,beta]
    out_ref,                     # (pad8(N)+E, D) f32 fused output [x_norm ; e_new]
):
    f32 = jnp.float32
    N, Tn = xtok_ref.shape
    E, Te = etok_ref.shape
    V, D = emb_ref.shape
    K = sym_ref.shape[1]
    n_pad = (N + 7) // 8 * 8

    emb = emb_ref[...]

    # --- vocab-embedding lookup + token sum, as (count matrix) @ (embedding table) on the MXU ---
    vocab_iota_n = jax.lax.broadcasted_iota(jnp.int32, (N, V), 1)
    x_cnt = jnp.zeros((N, V), f32)
    for t in range(Tn):                                   # Tn is tiny & static -> unrolled
        x_cnt = x_cnt + (vocab_iota_n == xtok_ref[:, t:t + 1]).astype(f32)
    x = jnp.dot(x_cnt, emb, preferred_element_type=f32)                  # (N, D)

    vocab_iota_e = jax.lax.broadcasted_iota(jnp.int32, (E, V), 1)
    e_cnt = jnp.zeros((E, V), f32)
    for t in range(Te):
        e_cnt = e_cnt + (vocab_iota_e == etok_ref[:, t:t + 1]).astype(f32)
    edge_iota = jax.lax.broadcasted_iota(jnp.int32, (E, K), 0)
    hit = jnp.sum((edge_iota == sym_ref[...]).astype(f32), axis=1, keepdims=True)
    sign = jnp.where(hit > 0.5, -1.0, 1.0)                               # (E, 1): -1 on sym edges
    ea = jnp.dot(e_cnt, emb, preferred_element_type=f32) * sign          # (E, D)

    # --- endpoint gathers x[row], x[col] as one-hot incidence matmuls (masks built in-kernel) ---
    node_iota_en = jax.lax.broadcasted_iota(jnp.int32, (E, N), 1)
    s_row = (node_iota_en == row_c_ref[...]).astype(f32)                 # (E, N)
    s_col = (node_iota_en == col_c_ref[...]).astype(f32)                 # (E, N)
    src = jnp.dot(s_row, x, preferred_element_type=f32)                  # (E, D)
    dst = jnp.dot(s_col, x, preferred_element_type=f32)                  # (E, D)

    # --- EdgeModel: Lin(3D->D) + ReLU + Lin(D->D); concat folded into split-weight matmuls ---
    h = (jnp.dot(src, w_ref[0:D, :], preferred_element_type=f32)
         + jnp.dot(dst, w_ref[D:2 * D, :], preferred_element_type=f32)
         + jnp.dot(ea, w_ref[2 * D:3 * D, :], preferred_element_type=f32)
         + b_ref[0:1, :])
    h = jnp.maximum(h, 0.0)
    e_new = jnp.dot(h, w_ref[3 * D:4 * D, :], preferred_element_type=f32) + b_ref[1:2, :]   # (E, D)

    # --- NodeModel mlp_1 on cat([x[row], e_new]) ---
    h1 = (jnp.dot(src, w_ref[4 * D:5 * D, :], preferred_element_type=f32)
          + jnp.dot(e_new, w_ref[5 * D:6 * D, :], preferred_element_type=f32)
          + b_ref[2:3, :])
    h1 = jnp.maximum(h1, 0.0)
    m = jnp.dot(h1, w_ref[6 * D:7 * D, :], preferred_element_type=f32) + b_ref[3:4, :]      # (E, D)

    # --- scatter_mean(m, col, dim_size=N): transposed incidence matmul + VPU degree reduce ---
    node_iota_ne = jax.lax.broadcasted_iota(jnp.int32, (N, E), 0)
    s_col_t = (node_iota_ne == col_r_ref[...]).astype(f32)               # (N, E)
    agg_sum = jnp.dot(s_col_t, m, preferred_element_type=f32)            # (N, D)
    deg = jnp.sum(s_col_t, axis=1, keepdims=True)                        # (N, 1)
    # isolated nodes: agg_sum row is exactly 0 -> agg row is 0 (scatter_mean zero-fill)
    agg = agg_sum / jnp.maximum(deg, 1.0)

    # --- NodeModel mlp_2 on cat([x, agg]) ---
    h2 = (jnp.dot(x, w_ref[7 * D:8 * D, :], preferred_element_type=f32)
          + jnp.dot(agg, w_ref[8 * D:9 * D, :], preferred_element_type=f32)
          + b_ref[4:5, :])
    h2 = jnp.maximum(h2, 0.0)
    x_enc = jnp.dot(h2, w_ref[9 * D:10 * D, :], preferred_element_type=f32) + b_ref[5:6, :]  # (N, D)

    # --- GraphLayerNorm: per-graph mean/var over (nodes x channels) via one same-graph matmul ---
    same_graph = (bat_c_ref[...] == bat_r_ref[...]).astype(f32)          # (N, N)
    rs1 = jnp.sum(x_enc, axis=1, keepdims=True)                          # (N, 1) row sums
    rs2 = jnp.sum(x_enc * x_enc, axis=1, keepdims=True)                  # (N, 1) row sums of squares
    gsum = jnp.dot(same_graph, rs1, preferred_element_type=f32)          # (N, 1) graph sum per node
    gsq = jnp.dot(same_graph, rs2, preferred_element_type=f32)           # (N, 1)
    gcnt = jnp.sum(same_graph, axis=1, keepdims=True)                    # (N, 1) nodes in node's graph
    inv_cnt = 1.0 / (gcnt * D)
    mean = gsum * inv_cnt
    var = gsq * inv_cnt - mean * mean                                    # E[x^2] - mean^2
    x_norm = (x_enc - mean) * jax.lax.rsqrt(var + 1e-5)
    x_out = x_norm * b_ref[6:7, :] + b_ref[7:8, :]                       # gamma / beta

    out_ref[0:N, :] = x_out.astype(out_ref.dtype)
    out_ref[n_pad:n_pad + E, :] = e_new.astype(out_ref.dtype)


# ----------------------------------------------------------------------------
# Wrapper: packs params once, launches ONE pallas_call (no one_hot/scatter/transpose in XLA)
# ----------------------------------------------------------------------------
def _full_spec(shape):
    return pl.BlockSpec(shape, lambda i: (0,) * len(shape))


def pack_params(params):
    """Pack weights/biases into two slabs. Call ONCE, outside the jitted forward."""
    w = jnp.concatenate([params["w1e"], params["w2e"], params["w1n"], params["w2n"],
                         params["w1m"], params["w2m"]], axis=0)                      # (10*D, D)
    b = jnp.stack([params["b1e"], params["b2e"], params["b1n"], params["b2n"],
                   params["b1m"], params["b2m"], params["gamma"], params["beta"]], axis=0)  # (8, D)
    return {"emb": params["emb"], "w": w, "b": b}


@jax.jit
def sg_encoder_forward(packed, x_tokens, edge_index, edge_attr_tokens, added_sym_edge, batch):
    emb = packed["emb"]
    V, D = emb.shape
    N = x_tokens.shape[0]
    E = edge_attr_tokens.shape[0]
    K = added_sym_edge.shape[0]
    n_pad = (N + 7) // 8 * 8

    # Only free reshapes / tiny row slices here; all mask construction happens in-kernel.
    row_c = edge_index[0].reshape(E, 1)
    col = edge_index[1]
    col_c = col.reshape(E, 1)
    col_r = col.reshape(1, E)
    bat_c = batch.reshape(N, 1)
    bat_r = batch.reshape(1, N)
    sym = added_sym_edge.reshape(1, K)

    in_arrays = [x_tokens, edge_attr_tokens, row_c, col_c, col_r, bat_c, bat_r, sym,
                 emb, packed["w"], packed["b"]]

    fused = pl.pallas_call(
        _sg_encoder_kernel,
        grid=(1,),
        in_specs=[_full_spec(a.shape) for a in in_arrays],
        out_specs=_full_spec((n_pad + E, D)),
        out_shape=jax.ShapeDtypeStruct((n_pad + E, D), jnp.float32),
        compiler_params=pltpu.CompilerParams(dimension_semantics=("arbitrary",)),
    )(*in_arrays)

    return fused[:N], fused[n_pad:n_pad + E], None


# ----------------------------------------------------------------------------
# Pure-JAX reference (independent formulation: explicit gathers / scatter-adds)
# ----------------------------------------------------------------------------
def sg_encoder_reference(params, x_tokens, edge_index, edge_attr_tokens,
                         added_sym_edge, batch, num_graphs):
    f32 = jnp.float32
    emb = params["emb"]
    D = emb.shape[1]
    N = x_tokens.shape[0]
    E = edge_attr_tokens.shape[0]
    G = num_graphs

    x = jnp.sum(jnp.take(emb, x_tokens, axis=0), axis=1)                       # (N, D)
    ea_tok = jnp.take(emb, edge_attr_tokens, axis=0)                           # (E, T, D)
    sign = jnp.ones((E,), f32).at[added_sym_edge].set(-1.0)
    ea = jnp.sum(ea_tok * sign[:, None, None], axis=1)                         # (E, D)

    row, col = edge_index[0], edge_index[1]
    src, dst = x[row], x[col]

    h = jnp.maximum(jnp.concatenate([src, dst, ea], axis=1) @ params["w1e"] + params["b1e"], 0.0)
    e_new = h @ params["w2e"] + params["b2e"]

    h1 = jnp.maximum(jnp.concatenate([src, e_new], axis=1) @ params["w1n"] + params["b1n"], 0.0)
    m = h1 @ params["w2n"] + params["b2n"]

    agg_sum = jnp.zeros((N, D), f32).at[col].add(m)
    deg = jnp.zeros((N,), f32).at[col].add(1.0)
    agg = agg_sum / jnp.maximum(deg, 1.0)[:, None]

    h2 = jnp.maximum(jnp.concatenate([x, agg], axis=1) @ params["w1m"] + params["b1m"], 0.0)
    x_enc = h2 @ params["w2m"] + params["b2m"]

    n_g = jnp.zeros((G,), f32).at[batch].add(1.0)
    mean_g = jnp.zeros((G,), f32).at[batch].add(jnp.sum(x_enc, axis=-1)) / (n_g * D)
    cen = x_enc - mean_g[batch][:, None]
    var_g = jnp.zeros((G,), f32).at[batch].add(jnp.sum(cen * cen, axis=-1)) / (n_g * D)
    x_norm = cen * jax.lax.rsqrt(var_g[batch][:, None] + 1e-5)
    return x_norm * params["gamma"] + params["beta"], e_new


# ----------------------------------------------------------------------------
# Deterministic parameter initialization
# ----------------------------------------------------------------------------
def init_params(key, vocab_size, emb_dim, pad_idx):
    D = emb_dim
    ks = iter(jax.random.split(key, 32))

    def w(shape, scale=0.1):
        return scale * jax.random.normal(next(ks), shape, dtype=jnp.float32)

    emb = w((vocab_size, D), scale=0.5)
    emb = emb.at[pad_idx].set(0.0)    # nn.Embedding padding_idx row is zero
    return {
        "emb": emb,
        # EdgeModel.edge_mlp : Lin(3D, D) -> ReLU -> Lin(D, D)
        "w1e": w((3 * D, D)), "b1e": w((D,), 0.05), "w2e": w((D, D)), "b2e": w((D,), 0.05),
        # NodeModel.node_mlp_1 : Lin(2D, D) -> ReLU -> Lin(D, D)
        "w1n": w((2 * D, D)), "b1n": w((D,), 0.05), "w2n": w((D, D)), "b2n": w((D,), 0.05),
        # NodeModel.node_mlp_2 : Lin(2D, D) -> ReLU -> Lin(D, D)
        "w1m": w((2 * D, D)), "b1m": w((D,), 0.05), "w2m": w((D, D)), "b2m": w((D,), 0.05),
        # GraphLayerNorm affine
        "gamma": jnp.ones((D,), jnp.float32), "beta": jnp.zeros((D,), jnp.float32),
    }


# ----------------------------------------------------------------------------
# main
# ----------------------------------------------------------------------------
if __name__ == "__main__":
    # Small config consistent with SGEncoder (graphVQAConfig scaled down).
    sg_vocab_size = 64
    sg_emb_dim = 32           # graphVQAConfig.text_emb_dim (scaled down)
    sg_pad_token = 0
    num_nodes = 12
    num_edges = 18
    tokens_per_node = 3
    tokens_per_edge = 3
    num_graphs = 2

    root = jax.random.PRNGKey(0)
    k_par, k_x, k_e, k_r, k_c = jax.random.split(root, 5)

    params = init_params(k_par, sg_vocab_size, sg_emb_dim, sg_pad_token)
    packed = pack_params(params)   # done once; the jitted forward only sees the packed slabs

    x_tokens = jax.random.randint(k_x, (num_nodes, tokens_per_node), 0, sg_vocab_size, dtype=jnp.int32)
    edge_attr_tokens = jax.random.randint(k_e, (num_edges, tokens_per_edge), 0, sg_vocab_size, dtype=jnp.int32)

    # Two graphs of 6 nodes each; edges stay inside their own graph.
    half_nodes = num_nodes // num_graphs
    batch = jnp.repeat(jnp.arange(num_graphs, dtype=jnp.int32), half_nodes)
    row = jax.random.randint(k_r, (num_edges,), 0, half_nodes, dtype=jnp.int32)
    col = jax.random.randint(k_c, (num_edges,), 0, half_nodes, dtype=jnp.int32)
    shift = jnp.where(jnp.arange(num_edges) >= num_edges // 2, half_nodes, 0).astype(jnp.int32)
    edge_index = jnp.stack([row + shift, col + shift])                  # (2, E)
    added_sym_edge = jnp.array([1, 4, 9, 16], dtype=jnp.int32)          # edges whose embeddings are negated

    x_enc, e_enc, u = sg_encoder_forward(
        packed, x_tokens, edge_index, edge_attr_tokens, added_sym_edge, batch)
    jax.block_until_ready((x_enc, e_enc))

    x_ref, e_ref = sg_encoder_reference(
        params, x_tokens, edge_index, edge_attr_tokens, added_sym_edge, batch, num_graphs)

    assert x_enc.shape == (num_nodes, sg_emb_dim)
    assert e_enc.shape == (num_edges, sg_emb_dim)
    assert u is None
    assert bool(jnp.all(jnp.isfinite(x_enc))) and bool(jnp.all(jnp.isfinite(e_enc)))
    assert bool(jnp.allclose(x_enc, x_ref, atol=2e-2, rtol=2e-2)), \
        float(jnp.max(jnp.abs(x_enc - x_ref)))
    assert bool(jnp.allclose(e_enc, e_ref, atol=2e-2, rtol=2e-2)), \
        float(jnp.max(jnp.abs(e_enc - e_ref)))

    print("KERNEL_OK")
</pallas_src>

<mosaic_0001>
module attributes {stable_mosaic.version = 11 : i64} {
  func.func @_sg_encoder_kernel(%arg0: i32, %arg1: memref<12x3xi32, #tpu.memory_space<vmem>>, %arg2: memref<18x3xi32, #tpu.memory_space<vmem>>, %arg3: memref<18x1xi32, #tpu.memory_space<vmem>>, %arg4: memref<18x1xi32, #tpu.memory_space<vmem>>, %arg5: memref<1x18xi32, #tpu.memory_space<vmem>>, %arg6: memref<12x1xi32, #tpu.memory_space<vmem>>, %arg7: memref<1x12xi32, #tpu.memory_space<vmem>>, %arg8: memref<1x4xi32, #tpu.memory_space<vmem>>, %arg9: memref<64x32xf32, #tpu.memory_space<vmem>>, %arg10: memref<320x32xf32, #tpu.memory_space<vmem>>, %arg11: memref<8x32xf32, #tpu.memory_space<vmem>>, %arg12: memref<34x32xf32, #tpu.memory_space<vmem>>) attributes {dimension_semantics = [#tpu.dimension_semantics<arbitrary>], iteration_bounds = array<i64: 1>, scalar_prefetch = 0 : i64, scratch_operands = 0 : i64, tpu.core_type = #tpu.core_type<tc>, window_params = [{pipeline_mode = #tpu.pipeline_mode<synchronous>, transform_indices = @transform_0, window_bounds = array<i64: 12, 3>}, {pipeline_mode = #tpu.pipeline_mode<synchronous>, transform_indices = @transform_1, window_bounds = array<i64: 18, 3>}, {pipeline_mode = #tpu.pipeline_mode<synchronous>, transform_indices = @transform_2, window_bounds = array<i64: 18, 1>}, {pipeline_mode = #tpu.pipeline_mode<synchronous>, transform_indices = @transform_3, window_bounds = array<i64: 18, 1>}, {pipeline_mode = #tpu.pipeline_mode<synchronous>, transform_indices = @transform_4, window_bounds = array<i64: 1, 18>}, {pipeline_mode = #tpu.pipeline_mode<synchronous>, transform_indices = @transform_5, window_bounds = array<i64: 12, 1>}, {pipeline_mode = #tpu.pipeline_mode<synchronous>, transform_indices = @transform_6, window_bounds = array<i64: 1, 12>}, {pipeline_mode = #tpu.pipeline_mode<synchronous>, transform_indices = @transform_7, window_bounds = array<i64: 1, 4>}, {pipeline_mode = #tpu.pipeline_mode<synchronous>, transform_indices = @transform_8, window_bounds = array<i64: 64, 32>}, {pipeline_mode = #tpu.pipeline_mode<synchronous>, transform_indices = @transform_9, window_bounds = array<i64: 320, 32>}, {pipeline_mode = #tpu.pipeline_mode<synchronous>, transform_indices = @transform_10, window_bounds = array<i64: 8, 32>}, {pipeline_mode = #tpu.pipeline_mode<synchronous>, transform_indices = @transform_11, window_bounds = array<i64: 34, 32>}]} {
    %c0 = arith.constant 0 : index
    %c0_0 = arith.constant 0 : index
    %0 = vector.load %arg9[%c0, %c0_0] : memref<64x32xf32, #tpu.memory_space<vmem>>, vector<64x32xf32>
    %1 = tpu.iota {dimensions = array<i32: 1>} : vector<12x64xi32>
    %cst = arith.constant 0.000000e+00 : f32
    %2 = vector.broadcast %cst : f32 to vector<12x64xf32>
    %c0_1 = arith.constant 0 : index
    %c0_2 = arith.constant 0 : index
    %3 = vector.load %arg1[%c0_1, %c0_2] : memref<12x3xi32, #tpu.memory_space<vmem>>, vector<12x1xi32>
    %4 = vector.broadcast %3 : vector<12x1xi32> to vector<12x64xi32>
    %5 = arith.cmpi eq, %1, %4 : vector<12x64xi32>
    %6 = arith.extui %5 : vector<12x64xi1> to vector<12x64xi32>
    %7 = arith.sitofp %6 : vector<12x64xi32> to vector<12x64xf32>
    %8 = arith.addf %2, %7 : vector<12x64xf32>
    %c0_3 = arith.constant 0 : index
    %c1 = arith.constant 1 : index
    %9 = vector.load %arg1[%c0_3, %c1] : memref<12x3xi32, #tpu.memory_space<vmem>>, vector<12x1xi32>
    %10 = vector.broadcast %9 : vector<12x1xi32> to vector<12x64xi32>
    %11 = arith.cmpi eq, %1, %10 : vector<12x64xi32>
    %12 = arith.extui %11 : vector<12x64xi1> to vector<12x64xi32>
    %13 = arith.sitofp %12 : vector<12x64xi32> to vector<12x64xf32>
    %14 = arith.addf %8, %13 : vector<12x64xf32>
    %c0_4 = arith.constant 0 : index
    %c2 = arith.constant 2 : index
    %15 = vector.load %arg1[%c0_4, %c2] : memref<12x3xi32, #tpu.memory_space<vmem>>, vector<12x1xi32>
    %16 = vector.broadcast %15 : vector<12x1xi32> to vector<12x64xi32>
    %17 = arith.cmpi eq, %1, %16 : vector<12x64xi32>
    %18 = arith.extui %17 : vector<12x64xi1> to vector<12x64xi32>
    %19 = arith.sitofp %18 : vector<12x64xi32> to vector<12x64xf32>
    %20 = arith.addf %14, %19 : vector<12x64xf32>
    %cst_5 = arith.constant dense<0.000000e+00> : vector<12x32xf32>
    %21 = tpu.matmul %20, %0, %cst_5 {dimension_numbers = #tpu.dot_dimension_numbers<[1], [0], [0], [1], [0, 0, 1, 1], [], []>, precision = #tpu.contract_precision<fp32>} : vector<12x64xf32>, vector<64x32xf32>, vector<12x32xf32> -> vector<12x32xf32>
    %22 = tpu.iota {dimensions = array<i32: 1>} : vector<18x64xi32>
    %cst_6 = arith.constant 0.000000e+00 : f32
    %23 = vector.broadcast %cst_6 : f32 to vector<18x64xf32>
    %c0_7 = arith.constant 0 : index
    %c0_8 = arith.constant 0 : index
    %24 = vector.load %arg2[%c0_7, %c0_8] : memref<18x3xi32, #tpu.memory_space<vmem>>, vector<18x1xi32>
    %25 = vector.broadcast %24 : vector<18x1xi32> to vector<18x64xi32>
    %26 = arith.cmpi eq, %22, %25 : vector<18x64xi32>
    %27 = arith.extui %26 : vector<18x64xi1> to vector<18x64xi32>
    %28 = arith.sitofp %27 : vector<18x64xi32> to vector<18x64xf32>
    %29 = arith.addf %23, %28 : vector<18x64xf32>
    %c0_9 = arith.constant 0 : index
    %c1_10 = arith.constant 1 : index
    %30 = vector.load %arg2[%c0_9, %c1_10] : memref<18x3xi32, #tpu.memory_space<vmem>>, vector<18x1xi32>
    %31 = vector.broadcast %30 : vector<18x1xi32> to vector<18x64xi32>
    %32 = arith.cmpi eq, %22, %31 : vector<18x64xi32>
    %33 = arith.extui %32 : vector<18x64xi1> to vector<18x64xi32>
    %34 = arith.sitofp %33 : vector<18x64xi32> to vector<18x64xf32>
    %35 = arith.addf %29, %34 : vector<18x64xf32>
    %c0_11 = arith.constant 0 : index
    %c2_12 = arith.constant 2 : index
    %36 = vector.load %arg2[%c0_11, %c2_12] : memref<18x3xi32, #tpu.memory_space<vmem>>, vector<18x1xi32>
    %37 = vector.broadcast %36 : vector<18x1xi32> to vector<18x64xi32>
    %38 = arith.cmpi eq, %22, %37 : vector<18x64xi32>
    %39 = arith.extui %38 : vector<18x64xi1> to vector<18x64xi32>
    %40 = arith.sitofp %39 : vector<18x64xi32> to vector<18x64xf32>
    %41 = arith.addf %35, %40 : vector<18x64xf32>
    %42 = tpu.iota {dimensions = array<i32: 0>} : vector<18x4xi32>
    %c0_13 = arith.constant 0 : index
    %c0_14 = arith.constant 0 : index
    %43 = vector.load %arg8[%c0_13, %c0_14] : memref<1x4xi32, #tpu.memory_space<vmem>>, vector<1x4xi32>
    %44 = vector.broadcast %43 : vector<1x4xi32> to vector<18x4xi32>
    %45 = arith.cmpi eq, %42, %44 : vector<18x4xi32>
    %46 = arith.extui %45 : vector<18x4xi1> to vector<18x4xi32>
    %47 = arith.sitofp %46 : vector<18x4xi32> to vector<18x4xf32>
    %cst_15 = arith.constant dense<0.000000e+00> : vector<18xf32>
    %48 = vector.multi_reduction <add>, %47, %cst_15 [1] : vector<18x4xf32> to vector<18xf32>
    %49 = vector.shape_cast %48 : vector<18xf32> to vector<18x1xf32>
    %cst_16 = arith.constant 5.000000e-01 : f32
    %50 = vector.broadcast %cst_16 : f32 to vector<18x1xf32>
    %51 = arith.cmpf ogt, %49, %50 : vector<18x1xf32>
    %cst_17 = arith.constant -1.000000e+00 : f32
    %cst_18 = arith.constant 1.000000e+00 : f32
    %52 = vector.broadcast %cst_17 : f32 to vector<18x1xf32>
    %53 = vector.broadcast %cst_18 : f32 to vector<18x1xf32>
    %54 = arith.select %51, %52, %53 : vector<18x1xi1>, vector<18x1xf32>
    %cst_19 = arith.constant dense<0.000000e+00> : vector<18x32xf32>
    %55 = tpu.matmul %41, %0, %cst_19 {dimension_numbers = #tpu.dot_dimension_numbers<[1], [0], [0], [1], [0, 0, 1, 1], [], []>, precision = #tpu.contract_precision<fp32>} : vector<18x64xf32>, vector<64x32xf32>, vector<18x32xf32> -> vector<18x32xf32>
    %56 = vector.broadcast %54 : vector<18x1xf32> to vector<18x32xf32>
    %57 = arith.mulf %55, %56 : vector<18x32xf32>
    %58 = tpu.iota {dimensions = array<i32: 1>} : vector<18x12xi32>
    %c0_20 = arith.constant 0 : index
    %c0_21 = arith.constant 0 : index
    %59 = vector.load %arg3[%c0_20, %c0_21] : memref<18x1xi32, #tpu.memory_space<vmem>>, vector<18x1xi32>
    %60 = vector.broadcast %59 : vector<18x1xi32> to vector<18x12xi32>
    %61 = arith.cmpi eq, %58, %60 : vector<18x12xi32>
    %62 = arith.extui %61 : vector<18x12xi1> to vector<18x12xi32>
    %63 = arith.sitofp %62 : vector<18x12xi32> to vector<18x12xf32>
    %c0_22 = arith.constant 0 : index
    %c0_23 = arith.constant 0 : index
    %64 = vector.load %arg4[%c0_22, %c0_23] : memref<18x1xi32, #tpu.memory_space<vmem>>, vector<18x1xi32>
    %65 = vector.broadcast %64 : vector<18x1xi32> to vector<18x12xi32>
    %66 = arith.cmpi eq, %58, %65 : vector<18x12xi32>
    %67 = arith.extui %66 : vector<18x12xi1> to vector<18x12xi32>
    %68 = arith.sitofp %67 : vector<18x12xi32> to vector<18x12xf32>
    %cst_24 = arith.constant dense<0.000000e+00> : vector<18x32xf32>
    %69 = tpu.matmul %63, %21, %cst_24 {dimension_numbers = #tpu.dot_dimension_numbers<[1], [0], [0], [1], [0, 0, 1, 1], [], []>, precision = #tpu.contract_precision<fp32>} : vector<18x12xf32>, vector<12x32xf32>, vector<18x32xf32> -> vector<18x32xf32>
    %cst_25 = arith.constant dense<0.000000e+00> : vector<18x32xf32>
    %70 = tpu.matmul %68, %21, %cst_25 {dimension_numbers = #tpu.dot_dimension_numbers<[1], [0], [0], [1], [0, 0, 1, 1], [], []>, precision = #tpu.contract_precision<fp32>} : vector<18x12xf32>, vector<12x32xf32>, vector<18x32xf32> -> vector<18x32xf32>
    %c0_26 = arith.constant 0 : index
    %c0_27 = arith.constant 0 : index
    %71 = vector.load %arg10[%c0_26, %c0_27] : memref<320x32xf32, #tpu.memory_space<vmem>>, vector<32x32xf32>
    %cst_28 = arith.constant dense<0.000000e+00> : vector<18x32xf32>
    %72 = tpu.matmul %69, %71, %cst_28 {dimension_numbers = #tpu.dot_dimension_numbers<[1], [0], [0], [1], [0, 0, 1, 1], [], []>, precision = #tpu.contract_precision<fp32>} : vector<18x32xf32>, vector<32x32xf32>, vector<18x32xf32> -> vector<18x32xf32>
    %c32 = arith.constant 32 : index
    %c0_29 = arith.constant 0 : index
    %73 = vector.load %arg10[%c32, %c0_29] : memref<320x32xf32, #tpu.memory_space<vmem>>, vector<32x32xf32>
    %cst_30 = arith.constant dense<0.000000e+00> : vector<18x32xf32>
    %74 = tpu.matmul %70, %73, %cst_30 {dimension_numbers = #tpu.dot_dimension_numbers<[1], [0], [0], [1], [0, 0, 1, 1], [], []>, precision = #tpu.contract_precision<fp32>} : vector<18x32xf32>, vector<32x32xf32>, vector<18x32xf32> -> vector<18x32xf32>
    %75 = arith.addf %72, %74 : vector<18x32xf32>
    %c64 = arith.constant 64 : index
    %c0_31 = arith.constant 0 : index
    %76 = vector.load %arg10[%c64, %c0_31] : memref<320x32xf32, #tpu.memory_space<vmem>>, vector<32x32xf32>
    %cst_32 = arith.constant dense<0.000000e+00> : vector<18x32xf32>
    %77 = tpu.matmul %57, %76, %cst_32 {dimension_numbers = #tpu.dot_dimension_numbers<[1], [0], [0], [1], [0, 0, 1, 1], [], []>, precision = #tpu.contract_precision<fp32>} : vector<18x32xf32>, vector<32x32xf32>, vector<18x32xf32> -> vector<18x32xf32>
    %78 = arith.addf %75, %77 : vector<18x32xf32>
    %c0_33 = arith.constant 0 : index
    %c0_34 = arith.constant 0 : index
    %79 = vector.load %arg11[%c0_33, %c0_34] : memref<8x32xf32, #tpu.memory_space<vmem>>, vector<1x32xf32>
    %80 = vector.broadcast %79 : vector<1x32xf32> to vector<18x32xf32>
    %81 = arith.addf %78, %80 : vector<18x32xf32>
    %cst_35 = arith.constant 0.000000e+00 : f32
    %82 = vector.broadcast %cst_35 : f32 to vector<18x32xf32>
    %83 = arith.maximumf %81, %82 : vector<18x32xf32>
    %c96 = arith.constant 96 : index
    %c0_36 = arith.constant 0 : index
    %84 = vector.load %arg10[%c96, %c0_36] : memref<320x32xf32, #tpu.memory_space<vmem>>, vector<32x32xf32>
    %cst_37 = arith.constant dense<0.000000e+00> : vector<18x32xf32>
    %85 = tpu.matmul %83, %84, %cst_37 {dimension_numbers = #tpu.dot_dimension_numbers<[1], [0], [0], [1], [0, 0, 1, 1], [], []>, precision = #tpu.contract_precision<fp32>} : vector<18x32xf32>, vector<32x32xf32>, vector<18x32xf32> -> vector<18x32xf32>
    %c1_38 = arith.constant 1 : index
    %c0_39 = arith.constant 0 : index
    %86 = vector.load %arg11[%c1_38, %c0_39] : memref<8x32xf32, #tpu.memory_space<vmem>>, vector<1x32xf32>
    %87 = vector.broadcast %86 : vector<1x32xf32> to vector<18x32xf32>
    %88 = arith.addf %85, %87 : vector<18x32xf32>
    %c128 = arith.constant 128 : index
    %c0_40 = arith.constant 0 : index
    %89 = vector.load %arg10[%c128, %c0_40] : memref<320x32xf32, #tpu.memory_space<vmem>>, vector<32x32xf32>
    %cst_41 = arith.constant dense<0.000000e+00> : vector<18x32xf32>
    %90 = tpu.matmul %69, %89, %cst_41 {dimension_numbers = #tpu.dot_dimension_numbers<[1], [0], [0], [1], [0, 0, 1, 1], [], []>, precision = #tpu.contract_precision<fp32>} : vector<18x32xf32>, vector<32x32xf32>, vector<18x32xf32> -> vector<18x32xf32>
    %c160 = arith.constant 160 : index
    %c0_42 = arith.constant 0 : index
    %91 = vector.load %arg10[%c160, %c0_42] : memref<320x32xf32, #tpu.memory_space<vmem>>, vector<32x32xf32>
    %cst_43 = arith.constant dense<0.000000e+00> : vector<18x32xf32>
    %92 = tpu.matmul %88, %91, %cst_43 {dimension_numbers = #tpu.dot_dimension_numbers<[1], [0], [0], [1], [0, 0, 1, 1], [], []>, precision = #tpu.contract_precision<fp32>} : vector<18x32xf32>, vector<32x32xf32>, vector<18x32xf32> -> vector<18x32xf32>
    %93 = arith.addf %90, %92 : vector<18x32xf32>
    %c2_44 = arith.constant 2 : index
    %c0_45 = arith.constant 0 : index
    %94 = vector.load %arg11[%c2_44, %c0_45] : memref<8x32xf32, #tpu.memory_space<vmem>>, vector<1x32xf32>
    %95 = vector.broadcast %94 : vector<1x32xf32> to vector<18x32xf32>
    %96 = arith.addf %93, %95 : vector<18x32xf32>
    %cst_46 = arith.constant 0.000000e+00 : f32
    %97 = vector.broadcast %cst_46 : f32 to vector<18x32xf32>
    %98 = arith.maximumf %96, %97 : vector<18x32xf32>
    %c192 = arith.constant 192 : index
    %c0_47 = arith.constant 0 : index
    %99 = vector.load %arg10[%c192, %c0_47] : memref<320x32xf32, #tpu.memory_space<vmem>>, vector<32x32xf32>
    %cst_48 = arith.constant dense<0.000000e+00> : vector<18x32xf32>
    %100 = tpu.matmul %98, %99, %cst_48 {dimension_numbers = #tpu.dot_dimension_numbers<[1], [0], [0], [1], [0, 0, 1, 1], [], []>, precision = #tpu.contract_precision<fp32>} : vector<18x32xf32>, vector<32x32xf32>, vector<18x32xf32> -> vector<18x32xf32>
    %c3 = arith.constant 3 : index
    %c0_49 = arith.constant 0 : index
    %101 = vector.load %arg11[%c3, %c0_49] : memref<8x32xf32, #tpu.memory_space<vmem>>, vector<1x32xf32>
    %102 = vector.broadcast %101 : vector<1x32xf32> to vector<18x32xf32>
    %103 = arith.addf %100, %102 : vector<18x32xf32>
    %104 = tpu.iota {dimensions = array<i32: 0>} : vector<12x18xi32>
    %c0_50 = arith.constant 0 : index
    %c0_51 = arith.constant 0 : index
    %105 = vector.load %arg5[%c0_50, %c0_51] : memref<1x18xi32, #tpu.memory_space<vmem>>, vector<1x18xi32>
    %106 = vector.broadcast %105 : vector<1x18xi32> to vector<12x18xi32>
    %107 = arith.cmpi eq, %104, %106 : vector<12x18xi32>
    %108 = arith.extui %107 : vector<12x18xi1> to vector<12x18xi32>
    %109 = arith.sitofp %108 : vector<12x18xi32> to vector<12x18xf32>
    %cst_52 = arith.constant dense<0.000000e+00> : vector<12x32xf32>
    %110 = tpu.matmul %109, %103, %cst_52 {dimension_numbers = #tpu.dot_dimension_numbers<[1], [0], [0], [1], [0, 0, 1, 1], [], []>, precision = #tpu.contract_precision<fp32>} : vector<12x18xf32>, vector<18x32xf32>, vector<12x32xf32> -> vector<12x32xf32>
    %cst_53 = arith.constant dense<0.000000e+00> : vector<12xf32>
    %111 = vector.multi_reduction <add>, %109, %cst_53 [1] : vector<12x18xf32> to vector<12xf32>
    %112 = vector.shape_cast %111 : vector<12xf32> to vector<12x1xf32>
    %cst_54 = arith.constant 1.000000e+00 : f32
    %113 = vector.broadcast %cst_54 : f32 to vector<12x1xf32>
    %114 = arith.maximumf %112, %113 : vector<12x1xf32>
    %115 = vector.broadcast %114 : vector<12x1xf32> to vector<12x32xf32>
    %116 = arith.divf %110, %115 : vector<12x32xf32>
    %c224 = arith.constant 224 : index
    %c0_55 = arith.constant 0 : index
    %117 = vector.load %arg10[%c224, %c0_55] : memref<320x32xf32, #tpu.memory_space<vmem>>, vector<32x32xf32>
    %cst_56 = arith.constant dense<0.000000e+00> : vector<12x32xf32>
    %118 = tpu.matmul %21, %117, %cst_56 {dimension_numbers = #tpu.dot_dimension_numbers<[1], [0], [0], [1], [0, 0, 1, 1], [], []>, precision = #tpu.contract_precision<fp32>} : vector<12x32xf32>, vector<32x32xf32>, vector<12x32xf32> -> vector<12x32xf32>
    %c256 = arith.constant 256 : index
    %c0_57 = arith.constant 0 : index
    %119 = vector.load %arg10[%c256, %c0_57] : memref<320x32xf32, #tpu.memory_space<vmem>>, vector<32x32xf32>
    %cst_58 = arith.constant dense<0.000000e+00> : vector<12x32xf32>
    %120 = tpu.matmul %116, %119, %cst_58 {dimension_numbers = #tpu.dot_dimension_numbers<[1], [0], [0], [1], [0, 0, 1, 1], [], []>, precision = #tpu.contract_precision<fp32>} : vector<12x32xf32>, vector<32x32xf32>, vector<12x32xf32> -> vector<12x32xf32>
    %121 = arith.addf %118, %120 : vector<12x32xf32>
    %c4 = arith.constant 4 : index
    %c0_59 = arith.constant 0 : index
    %122 = vector.load %arg11[%c4, %c0_59] : memref<8x32xf32, #tpu.memory_space<vmem>>, vector<1x32xf32>
    %123 = vector.broadcast %122 : vector<1x32xf32> to vector<12x32xf32>
    %124 = arith.addf %121, %123 : vector<12x32xf32>
    %cst_60 = arith.constant 0.000000e+00 : f32
    %125 = vector.broadcast %cst_60 : f32 to vector<12x32xf32>
    %126 = arith.maximumf %124, %125 : vector<12x32xf32>
    %c288 = arith.constant 288 : index
    %c0_61 = arith.constant 0 : index
    %127 = vector.load %arg10[%c288, %c0_61] : memref<320x32xf32, #tpu.memory_space<vmem>>, vector<32x32xf32>
    %cst_62 = arith.constant dense<0.000000e+00> : vector<12x32xf32>
    %128 = tpu.matmul %126, %127, %cst_62 {dimension_numbers = #tpu.dot_dimension_numbers<[1], [0], [0], [1], [0, 0, 1, 1], [], []>, precision = #tpu.contract_precision<fp32>} : vector<12x32xf32>, vector<32x32xf32>, vector<12x32xf32> -> vector<12x32xf32>
    %c5 = arith.constant 5 : index
    %c0_63 = arith.constant 0 : index
    %129 = vector.load %arg11[%c5, %c0_63] : memref<8x32xf32, #tpu.memory_space<vmem>>, vector<1x32xf32>
    %130 = vector.broadcast %129 : vector<1x32xf32> to vector<12x32xf32>
    %131 = arith.addf %128, %130 : vector<12x32xf32>
    %c0_64 = arith.constant 0 : index
    %c0_65 = arith.constant 0 : index
    %132 = vector.load %arg6[%c0_64, %c0_65] : memref<12x1xi32, #tpu.memory_space<vmem>>, vector<12x1xi32>
    %c0_66 = arith.constant 0 : index
    %c0_67 = arith.constant 0 : index
    %133 = vector.load %arg7[%c0_66, %c0_67] : memref<1x12xi32, #tpu.memory_space<vmem>>, vector<1x12xi32>
    %134 = vector.broadcast %132 : vector<12x1xi32> to vector<12x12xi32>
    %135 = vector.broadcast %133 : vector<1x12xi32> to vector<12x12xi32>
    %136 = arith.cmpi eq, %134, %135 : vector<12x12xi32>
    %137 = arith.extui %136 : vector<12x12xi1> to vector<12x12xi32>
    %138 = arith.sitofp %137 : vector<12x12xi32> to vector<12x12xf32>
    %cst_68 = arith.constant dense<0.000000e+00> : vector<12xf32>
    %139 = vector.multi_reduction <add>, %131, %cst_68 [1] : vector<12x32xf32> to vector<12xf32>
    %140 = vector.shape_cast %139 : vector<12xf32> to vector<12x1xf32>
    %141 = arith.mulf %131, %131 : vector<12x32xf32>
    %cst_69 = arith.constant dense<0.000000e+00> : vector<12xf32>
    %142 = vector.multi_reduction <add>, %141, %cst_69 [1] : vector<12x32xf32> to vector<12xf32>
    %143 = vector.shape_cast %142 : vector<12xf32> to vector<12x1xf32>
    %cst_70 = arith.constant dense<0.000000e+00> : vector<12x1xf32>
    %144 = tpu.matmul %138, %140, %cst_70 {dimension_numbers = #tpu.dot_dimension_numbers<[1], [0], [0], [1], [0, 0, 1, 1], [], []>, precision = #tpu.contract_precision<fp32>} : vector<12x12xf32>, vector<12x1xf32>, vector<12x1xf32> -> vector<12x1xf32>
    %cst_71 = arith.constant dense<0.000000e+00> : vector<12x1xf32>
    %145 = tpu.matmul %138, %143, %cst_71 {dimension_numbers = #tpu.dot_dimension_numbers<[1], [0], [0], [1], [0, 0, 1, 1], [], []>, precision = #tpu.contract_precision<fp32>} : vector<12x12xf32>, vector<12x1xf32>, vector<12x1xf32> -> vector<12x1xf32>
    %cst_72 = arith.constant dense<0.000000e+00> : vector<12xf32>
    %146 = vector.multi_reduction <add>, %138, %cst_72 [1] : vector<12x12xf32> to vector<12xf32>
    %147 = vector.shape_cast %146 : vector<12xf32> to vector<12x1xf32>
    %cst_73 = arith.constant 3.200000e+01 : f32
    %148 = vector.broadcast %cst_73 : f32 to vector<12x1xf32>
    %149 = arith.mulf %147, %148 : vector<12x1xf32>
    %cst_74 = arith.constant 1.000000e+00 : f32
    %150 = vector.broadcast %cst_74 : f32 to vector<12x1xf32>
    %151 = arith.divf %150, %149 : vector<12x1xf32>
    %152 = arith.mulf %144, %151 : vector<12x1xf32>
    %153 = arith.mulf %145, %151 : vector<12x1xf32>
    %154 = arith.mulf %152, %152 : vector<12x1xf32>
    %155 = arith.subf %153, %154 : vector<12x1xf32>
    %156 = vector.broadcast %152 : vector<12x1xf32> to vector<12x32xf32>
    %157 = arith.subf %131, %156 : vector<12x32xf32>
    %cst_75 = arith.constant 9.99999974E-6 : f32
    %158 = vector.broadcast %cst_75 : f32 to vector<12x1xf32>
    %159 = arith.addf %155, %158 : vector<12x1xf32>
    %160 = math.rsqrt %159 : vector<12x1xf32>
    %161 = vector.broadcast %160 : vector<12x1xf32> to vector<12x32xf32>
    %162 = arith.mulf %157, %161 : vector<12x32xf32>
    %c6 = arith.constant 6 : index
    %c0_76 = arith.constant 0 : index
    %163 = vector.load %arg11[%c6, %c0_76] : memref<8x32xf32, #tpu.memory_space<vmem>>, vector<1x32xf32>
    %164 = vector.broadcast %163 : vector<1x32xf32> to vector<12x32xf32>
    %165 = arith.mulf %162, %164 : vector<12x32xf32>
    %c7 = arith.constant 7 : index
    %c0_77 = arith.constant 0 : index
    %166 = vector.load %arg11[%c7, %c0_77] : memref<8x32xf32, #tpu.memory_space<vmem>>, vector<1x32xf32>
    %167 = vector.broadcast %166 : vector<1x32xf32> to vector<12x32xf32>
    %168 = arith.addf %165, %167 : vector<12x32xf32>
    %c0_78 = arith.constant 0 : index
    %c0_79 = arith.constant 0 : index
    %169 = vector.load %arg12[%c0_78, %c0_79] : memref<34x32xf32, #tpu.memory_space<vmem>>, vector<12x32xf32>
    tpu.vector_store %arg12[%c0_78, %c0_79], %168 {strides = array<i32>} : memref<34x32xf32, #tpu.memory_space<vmem>>, vector<12x32xf32>,
    %c16 = arith.constant 16 : index
    %c0_80 = arith.constant 0 : index
    %170 = vector.load %arg12[%c16, %c0_80] : memref<34x32xf32, #tpu.memory_space<vmem>>, vector<18x32xf32>
    tpu.vector_store %arg12[%c16, %c0_80], %88 {strides = array<i32>} : memref<34x32xf32, #tpu.memory_space<vmem>>, vector<18x32xf32>,
    return
  }
  func.func @transform_0(%arg0: i32) -> (i32, i32) {
    %c0_i32 = arith.constant 0 : i32
    %c0_i32_0 = arith.constant 0 : i32
    %c0_i32_1 = arith.constant 0 : i32
    return %c0_i32, %c0_i32_0 : i32, i32
  }
  func.func @transform_1(%arg0: i32) -> (i32, i32) {
    %c0_i32 = arith.constant 0 : i32
    %c0_i32_0 = arith.constant 0 : i32
    %c0_i32_1 = arith.constant 0 : i32
    return %c0_i32, %c0_i32_0 : i32, i32
  }
  func.func @transform_2(%arg0: i32) -> (i32, i32) {
    %c0_i32 = arith.constant 0 : i32
    %c0_i32_0 = arith.constant 0 : i32
    %c0_i32_1 = arith.constant 0 : i32
    return %c0_i32, %c0_i32_0 : i32, i32
  }
  func.func @transform_3(%arg0: i32) -> (i32, i32) {
    %c0_i32 = arith.constant 0 : i32
    %c0_i32_0 = arith.constant 0 : i32
    %c0_i32_1 = arith.constant 0 : i32
    return %c0_i32, %c0_i32_0 : i32, i32
  }
  func.func @transform_4(%arg0: i32) -> (i32, i32) {
    %c0_i32 = arith.constant 0 : i32
    %c0_i32_0 = arith.constant 0 : i32
    %c0_i32_1 = arith.constant 0 : i32
    return %c0_i32, %c0_i32_0 : i32, i32
  }
  func.func @transform_5(%arg0: i32) -> (i32, i32) {
    %c0_i32 = arith.constant 0 : i32
    %c0_i32_0 = arith.constant 0 : i32
    %c0_i32_1 = arith.constant 0 : i32
    return %c0_i32, %c0_i32_0 : i32, i32
  }
  func.func @transform_6(%arg0: i32) -> (i32, i32) {
    %c0_i32 = arith.constant 0 : i32
    %c0_i32_0 = arith.constant 0 : i32
    %c0_i32_1 = arith.constant 0 : i32
    return %c0_i32, %c0_i32_0 : i32, i32
  }
  func.func @transform_7(%arg0: i32) -> (i32, i32) {
    %c0_i32 = arith.constant 0 : i32
    %c0_i32_0 = arith.constant 0 : i32
    %c0_i32_1 = arith.constant 0 : i32
    return %c0_i32, %c0_i32_0 : i32, i32
  }
  func.func @transform_8(%arg0: i32) -> (i32, i32) {
    %c0_i32 = arith.constant 0 : i32
    %c0_i32_0 = arith.constant 0 : i32
    %c0_i32_1 = arith.constant 0 : i32
    return %c0_i32, %c0_i32_0 : i32, i32
  }
  func.func @transform_9(%arg0: i32) -> (i32, i32) {
    %c0_i32 = arith.constant 0 : i32
    %c0_i32_0 = arith.constant 0 : i32
    %c0_i32_1 = arith.constant 0 : i32
    return %c0_i32, %c0_i32_0 : i32, i32
  }
  func.func @transform_10(%arg0: i32) -> (i32, i32) {
    %c0_i32 = arith.constant 0 : i32
    %c0_i32_0 = arith.constant 0 : i32
    %c0_i32_1 = arith.constant 0 : i32
    return %c0_i32, %c0_i32_0 : i32, i32
  }
  func.func @transform_11(%arg0: i32) -> (i32, i32) {
    %c0_i32 = arith.constant 0 : i32
    %c0_i32_0 = arith.constant 0 : i32
    %c0_i32_1 = arith.constant 0 : i32
    return %c0_i32, %c0_i32_0 : i32, i32
  }
}

</mosaic_0001>

<bundles_post_ra>
// kernel: sg_encoder_forward.1
= control target key start
LH: loop header
LB: loop body
LE: loop exit
PB: predicated region body
PF: predicated region fallthrough
CT: control target
= control target key end

     0   :  { %v12230_v0 = vmov 0   ;;  %v12231_v17 = vmov 1   ;;  %v12232_v33 = vmov 2   ;;  %v46_v60 = vlaneseq  ;;  %s14753_s0 = inlined_call_operand.vmem [shape: s32[12,3], index: 0, kind: input, shape index: {}]   ;;  %s14754_s8 = inlined_call_operand.vmem [shape: f32[64,32], index: 8, kind: input, shape index: {}]   ;;  %s14755_s1 = inlined_call_operand.vmem [shape: s32[18,3], index: 1, kind: input, shape index: {}]   ;;  %s14756_s2 = inlined_call_operand.vmem [shape: s32[18,1], index: 2, kind: input, shape index: {}]   ;;  %s14757_s3 = inlined_call_operand.vmem [shape: s32[18,1], index: 3, kind: input, shape index: {}]   ;;  %s14758_s7 = inlined_call_operand.vmem [shape: s32[1,4], index: 7, kind: input, shape index: {}]   ;;  %s14759_s4 = inlined_call_operand.vmem [shape: s32[1,18], index: 4, kind: input, shape index: {}]   ;;  %s14760_s9 = inlined_call_operand.vmem [shape: f32[320,32], index: 9, kind: input, shape index: {}]   ;;  %s14761_s10 = inlined_call_operand.vmem [shape: f32[8,32], index: 10, kind: input, shape index: {}]   ;;  %s14762_s11 = inlined_call_operand.vmem [shape: f32[34,32], index: 11, kind: output, shape index: {}]   ;;  %s14763_s5 = inlined_call_operand.vmem [shape: s32[12,1], index: 5, kind: input, shape index: {}]   ;;  %s14764_s6 = inlined_call_operand.vmem [shape: s32[1,12], index: 6, kind: input, shape index: {}]  }
   0x1   :  { %12204 = vset.pattern.permute.xlu1 %v12230_v0  ;;  %12202 = vset.pattern.permute.xlu0 %v12230_v0  ;;  %v49_v1 = vld [vmem:[%s14753_s0 + $0x8] sm:$0xf]  ;;  %v48_v2 = vld [vmem:[%s14753_s0] sm:$0xff]  ;;  %v45_v3 = vld [vmem:[%s14754_s8 + $0x38] sm:$0xff]  ;;  %vm92_vm6 = vcmask 523264  }
   0x2   :  { %54 = vperm.xlu1 %12204, %v49_v1   ;;  %51 = vperm.xlu0 %12202, %v48_v2   ;;  %v12307_v4 = vand.u32 4294901760, %v45_v3  ;;  %v44_v5 = vld [vmem:[%s14754_s8 + $0x30] sm:$0xff]  ;;  %v43_v6 = vld [vmem:[%s14754_s8 + $0x28] sm:$0xff]  ;;  %v42_v7 = vld [vmem:[%s14754_s8 + $0x20] sm:$0xff] }
   0x3   :  { %v12318_v8 = vand.u32 4294901760, %v44_v5  ;;  %v12320_v9 = vand.u32 4294901760, %v43_v6  ;;  %v12322_v10 = vand.u32 4294901760, %v42_v7  ;;  %v41_v11 = vld [vmem:[%s14754_s8 + $0x18] sm:$0xff]  ;;  %v40_v12 = vld [vmem:[%s14754_s8 + $0x10] sm:$0xff]  ;;  %v39_v13 = vld [vmem:[%s14754_s8 + $0x8] sm:$0xff] }
   0x4   :  { %v12334_v14 = vsub.f32 %v45_v3, %v12307_v4  ;;  %10726 = vmatprep.subr.mxu0 %v12307_v4  ;;  %v12337_v15 = vand.u32 4294901760, %v41_v11  ;;  %v12339_v16 = vand.u32 4294901760, %v40_v12  ;;  %v38_v21 = vld [vmem:[%s14754_s8] sm:$0xff]  ;;  %v12359_v24 = vand.u32 4294901760, %v39_v13  ;;  %v680_v50 = vld [vmem:[%s14755_s1 + $0x8] sm:$0xff] }
   0x5   :  { %v12342_v18 = vsub.f32 %v44_v5, %v12318_v8  ;;  %v12345_v19 = vsub.f32 %v43_v6, %v12320_v9  ;;  %v12348_v20 = vsub.f32 %v42_v7, %v12322_v10  ;;  %10727 = vmatpush3.msra.mxu0 %v12307_v4  ;;  %v12377_v30 = vand.u32 4294901760, %v38_v21  ;;  %v679_v39 = vld [vmem:[%s14755_s1] sm:$0xff]  ;;  %v681_v54 = vld [vmem:[%s14755_s1 + $0x10] sm:$0x3]  ;;  %v1416_v56 = vld [vmem:[%s14756_s2 + $0x8] sm:$0xff] }
   0x6   :  { %12205 = vset.pattern.permute.xlu1 %v12231_v17  ;;  %12203 = vset.pattern.permute.xlu0 %v12231_v17  ;;  %v12354_v22 = vand.u32 4294901760, %v12334_v14  ;;  %v12357_v23 = vsub.f32 %v41_v11, %v12337_v15  ;;  %v12375_v29 = vsub.f32 %v40_v12, %v12339_v16  ;;  %v12392_v36 = vsub.f32 %v39_v13, %v12359_v24  ;;  %v1415_v57 = vld [vmem:[%s14756_s2] sm:$0xff]  ;;  %v1417_v58 = vld [vmem:[%s14756_s2 + $0x10] sm:$0x3]  ;;  %v1437_v63 = vld [vmem:[%s14757_s3 + $0x8] sm:$0xff] }
   0x7   :  { %68 = vperm.xlu1 %12205, %v49_v1   ;;  %65 = vperm.xlu0 %12203, %v48_v2   ;;  %v12362_v25 = vand.u32 4294901760, %v12342_v18  ;;  %v12365_v26 = vand.u32 4294901760, %v12345_v19  ;;  %v12368_v27 = vand.u32 4294901760, %v12348_v20  ;;  %v12407_v41 = vsub.f32 %v38_v21, %v12377_v30  ;;  %v1436_v59 = vld [vmem:[%s14757_s3] sm:$0xff] }
   0x8   :  { %v212_v28 = vsub.f32 %v12334_v14, %v12354_v22  ;;  %10728 = vmatprep.subr.mxu0 %v12318_v8  ;;  %v12389_v35 = vand.u32 4294901760, %v12357_v23  ;;  %v12403_v40 = vand.u32 4294901760, %v12375_v29  ;;  %v12417_v44 = vand.u32 4294901760, %v12392_v36 }
   0x9   :  { %v219_v31 = vsub.f32 %v12342_v18, %v12362_v25  ;;  %v226_v32 = vsub.f32 %v12345_v19, %v12365_v26  ;;  %10729 = vmatpush3.msra.mxu0 %v12318_v8  ;;  %v233_v38 = vsub.f32 %v12348_v20, %v12368_v27  ;;  %v12427_v47 = vand.u32 4294901760, %v12407_v41 }
   0xa   :  { %v12386_v34 = vand.u32 4294901760, %v212_v28  ;;  %10730 = vmatprep.subr.mxu0 %v12320_v9  ;;  %v240_v43 = vsub.f32 %v12357_v23, %v12389_v35  ;;  %v247_v46 = vsub.f32 %v12375_v29, %v12403_v40  ;;  %v254_v49 = vsub.f32 %v12392_v36, %v12417_v44 }
   0xb   :  { %12206 = vset.pattern.permute.xlu1 %v12232_v33  ;;  %12207 = vset.pattern.permute.xlu0 %v12232_v33  ;;  %v12394_v37 = vand.u32 4294901760, %v219_v31  ;;  %v12410_v42 = vand.u32 4294901760, %v226_v32  ;;  %v12421_v45 = vand.u32 4294901760, %v233_v38  ;;  %v261_v52 = vsub.f32 %v12407_v41, %v12427_v47 }
   0xc   :  { %79 = vperm.xlu1 %12206, %v48_v2   ;;  %82 = vperm.xlu0 %12207, %v49_v1   ;;  %v12432_v48 = vand.u32 4294901760, %v240_v43  ;;  %v12441_v51 = vand.u32 4294901760, %v247_v46  ;;  %v12447_v53 = vand.u32 4294901760, %v254_v49  ;;  %v12495_v1 = vand.u32 127, %v46_v60 }
   0xd   :  { %10745 = vmatprep.subr.mxu1 %v12386_v34  ;;  %10731 = vmatpush3.msra.mxu0 %v12320_v9  ;;  %v12456_v55 = vand.u32 4294901760, %v261_v52  ;;  %v14769_v5 = vmov 0.0  }
   0xe   :  { %10746 = vmatpush3.msra.mxu1 %v12386_v34  ;;  %10732 = vmatprep.subr.mxu0 %v12322_v10 }
   0xf   :  { %10747 = vmatprep.subr.mxu1 %v12394_v37  ;;  %10733 = vmatpush3.msra.mxu0 %v12322_v10 }
  0x10   :  { %12208 = vset.pattern.permute.xlu1 %v12230_v0  ;;  %725 = vperm.xlu0 %12207, %v679_v39  }
  0x11   :  { %683 = vperm.xlu1 %12208, %v679_v39   ;;  %10748 = vmatpush3.msra.mxu1 %v12394_v37 }
  0x12   :  { %10749 = vmatprep.subr.mxu1 %v12410_v42  ;;  %10734 = vmatprep.subr.mxu0 %v12337_v15 }
  0x13   :  { %10750 = vmatpush3.msra.mxu1 %v12410_v42  ;;  %10735 = vmatpush3.msra.mxu0 %v12337_v15 }
  0x14   :  { %12211 = vset.pattern.permute.xlu0 %v12231_v17  ;;  %10751 = vmatprep.subr.mxu1 %v12421_v45 }
  0x15   :  { %12209 = vset.pattern.permute.xlu1 %v12231_v17  ;;  %707 = vperm.xlu0 %12211, %v680_v50  }
  0x16   :  { %704 = vperm.xlu1 %12209, %v679_v39   ;;  %10752 = vmatpush3.msra.mxu1 %v12421_v45 }
  0x17   :  { %10753 = vmatprep.subr.mxu1 %v12432_v48  ;;  %10736 = vmatprep.subr.mxu0 %v12339_v16 }
  0x18   :  { %10754 = vmatpush3.msra.mxu1 %v12432_v48  ;;  %10737 = vmatpush3.msra.mxu0 %v12339_v16 }
  0x19   :  { %710 = vperm.xlu0 %12211, %v681_v54   ;;  %10755 = vmatprep.subr.mxu1 %v12441_v51 }
  0x1a   :  { %12210 = vset.pattern.permute.xlu1 %v12230_v0  ;;  %10756 = vmatpush3.msra.mxu1 %v12441_v51 }
  0x1b   :  { %686 = vperm.xlu1 %12210, %v680_v50   ;;  %10757 = vmatprep.subr.mxu1 %v12447_v53 }
  0x1c   :  { %10758 = vmatpush3.msra.mxu1 %v12447_v53  ;;  %10738 = vmatprep.subr.mxu0 %v12359_v24 }
  0x1d   :  { %10759 = vmatprep.subr.mxu1 %v12456_v55  ;;  %10739 = vmatpush3.msra.mxu0 %v12359_v24 }
  0x1e   :  { %10760 = vmatpush3.msra.mxu1 %v12456_v55  ;;  %10740 = vmatprep.subr.mxu0 %v12377_v30 }
  0x1f   :  { %12212 = vset.pattern.permute.xlu1 %v12232_v33  ;;  %10783 = vmatprep.subr.mxu1 %v12307_v4 }
  0x20   :  { %728 = vperm.xlu1 %12212, %v680_v50   ;;  %10741 = vmatpush3.msra.mxu0 %v12377_v30 }
  0x21   :  { %12215 = vset.pattern.permute.xlu0 %v12230_v0  ;;  %10764 = vmatprep.subr.mxu0 %v12334_v14 }
  0x22   :  { %1419 = vperm.xlu0 %12215, %v1415_v57  }
  0x24   :  { %12213 = vset.pattern.permute.xlu1 %v12230_v0 }
  0x25   :  { %689 = vperm.xlu1 %12213, %v681_v54  }
  0x26   :  { %1440 = vperm.xlu0 %12215, %v1436_v59  }
  0x29   :  { %12214 = vset.pattern.permute.xlu1 %v12232_v33 }
  0x2a   :  { %731 = vperm.xlu1 %12214, %v681_v54  }
  0x2e   :  { %12216 = vset.pattern.permute.xlu1 %v12230_v0  ;;  %v1438_v0 = vld [vmem:[%s14757_s3 + $0x10] sm:$0x3] }
  0x2f   :  { %1422 = vperm.xlu1 %12216, %v1416_v56   ;;  %1446 = vperm.xlu0 %12215, %v1438_v0  }
  0x33   :  { %1425 = vperm.xlu1 %12216, %v1417_v58  }
  0x37   :  { %1443 = vperm.xlu1 %12216, %v1437_v63  }
  0x7d   :  { %v55_v61 = vpop.permute.xlu1 %54  ;;  %v52_v62 = vpop.permute.xlu0 %51 }
  0x7e   :  { %vm57_vm2 = vcmp.eq.s32.totalorder %v12495_v1, %v55_v61  ;;  %vm56_vm3 = vcmp.eq.s32.totalorder %v12495_v1, %v52_v62 }
  0x7f   :  { %v9986_v11 = vsel %vm57_vm2, 1.0, %v14769_v5  ;;  %v9985_v12 = vsel %vm56_vm3, 1.0, %v14769_v5  ;;  %vm763_vm2 = vcmask 31744  }
  0x82   :  { %v69_v2 = vpop.permute.xlu1 %68  ;;  %v66_v3 = vpop.permute.xlu0 %65 }
  0x83   :  { %vm71_vm0 = vcmp.eq.s32.totalorder %v12495_v1, %v69_v2  ;;  %vm70_vm1 = vcmp.eq.s32.totalorder %v12495_v1, %v66_v3 }
  0x84   :  { %v9988_v6 = vsel %vm71_vm0, 1.0, %v14769_v5  ;;  %v9987_v7 = vsel %vm70_vm1, 1.0, %v14769_v5  ;;  %vm12234_vm0 = vmmov 0  }
  0x85   :  { %v77_v21 = vadd.f32 %v9988_v6, %v9986_v11  ;;  %v76_v28 = vadd.f32 %v9987_v7, %v9985_v12 }
  0x87   :  { %v80_v13 = vpop.permute.xlu1 %79  ;;  %v83_v17 = vpop.permute.xlu0 %82 }
  0x88   :  { %vm84_vm4 = vcmp.eq.s32.totalorder %v12495_v1, %v80_v13  ;;  %vm85_vm5 = vcmp.eq.s32.totalorder %v12495_v1, %v83_v17 }
  0x89   :  { %v9989_v31 = vsel %vm84_vm4, 1.0, %v14769_v5  ;;  %v9990_v32 = vsel %vm85_vm5, 1.0, %v14769_v5  ;;  %vm770_vm5 = vcmask 25600  }
  0x8a   :  { %v90_v33 = vadd.f32 %v9989_v31, %v76_v28  ;;  %v91_v38 = vadd.f32 %v9990_v32, %v77_v21 }
  0x8b   :  { %v726_v2 = vpop.permute.xlu0 %725 }
  0x8c   :  { %v94_v39 = vsel %vm92_vm6, %v90_v33, 0  ;;  %v97_v43 = vsel %vm92_vm6, %v91_v38, 0  ;;  %v684_v62 = vpop.permute.xlu1 %683  ;;  %vm733_vm9 = vcmp.eq.s32.totalorder %v12495_v1, %v726_v2 }
  0x8d   :  { %v12511_v46 = vand.u32 4294901760, %v94_v39  ;;  %v12513_v49 = vand.u32 4294901760, %v97_v43  ;;  %vm691_vm7 = vcmp.eq.s32.totalorder %v12495_v1, %v684_v62  ;;  %v9997_v13 = vsel %vm733_vm9, 1.0, %v14769_v5 }
  0x8e   :  { %v9991_v3 = vsel %vm691_vm7, 1.0, %v14769_v5 }
  0x8f   :  { %v173_v50 = vsub.f32 %v94_v39, %v12511_v46  ;;  %v183_v52 = vsub.f32 %v97_v43, %v12513_v49  ;;  %10761 = vmatprep.mubr.f32.mxu1 %v12511_v46 }
  0x90   :  { %10762 = vmatmul.mubr.f32.vlgmr.msra.gmra.mxu1 %v12513_v49  ;;  %v708_v12 = vpop.permute.xlu0 %707 }
  0x91   :  { %10784 = vmatpush3.msra.mxu1 %v12307_v4  ;;  %v174_v54 = vand.u32 4294901760, %v173_v50  ;;  %v184_v56 = vand.u32 4294901760, %v183_v52  ;;  %v705_v63 = vpop.permute.xlu1 %704  ;;  %vm713_vm11 = vcmp.eq.s32.totalorder %v12495_v1, %v708_v12 }
  0x92   :  { %10785 = vmatprep.subr.mxu1 %v12318_v8  ;;  %vm712_vm8 = vcmp.eq.s32.totalorder %v12495_v1, %v705_v63  ;;  %v9995_v31 = vsel %vm713_vm11, 1.0, %v14769_v5  ;;  %vm1467_vm11 = vcmask 1043456  }
  0x93   :  { %10786 = vmatpush3.msra.mxu1 %v12318_v8  ;;  %10799 = vmatprep.mubr.f32.mxu1 %v174_v54  ;;  %v175_v57 = vsub.f32 %v173_v50, %v174_v54  ;;  %v185_v58 = vsub.f32 %v183_v52, %v184_v56  ;;  %v9994_v6 = vsel %vm712_vm8, 1.0, %v14769_v5  ;;  %vm1457_vm8 = vcmask 97280  }
  0x94   :  { %10787 = vmatprep.subr.mxu1 %v12320_v9  ;;  %v721_v11 = vadd.f32 %v9994_v6, %v9991_v3  ;;  %v711_v32 = vpop.permute.xlu0 %710 }
  0x95   :  { %10788 = vmatpush3.msra.mxu1 %v12320_v9  ;;  %v176_v59 = vand.u32 4294901760, %v175_v57  ;;  %v186_v61 = vand.u32 4294901760, %v185_v58  ;;  %vm714_vm14 = vcmp.eq.s32.totalorder %v12495_v1, %v711_v32 }
  0x96   :  { %10789 = vmatprep.subr.mxu1 %v12322_v10  ;;  %v687_v0 = vpop.permute.xlu1 %686  ;;  %v742_v17 = vadd.f32 %v9997_v13, %v721_v11  ;;  %v9996_v43 = vsel %vm714_vm14, 1.0, %v14769_v5 }
  0x97   :  { %10790 = vmatpush3.msra.mxu1 %v12322_v10  ;;  %10742 = vmatprep.mubr.f32.mxu0 %v176_v59  ;;  %vm692_vm10 = vcmp.eq.s32.totalorder %v12495_v1, %v687_v0 }
  0x98   :  { %10791 = vmatprep.subr.mxu1 %v12337_v15  ;;  %10743 = vmatmul.mubr.f32.vlgmr.msra.gmra.mxu0 %v186_v61  ;;  %v9992_v28 = vsel %vm692_vm10, 1.0, %v14769_v5 }
  0x99   :  { %10765 = vmatpush3.msra.mxu0 %v12334_v14  ;;  %10792 = vmatpush3.msra.mxu1 %v12337_v15 }
  0x9a   :  { %10766 = vmatprep.subr.mxu0 %v12342_v18  ;;  %10780 = vmatprep.mubr.f32.mxu0 %v173_v50 }
  0x9b   :  { %10793 = vmatprep.subr.mxu1 %v12339_v16  ;;  %10767 = vmatpush3.msra.mxu0 %v12342_v18  ;;  %v729_v7 = vpop.permute.xlu1 %728 }
  0x9c   :  { %10794 = vmatpush3.msra.mxu1 %v12339_v16  ;;  %10768 = vmatprep.subr.mxu0 %v12345_v19  ;;  %vm734_vm12 = vcmp.eq.s32.totalorder %v12495_v1, %v729_v7 }
  0x9d   :  { %10795 = vmatprep.subr.mxu1 %v12359_v24  ;;  %10769 = vmatpush3.msra.mxu0 %v12345_v19  ;;  %v9998_v33 = vsel %vm734_vm12, 1.0, %v14769_v5 }
  0x9e   :  { %10796 = vmatpush3.msra.mxu1 %v12359_v24  ;;  %10770 = vmatprep.subr.mxu0 %v12348_v20 }
  0x9f   :  { %10797 = vmatprep.subr.mxu1 %v12377_v30  ;;  %10771 = vmatpush3.msra.mxu0 %v12348_v20 }
  0xa0   :  { %10798 = vmatpush3.msra.mxu1 %v12377_v30  ;;  %10772 = vmatprep.subr.mxu0 %v12357_v23  ;;  %v690_v21 = vpop.permute.xlu1 %689 }
  0xa1   :  { %10800 = vmatmul.mubr.f32.vlgmr.msra.gmra.mxu1 %v184_v56  ;;  %10821 = vmatprep.subr.mxu1 %v12307_v4  ;;  %vm693_vm13 = vcmp.eq.s32.totalorder %v12495_v1, %v690_v21 }
  0xa2   :  { %10773 = vmatpush3.msra.mxu0 %v12357_v23  ;;  %10822 = vmatpush3.msra.mxu1 %v12307_v4 }
  0xa3   :  { %10837 = vmatprep.mubr.f32.mxu1 %v12511_v46  ;;  %10774 = vmatprep.subr.mxu0 %v12375_v29 }
  0xa4   :  { %10823 = vmatprep.subr.mxu1 %v12318_v8  ;;  %10775 = vmatpush3.msra.mxu0 %v12375_v29 }
  0xa5   :  { %10824 = vmatpush3.msra.mxu1 %v12318_v8  ;;  %10776 = vmatprep.subr.mxu0 %v12392_v36  ;;  %v732_v38 = vpop.permute.xlu1 %731 }
  0xa6   :  { %10825 = vmatprep.subr.mxu1 %v12320_v9  ;;  %10777 = vmatpush3.msra.mxu0 %v12392_v36  ;;  %vm735_vm15 = vcmp.eq.s32.totalorder %v12495_v1, %v732_v38 }
  0xa7   :  { %10826 = vmatpush3.msra.mxu1 %v12320_v9  ;;  %10778 = vmatprep.subr.mxu0 %v12407_v41 }
  0xa8   :  { %10827 = vmatprep.subr.mxu1 %v12322_v10  ;;  %10779 = vmatpush3.msra.mxu0 %v12407_v41 }
  0xa9   :  { %10828 = vmatpush3.msra.mxu1 %v12322_v10  ;;  %10781 = vmatmul.mubr.f32.vlgmr.msra.gmra.mxu0 %v183_v52 }
  0xaa   :  { %10802 = vmatprep.subr.mxu0 %v12354_v22  ;;  %10829 = vmatprep.subr.mxu1 %v12337_v15 }
  0xab   :  { %10803 = vmatpush3.msra.mxu0 %v12354_v22  ;;  %10818 = vmatprep.mubr.f32.mxu0 %v12511_v46 }
  0xac   :  { %10830 = vmatpush3.msra.mxu1 %v12337_v15  ;;  %10804 = vmatprep.subr.mxu0 %v12362_v25 }
  0xad   :  { %10831 = vmatprep.subr.mxu1 %v12339_v16  ;;  %10805 = vmatpush3.msra.mxu0 %v12362_v25 }
  0xae   :  { %10832 = vmatpush3.msra.mxu1 %v12339_v16  ;;  %10806 = vmatprep.subr.mxu0 %v12365_v26 }
  0xaf   :  { %10833 = vmatprep.subr.mxu1 %v12359_v24  ;;  %10807 = vmatpush3.msra.mxu0 %v12365_v26 }
  0xb0   :  { %10834 = vmatpush3.msra.mxu1 %v12359_v24  ;;  %10808 = vmatprep.subr.mxu0 %v12368_v27 }
  0xb1   :  { %10835 = vmatprep.subr.mxu1 %v12377_v30  ;;  %10809 = vmatpush3.msra.mxu0 %v12368_v27 }
  0xb2   :  { %10836 = vmatpush3.msra.mxu1 %v12377_v30  ;;  %10810 = vmatprep.subr.mxu0 %v12389_v35 }
  0xb3   :  { %10838 = vmatmul.mubr.f32.vlgmr.msra.gmra.mxu1 %v12513_v49  ;;  %10865 = vmatprep.subr.mxu1 %v14769_v5 }
  0xb4   :  { %10811 = vmatpush3.msra.mxu0 %v12389_v35  ;;  %10866 = vmatpush3.msra.mxu1 %v12386_v34  ;;  %v781_v34 = vsel %vm92_vm6, %v742_v17, 0 }
  0xb5   :  { %10812 = vmatprep.subr.mxu0 %v12403_v40  ;;  %10867 = vmatprep.subr.mxu1 %v14769_v5  ;;  %v12607_v39 = vand.u32 4294901760, %v781_v34 }
  0xb6   :  { %10813 = vmatpush3.msra.mxu0 %v12403_v40  ;;  %10868 = vmatpush3.msra.mxu1 %v12394_v37  ;;  %v722_v37 = vadd.f32 %v9995_v31, %v9992_v28 }
  0xb7   :  { %10814 = vmatprep.subr.mxu0 %v12417_v44  ;;  %10869 = vmatprep.subr.mxu1 %v14769_v5  ;;  %v12621_v46 = vsub.f32 %v781_v34, %v12607_v39 }
  0xb8   :  { %10815 = vmatpush3.msra.mxu0 %v12417_v44  ;;  %10870 = vmatpush3.msra.mxu1 %v12410_v42  ;;  %v9993_v42 = vsel %vm693_vm13, 1.0, %v14769_v5 }
  0xb9   :  { %10816 = vmatprep.subr.mxu0 %v12427_v47  ;;  %10871 = vmatprep.subr.mxu1 %v14769_v5  ;;  %v864_v52 = vand.u32 4294901760, %v12621_v46 }
  0xba   :  { %10817 = vmatpush3.msra.mxu0 %v12427_v47  ;;  %10872 = vmatpush3.msra.mxu1 %v12421_v45  ;;  %v743_v45 = vadd.f32 %v9998_v33, %v722_v37 }
  0xbb   :  { %10819 = vmatmul.mubr.f32.vlgmr.msra.gmra.mxu0 %v12513_v49  ;;  %10840 = vmatprep.subr.mxu0 %v14769_v5  ;;  %v723_v49 = vadd.f32 %v9996_v43, %v9993_v42 }
  0xbc   :  { %10873 = vmatprep.subr.mxu1 %v14769_v5  ;;  %10841 = vmatpush3.msra.mxu0 %v12307_v4  ;;  %v784_v50 = vsel %vm92_vm6, %v743_v45, 0 }
  0xbd   :  { %10874 = vmatpush3.msra.mxu1 %v12432_v48  ;;  %10842 = vmatprep.subr.mxu0 %v14769_v5  ;;  %v9999_v48 = vsel %vm735_vm15, 1.0, %v14769_v5  ;;  %v12637_v54 = vand.u32 4294901760, %v784_v50  ;;  %vm2578_vm15 = vcmask 261120  }
  0xbe   :  { %10875 = vmatprep.subr.mxu1 %v14769_v5  ;;  %10843 = vmatpush3.msra.mxu0 %v12318_v8 }
  0xbf   :  { %10876 = vmatpush3.msra.mxu1 %v12441_v51  ;;  %10844 = vmatprep.subr.mxu0 %v14769_v5  ;;  %v744_v51 = vadd.f32 %v9999_v48, %v723_v49  ;;  %v12650_v56 = vsub.f32 %v784_v50, %v12637_v54 }
  0xc0   :  { %10877 = vmatprep.subr.mxu1 %v14769_v5  ;;  %10845 = vmatpush3.msra.mxu0 %v12320_v9 }
  0xc1   :  { %10878 = vmatpush3.msra.mxu1 %v12447_v53  ;;  %10846 = vmatprep.subr.mxu0 %v14769_v5  ;;  %v787_v53 = vsel %vm92_vm6, %v744_v51, 0  ;;  %v874_v59 = vand.u32 4294901760, %v12650_v56 }
  0xc2   :  { %10879 = vmatprep.subr.mxu1 %v14769_v5  ;;  %10847 = vmatpush3.msra.mxu0 %v12322_v10  ;;  %v12656_v57 = vand.u32 4294901760, %v787_v53 }
  0xc3   :  { %10880 = vmatpush3.msra.mxu1 %v12456_v55  ;;  %10881 = vmatprep.mubr.msk.f32.mxu1 %vm12234_vm0, %v14769_v5  ;;  %v865_v55 = vsub.f32 %v12621_v46, %v864_v52  ;;  %v875_v62 = vsub.f32 %v12650_v56, %v874_v59 }
  0xc4   :  { %10848 = vmatprep.subr.mxu0 %v14769_v5  ;;  %10882 = vmatmul.mubr.f32.vlgmr.msra.gmra.mxu1 %v12607_v39  ;;  %v12669_v61 = vsub.f32 %v787_v53, %v12656_v57 }
  0xc5   :  { %10915 = vmatprep.subr.mxu1 %v14769_v5  ;;  %10849 = vmatpush3.msra.mxu0 %v12337_v15  ;;  %v866_v58 = vand.u32 4294901760, %v865_v55 }
  0xc6   :  { %10916 = vmatpush3.msra.mxu1 %v12307_v4  ;;  %10850 = vmatprep.subr.mxu0 %v14769_v5  ;;  %v884_v63 = vand.u32 4294901760, %v12669_v61 }
  0xc7   :  { %10917 = vmatprep.subr.mxu1 %v14769_v5  ;;  %10851 = vmatpush3.msra.mxu0 %v12339_v16 }
  0xc8   :  { %10918 = vmatpush3.msra.mxu1 %v12318_v8  ;;  %10852 = vmatprep.subr.mxu0 %v14769_v5 }
  0xc9   :  { %10919 = vmatprep.subr.mxu1 %v14769_v5  ;;  %10853 = vmatpush3.msra.mxu0 %v12359_v24 }
  0xca   :  { %10920 = vmatpush3.msra.mxu1 %v12320_v9  ;;  %10854 = vmatprep.subr.mxu0 %v14769_v5 }
  0xcb   :  { %10921 = vmatprep.subr.mxu1 %v14769_v5  ;;  %10855 = vmatpush3.msra.mxu0 %v12377_v30 }
  0xcc   :  { %10856 = vmatprep.mubr.msk.f32.mxu0 %vm12234_vm0, %v14769_v5  ;;  %10884 = vmatprep.mubr.msk.f32.mxu1 %vm12234_vm0, %v14769_v5 }
  0xcd   :  { %10922 = vmatpush3.msra.mxu1 %v12322_v10  ;;  %10857 = vmatmul.mubr.f32.vlgmr.msra.gmra.mxu0 %v866_v58 }
  0xce   :  { %10885 = vmatmul.mubr.f32.gmra.mxu1 %v12637_v54  ;;  %10890 = vmatprep.subr.mxu0 %v14769_v5 }
  0xcf   :  { %10923 = vmatprep.subr.mxu1 %v14769_v5  ;;  %10891 = vmatpush3.msra.mxu0 %v12334_v14  ;;  %v876_v14 = vand.u32 4294901760, %v875_v62 }
  0xd0   :  { %10924 = vmatpush3.msra.mxu1 %v12337_v15  ;;  %10892 = vmatprep.subr.mxu0 %v14769_v5 }
  0xd1   :  { %10925 = vmatprep.subr.mxu1 %v14769_v5  ;;  %10887 = vmatprep.mubr.msk.f32.mxu1 %vm12234_vm0, %v14769_v5 }
  0xd2   :  { %10893 = vmatpush3.msra.mxu0 %v12342_v18  ;;  %10926 = vmatpush3.msra.mxu1 %v12339_v16  ;;  %v885_v18 = vsub.f32 %v12669_v61, %v884_v63 }
  0xd3   :  { %10888 = vmatmul.mubr.f32.gmra.mxu1 %v12656_v57  ;;  %10894 = vmatprep.subr.mxu0 %v14769_v5 }
  0xd4   :  { %10927 = vmatprep.subr.mxu1 %v14769_v5  ;;  %10895 = vmatpush3.msra.mxu0 %v12345_v19  ;;  %v886_v19 = vand.u32 4294901760, %v885_v18 }
  0xd5   :  { %10928 = vmatpush3.msra.mxu1 %v12359_v24  ;;  %10896 = vmatprep.subr.mxu0 %v14769_v5 }
  0xd6   :  { %10929 = vmatprep.subr.mxu1 %v14769_v5  ;;  %10859 = vmatprep.mubr.msk.f32.mxu0 %vm12234_vm0, %v14769_v5 }
  0xd7   :  { %10897 = vmatpush3.msra.mxu0 %v12348_v20  ;;  %10930 = vmatpush3.msra.mxu1 %v12377_v30 }
  0xd8   :  { %10931 = vmatprep.mubr.msk.f32.mxu1 %vm12234_vm0, %v14769_v5  ;;  %10860 = vmatmul.mubr.f32.gmra.mxu0 %v876_v14 }
  0xd9   :  { %10898 = vmatprep.subr.mxu0 %v14769_v5  ;;  %10932 = vmatmul.mubr.f32.vlgmr.msra.gmra.mxu1 %v864_v52 }
  0xda   :  { %10965 = vmatprep.subr.mxu1 %v14769_v5  ;;  %10899 = vmatpush3.msra.mxu0 %v12357_v23 }
  0xdb   :  { %10966 = vmatpush3.msra.mxu1 %v12307_v4  ;;  %10900 = vmatprep.subr.mxu0 %v14769_v5  ;;  %v12723_v4 = vshrl.u32 %v46_v60, 7 }
  0xdc   :  { %10967 = vmatprep.subr.mxu1 %v14769_v5  ;;  %10862 = vmatprep.mubr.msk.f32.mxu0 %vm12234_vm0, %v14769_v5 }
  0xdd   :  { %10901 = vmatpush3.msra.mxu0 %v12375_v29  ;;  %10968 = vmatpush3.msra.mxu1 %v12318_v8  ;;  %14778 = vst [vmem:[#allocation2_spill] sm:$0xff] %v12723_v4  ;;  %v10000_v8 = vld [vmem:[%s14758_s7] ss:$0 sm:$0xff]  ;;  %v748_v23 = vadd.s32 16, %v12723_v4  ;;  %v1423_v29 = vpop.permute.xlu1 %1422 }
  0xde   :  { %10863 = vmatmul.mubr.f32.gmra.mxu0 %v886_v19  ;;  %10902 = vmatprep.subr.mxu0 %v14769_v5  ;;  %vm754_vm1 = vcmp.eq.s32.totalorder %v12723_v4, %v10000_v8  ;;  %vm1428_vm9 = vcmp.eq.s32.totalorder %v12495_v1, %v1423_v29 }
  0xdf   :  { %10969 = vmatprep.subr.mxu1 %v14769_v5  ;;  %10903 = vmatpush3.msra.mxu0 %v12392_v36  ;;  %vm756_vm6 = vcmp.eq.s32.totalorder %v748_v23, %v10000_v8  ;;  %v12809_v60 = vsel %vm1428_vm9, 1.0, %v14769_v5  ;;  %vm8884_vm9 = vcmask 257024  }
  0xe0   :  { %10970 = vmatpush3.msra.mxu1 %v12320_v9  ;;  %10904 = vmatprep.subr.mxu0 %v14769_v5  ;;  %v10001_v9 = vsel %vm754_vm1, 1.0, %v14769_v5  ;;  %v1462_v12 = vsel %vm1457_vm8, %v12809_v60, 0 }
  0xe1   :  { %10971 = vmatprep.subr.mxu1 %v14769_v5  ;;  %10905 = vmatpush3.msra.mxu0 %v12407_v41  ;;  %v1426_v0 = vpop.permute.xlu1 %1425  ;;  %v12820_v32 = vsub.f32 %v1462_v12, %v1462_v12 }
  0xe2   :  { %10906 = vmatprep.mubr.msk.f32.mxu0 %vm12234_vm0, %v14769_v5  ;;  %10934 = vmatprep.mubr.msk.f32.mxu1 %vm12234_vm0, %v14769_v5  ;;  %vm1429_vm10 = vcmp.eq.s32.totalorder %v12495_v1, %v1426_v0 }
  0xe3   :  { %10972 = vmatpush3.msra.mxu1 %v12322_v10  ;;  %10907 = vmatmul.mubr.f32.vlgmr.msra.gmra.mxu0 %v12621_v46  ;;  %v764_v10 = vsel %vm763_vm2, %v10001_v9, 0.0  ;;  %v12817_v17 = vsel %vm1429_vm10, 1.0, %v14769_v5  ;;  %v1550_v48 = vand.u32 4294901760, %v12820_v32 }
  0xe4   :  { %10935 = vmatmul.mubr.f32.gmra.mxu1 %v874_v59  ;;  %10940 = vmatprep.subr.mxu0 %v14769_v5  ;;  %v1465_v33 = vsel %vm1457_vm8, %v12817_v17, 0 }
  0xe5   :  { %10973 = vmatprep.subr.mxu1 %v14769_v5  ;;  %10941 = vmatpush3.msra.mxu0 %v12354_v22  ;;  %v12829_v49 = vsub.f32 %v1465_v33, %v1465_v33 }
  0xe6   :  { %10974 = vmatpush3.msra.mxu1 %v12337_v15  ;;  %10942 = vmatprep.subr.mxu0 %v14769_v5  ;;  %v12787_v15 = vadd.s32 8, %v12723_v4 }
  0xe7   :  { %10975 = vmatprep.subr.mxu1 %v14769_v5  ;;  %10937 = vmatprep.mubr.msk.f32.mxu1 %vm12234_vm0, %v14769_v5 }
  0xe8   :  { %10943 = vmatpush3.msra.mxu0 %v12362_v25  ;;  %10976 = vmatpush3.msra.mxu1 %v12339_v16  ;;  %14779 = vst [vmem:[#allocation3_spill] sm:$0xff] %v12787_v15  ;;  %v12792_v16 = vld [vmem:[%s14759_s4] ss:$0 sm:$0xff]  ;;  %vm755_vm3 = vcmp.eq.s32.totalorder %v12787_v15, %v10000_v8 }
  0xe9   :  { %10938 = vmatmul.mubr.f32.gmra.mxu1 %v884_v63  ;;  %10944 = vmatprep.subr.mxu0 %v14769_v5  ;;  %14780 = vst [vmem:[#allocation4_spill] sm:$0xff] %v12792_v16  ;;  %v10002_v20 = vsel %vm755_vm3, 1.0, %v14769_v5  ;;  %vm6691_vm4 = vcmp.eq.s32.totalorder %v12787_v15, %v12792_v16 }
  0xea   :  { %10977 = vmatprep.subr.mxu1 %v14769_v5  ;;  %10945 = vmatpush3.msra.mxu0 %v12365_v26  ;;  %v767_v22 = vsel %vm763_vm2, %v10002_v20, 0.0 }
  0xeb   :  { %10978 = vmatpush3.msra.mxu1 %v12359_v24  ;;  %10946 = vmatprep.subr.mxu0 %v14769_v5  ;;  %v10003_v24 = vsel %vm756_vm6, 1.0, %v14769_v5 }
  0xec   :  { %10979 = vmatprep.subr.mxu1 %v14769_v5  ;;  %10909 = vmatprep.mubr.msk.f32.mxu0 %vm12234_vm0, %v14769_v5  ;;  %v771_v25 = vsel %vm770_vm5, %v10003_v24, 0.0  ;;  %vm9979_vm5 = vcmask 254976  }
  0xed   :  { %10947 = vmatpush3.msra.mxu0 %v12368_v27  ;;  %10980 = vmatpush3.msra.mxu1 %v12377_v30  ;;  %v1420_v27 = vpop.permute.xlu0 %1419 }
  0xee   :  { %10981 = vmatprep.mubr.msk.f32.mxu1 %vm12234_vm0, %v14769_v5  ;;  %10910 = vmatmul.mubr.f32.gmra.mxu0 %v12650_v56  ;;  %vm1427_vm7 = vcmp.eq.s32.totalorder %v12495_v1, %v1420_v27  ;;  %v1551_v56 = vsub.f32 %v12820_v32, %v1550_v48 }
  0xef   :  { %10948 = vmatprep.subr.mxu0 %v14769_v5  ;;  %10982 = vmatmul.mubr.f32.vlgmr.msra.gmra.mxu1 %v12607_v39  ;;  %v12803_v36 = vsel %vm1427_vm7, 1.0, %v14769_v5  ;;  %vm6696_vm7 = vcmask 146432  }
  0xf0   :  { %10949 = vmatpush3.msra.mxu0 %v12389_v35  ;;  %10912 = vmatprep.mubr.msk.f32.mxu0 %vm12234_vm0, %v14769_v5  ;;  %v1459_v41 = vsel %vm1457_vm8, %v12803_v36, 0  ;;  %v1552_v14 = vand.u32 4294901760, %v1551_v56 }
  0xf1   :  { %10950 = vmatprep.subr.mxu0 %v14769_v5  ;;  %765 = vadd.xlane.f32.xlu1 %v764_v10  ;;  %v12811_v6 = vsub.f32 %v1459_v41, %v1459_v41  ;;  %v1441_v29 = vpop.permute.xlu0 %1440 }
  0xf2   :  { %10951 = vmatpush3.msra.mxu0 %v12403_v40  ;;  %10984 = vmatprep.mubr.msk.f32.mxu1 %vm12234_vm0, %v14769_v5  ;;  %vm1448_vm12 = vcmp.eq.s32.totalorder %v12495_v1, %v1441_v29 }
  0xf3   :  { %10913 = vmatmul.mubr.f32.gmra.mxu0 %v12669_v61  ;;  %10952 = vmatprep.subr.mxu0 %v14769_v5  ;;  %v1540_v28 = vand.u32 4294901760, %v12811_v6  ;;  %v12908_v41 = vsel %vm1448_vm12, 1.0, %v14769_v5  ;;  %vm9915_vm12 = vcmask 93184  }
  0xf4   :  { %10953 = vmatpush3.msra.mxu0 %v12417_v44  ;;  %10956 = vmatprep.mubr.msk.f32.mxu0 %vm12234_vm0, %v14769_v5  ;;  %v2017_v0 = vsel %vm1457_vm8, %v12908_v41, 0 }
  0xf5   :  { %10954 = vmatprep.subr.mxu0 %v14769_v5  ;;  %10985 = vmatmul.mubr.f32.gmra.mxu1 %v12637_v54  ;;  %v1541_v42 = vsub.f32 %v12811_v6, %v1540_v28 }
  0xf6   :  { %10955 = vmatpush3.msra.mxu0 %v12427_v47  ;;  %10987 = vmatprep.mubr.msk.f32.mxu1 %vm12234_vm0, %v14769_v5 }
  0xf7   :  { %10957 = vmatmul.mubr.f32.vlgmr.msra.gmra.mxu0 %v12607_v39  ;;  %10990 = vmatprep.subr.mxu0 %v14769_v5  ;;  %v1542_v53 = vand.u32 4294901760, %v1541_v42 }
  0xf8   :  { %10959 = vmatprep.mubr.msk.f32.mxu0 %vm12234_vm0, %v14769_v5  ;;  %11003 = vmatprep.subr.mxu1 %v14769_v5 }
  0xf9   :  { %10988 = vmatmul.mubr.f32.gmra.mxu1 %v12656_v57  ;;  %768 = vadd.xlane.f32.xlu0 %v767_v22 }
  0xfa   :  { %11007 = vmatprep.mubr.msk.f32.mxu1 %vm12234_vm0, %v14769_v5 }
  0xfb   :  { %10960 = vmatmul.mubr.f32.gmra.mxu0 %v12637_v54 }
  0xfc   :  { %10962 = vmatprep.mubr.msk.f32.mxu0 %vm12234_vm0, %v14769_v5 }
  0xfd   :  { %772 = vadd.xlane.f32.xlu0 %v771_v25 }
  0xff   :  { %10963 = vmatmul.mubr.f32.gmra.mxu0 %v12656_v57  ;;  %v1560_v57 = vand.u32 4294901760, %v12829_v49 }
 0x100   :  { %10994 = vmatprep.mubr.msk.f32.mxu0 %vm12234_vm0, %v14769_v5 }
 0x101   :  { %v1561_v19 = vsub.f32 %v12829_v49, %v1560_v57 }
 0x103   :  { %v1562_v22 = vand.u32 4294901760, %v1561_v19 }
 0x150   :  { %v10763_v30 = vpop.f32.mrf.mxu1 }
 0x152   :  { %v299_v44 = vpop.f32.mrf.mxu1 }
 0x158   :  { %v10744_v26 = vpop.f32.mrf.mxu0 }
 0x159   :  { %v306_v47 = vadd.f32 %v10763_v30, %v10744_v26 }
 0x15a   :  { %v178_v35 = vpop.f32.mrf.mxu0 }
 0x15b   :  { %v300_v7 = vadd.f32 %v299_v44, %v178_v35  ;;  %v1444_v35 = vpop.permute.xlu1 %1443  ;;  %v1447_v44 = vpop.permute.xlu0 %1446 }
 0x15c   :  { %vm1449_vm13 = vcmp.eq.s32.totalorder %v12495_v1, %v1444_v35  ;;  %vm1450_vm14 = vcmp.eq.s32.totalorder %v12495_v1, %v1447_v44 }
 0x15d   :  { %v12942_v1 = vsel %vm1450_vm14, 1.0, %v14769_v5 }
 0x15e   :  { %v2023_v33 = vsel %vm1457_vm8, %v12942_v1, 0 }
 0x161   :  { %v10801_v2 = vpop.f32.mrf.mxu1 }
 0x163   :  { %v481_v21 = vpop.f32.mrf.mxu1 }
 0x169   :  { %v10782_v40 = vpop.f32.mrf.mxu0 }
 0x16a   :  { %v401_v11 = vadd.f32 %v10782_v40, %v306_v47 }
 0x16b   :  { %v393_v3 = vpop.f32.mrf.mxu0 }
 0x16c   :  { %v394_v13 = vadd.f32 %v393_v3, %v300_v7  ;;  %v490_v31 = vadd.f32 %v10801_v2, %v401_v11  ;;  %v12925_v7 = vsel %vm1449_vm13, 1.0, %v14769_v5 }
 0x16e   :  { %v482_v39 = vadd.f32 %v481_v21, %v394_v13  ;;  %v12933_v13 = vsub.f32 %v2017_v0, %v2017_v0  ;;  %v2020_v21 = vsel %vm1457_vm8, %v12925_v7, 0 }
 0x173   :  { %v10839_v34 = vpop.f32.mrf.mxu1 }
 0x175   :  { %v669_v50 = vpop.f32.mrf.mxu1 }
 0x17b   :  { %v10820_v37 = vpop.f32.mrf.mxu0 }
 0x17c   :  { %v591_v38 = vadd.f32 %v10820_v37, %v490_v31  ;;  %v2094_v31 = vand.u32 4294901760, %v12933_v13 }
 0x17d   :  { %v584_v43 = vpop.f32.mrf.mxu0 }
 0x17e   :  { %v12827_v45 = vadd.f32 %v10839_v34, %v591_v38  ;;  %v585_v46 = vadd.f32 %v584_v43, %v482_v39  ;;  %v12953_v34 = vsub.f32 %v2020_v21, %v2020_v21  ;;  %v2095_v38 = vsub.f32 %v12933_v13, %v2094_v31 }
 0x17f   :  { %v12973_v39 = vsub.f32 %v2023_v33, %v2023_v33 }
 0x180   :  { %14781 = vst [vmem:[#allocation5_spill] sm:$0xff] %v12827_v45  ;;  %v1469_v51 = vsel %vm1467_vm11, %v12827_v45, 0  ;;  %v12834_v52 = vadd.f32 %v669_v50, %v585_v46  ;;  %v2104_v46 = vand.u32 4294901760, %v12953_v34 }
 0x181   :  { %v12836_v54 = vand.u32 4294901760, %v1469_v51  ;;  %v2114_v56 = vand.u32 4294901760, %v12973_v39 }
 0x182   :  { %14782 = vst [vmem:[#allocation6_spill] sm:$0xff] %v12834_v52  ;;  %v12839_v55 = vand.u32 4294901760, %v12834_v52 }
 0x183   :  { %v12846_v58 = vsub.f32 %v1469_v51, %v12836_v54  ;;  %10991 = vmatpush3.msra.mxu0 %v12836_v54  ;;  %v2096_v51 = vand.u32 4294901760, %v2095_v38 }
 0x184   :  { %v999_v59 = vpop.f32.mrf.mxu1  ;;  %10992 = vmatprep.subr.mxu0 %v14769_v5  ;;  %v12852_v61 = vsub.f32 %v12834_v52, %v12839_v55 }
 0x185   :  { %10993 = vmatpush3.msra.mxu0 %v12839_v55  ;;  %v12856_v62 = vand.u32 4294901760, %v12846_v58 }
 0x186   :  { %v10883_v63 = vpop.f32.mrf.mxu1  ;;  %10995 = vmatmul.mubr.f32.vlgmr.msra.gmra.mxu0 %v1542_v53  ;;  %11016 = vmatprep.subr.mxu0 %v14769_v5  ;;  %v12860_v18 = vand.u32 4294901760, %v12852_v61  ;;  %v2105_v53 = vsub.f32 %v12953_v34, %v2104_v46 }
 0x187   :  { %11017 = vmatpush3.msra.mxu0 %v12846_v58  ;;  %10997 = vmatprep.mubr.msk.f32.mxu0 %vm12234_vm0, %v14769_v5  ;;  %v1600_v8 = vsub.f32 %v12846_v58, %v12856_v62  ;;  %v2115_v63 = vsub.f32 %v12973_v39, %v2114_v56 }
 0x188   :  { %11018 = vmatprep.subr.mxu0 %v14769_v5  ;;  %v1607_v9 = vsub.f32 %v12852_v61, %v12860_v18 }
 0x189   :  { %11019 = vmatpush3.msra.mxu0 %v12852_v61  ;;  %v12874_v10 = vand.u32 4294901760, %v1600_v8 }
 0x18a   :  { %10998 = vmatmul.mubr.f32.gmra.mxu0 %v1552_v14  ;;  %v12876_v20 = vand.u32 4294901760, %v1607_v9  ;;  %11042 = vmatprep.subr.mxu0 %v14769_v5 }
 0x18b   :  { %11004 = vmatpush3.msra.mxu1 %v12874_v10  ;;  %11000 = vmatprep.mubr.msk.f32.mxu0 %vm12234_vm0, %v14769_v5 }
 0x18c   :  { %11005 = vmatprep.subr.mxu1 %v14769_v5 }
 0x18d   :  { %v868_v23 = vpop.f32.mrf.mxu0  ;;  %11006 = vmatpush3.msra.mxu1 %v12876_v20 }
 0x18e   :  { %v12884_v24 = vadd.f32 %v999_v59, %v868_v23  ;;  %v1005_v25 = vpop.f32.mrf.mxu1  ;;  %11001 = vmatmul.mubr.f32.gmra.mxu0 %v1562_v22  ;;  %11008 = vmatmul.mubr.msk.f32.vlgmr.msra.gmra.mxu1 %vm1457_vm8, %v12803_v36  ;;  %v2106_v59 = vand.u32 4294901760, %v2105_v53 }
 0x18f   :  { %v10858_v26 = vpop.f32.mrf.mxu0  ;;  %11029 = vmatprep.subr.mxu1 %v14769_v5  ;;  %11010 = vmatprep.mubr.msk.f32.mxu1 %vm12234_vm0, %v14769_v5 }
 0x190   :  { %v10886_v27 = vpop.f32.mrf.mxu1  ;;  %11030 = vmatpush3.msra.mxu1 %v12836_v54  ;;  %11020 = vmatprep.mubr.msk.f32.mxu0 %vm12234_vm0, %v14769_v5 }
 0x191   :  { %11031 = vmatprep.subr.mxu1 %v14769_v5 }
 0x192   :  { %11032 = vmatpush3.msra.mxu1 %v12839_v55  ;;  %11021 = vmatmul.mubr.f32.vlgmr.msra.gmra.mxu0 %v12811_v6 }
 0x193   :  { %v1011_v30 = vpop.f32.mrf.mxu1  ;;  %11011 = vmatmul.mubr.msk.f32.gmra.mxu1 %vm1457_vm8, %v12809_v60  ;;  %11043 = vmatpush3.msra.mxu0 %v12856_v62 }
 0x194   :  { %11044 = vmatprep.subr.mxu0 %v14769_v5  ;;  %11013 = vmatprep.mubr.msk.f32.mxu1 %vm12234_vm0, %v14769_v5 }
 0x195   :  { %v10889_v40 = vpop.f32.mrf.mxu1  ;;  %11045 = vmatpush3.msra.mxu0 %v12860_v18  ;;  %11023 = vmatprep.mubr.msk.f32.mxu0 %vm12234_vm0, %v14769_v5 }
 0x196   :  { %11024 = vmatmul.mubr.f32.gmra.mxu0 %v12820_v32  ;;  %11055 = vmatprep.subr.mxu1 %v14769_v5 }
 0x197   :  { %11014 = vmatmul.mubr.msk.f32.gmra.mxu1 %vm1457_vm8, %v12817_v17  ;;  %11026 = vmatprep.mubr.msk.f32.mxu0 %vm12234_vm0, %v14769_v5 }
 0x198   :  { %v878_v47 = vpop.f32.mrf.mxu0  ;;  %11033 = vmatprep.mubr.msk.f32.mxu1 %vm12234_vm0, %v14769_v5  ;;  %11068 = vmatprep.subr.mxu0 %v14769_v5 }
 0x199   :  { %v12922_v2 = vadd.f32 %v1005_v25, %v878_v47  ;;  %v1194_v3 = vpop.f32.mrf.mxu1 }
 0x19a   :  { %v10861_v11 = vpop.f32.mrf.mxu0  ;;  %11027 = vmatmul.mubr.f32.gmra.mxu0 %v12829_v49 }
 0x19b   :  { %v10933_v12 = vpop.f32.mrf.mxu1  ;;  %11034 = vmatmul.mubr.f32.vlgmr.msra.gmra.mxu1 %v1540_v28  ;;  %11046 = vmatprep.mubr.msk.f32.mxu0 %vm12234_vm0, %v14769_v5 }
 0x19c   :  { %11056 = vmatpush3.msra.mxu1 %v12836_v54  ;;  %11036 = vmatprep.mubr.msk.f32.mxu1 %vm12234_vm0, %v14769_v5  ;;  %v2575_v12 = vld [vmem:[%s14760_s9 + $0x28] sm:$0xff] }
 0x19d   :  { %11057 = vmatprep.subr.mxu1 %v14769_v5 }
 0x19e   :  { %v888_v6 = vpop.f32.mrf.mxu0  ;;  %11058 = vmatpush3.msra.mxu1 %v12839_v55  ;;  %11047 = vmatmul.mubr.msk.f32.vlgmr.msra.gmra.mxu0 %vm1457_vm8, %v12803_v36 }
 0x19f   :  { %v12947_v28 = vadd.f32 %v1011_v30, %v888_v6  ;;  %11037 = vmatmul.mubr.f32.gmra.mxu1 %v1550_v48  ;;  %11069 = vmatpush3.msra.mxu0 %v12836_v54  ;;  %v2574_v6 = vld [vmem:[%s14760_s9 + $0x20] sm:$0xff] }
 0x1a0   :  { %v10864_v37 = vpop.f32.mrf.mxu0  ;;  %11070 = vmatprep.subr.mxu0 %v14769_v5  ;;  %11039 = vmatprep.mubr.msk.f32.mxu1 %vm12234_vm0, %v14769_v5 }
 0x1a1   :  { %11071 = vmatpush3.msra.mxu0 %v12839_v55  ;;  %11049 = vmatprep.mubr.msk.f32.mxu0 %vm12234_vm0, %v14769_v5  ;;  %v13130_v37 = vand.u32 4294901760, %v2574_v6 }
 0x1a2   :  { %11050 = vmatmul.mubr.msk.f32.gmra.mxu0 %vm1457_vm8, %v12809_v60  ;;  %11081 = vmatprep.subr.mxu1 %v14769_v5 }
 0x1a3   :  { %v1099_v32 = vpop.f32.mrf.mxu0  ;;  %11040 = vmatmul.mubr.f32.gmra.mxu1 %v1560_v57  ;;  %11052 = vmatprep.mubr.msk.f32.mxu0 %vm12234_vm0, %v14769_v5 }
 0x1a4   :  { %v1100_v42 = vadd.f32 %v1099_v32, %v12884_v24  ;;  %v1202_v43 = vpop.f32.mrf.mxu1  ;;  %11059 = vmatprep.mubr.msk.f32.mxu1 %vm12234_vm0, %v14769_v5  ;;  %11094 = vmatprep.subr.mxu0 %v14769_v5 }
 0x1a5   :  { %v10908_v49 = vpop.f32.mrf.mxu0 }
 0x1a6   :  { %v10936_v48 = vpop.f32.mrf.mxu1  ;;  %11053 = vmatmul.mubr.msk.f32.gmra.mxu0 %vm1457_vm8, %v12817_v17  ;;  %v1195_v50 = vadd.f32 %v1194_v3, %v1100_v42 }
 0x1a7   :  { %11060 = vmatmul.mubr.msk.f32.vlgmr.msra.gmra.mxu1 %vm1457_vm8, %v12803_v36  ;;  %11072 = vmatprep.mubr.msk.f32.mxu0 %vm12234_vm0, %v14769_v5 }
 0x1a8   :  { %11082 = vmatpush3.msra.mxu1 %v12874_v10  ;;  %11062 = vmatprep.mubr.msk.f32.mxu1 %vm12234_vm0, %v14769_v5 }
 0x1a9   :  { %v1210_v57 = vpop.f32.mrf.mxu1  ;;  %11083 = vmatprep.subr.mxu1 %v14769_v5 }
 0x1aa   :  { %11084 = vmatpush3.msra.mxu1 %v12876_v20  ;;  %11073 = vmatmul.mubr.f32.vlgmr.msra.gmra.mxu0 %v2096_v51 }
 0x1ab   :  { %v10939_v36 = vpop.f32.mrf.mxu1  ;;  %11063 = vmatmul.mubr.msk.f32.gmra.mxu1 %vm1457_vm8, %v12809_v60  ;;  %11095 = vmatpush3.msra.mxu0 %v12846_v58 }
 0x1ac   :  { %11096 = vmatprep.subr.mxu0 %v14769_v5  ;;  %11065 = vmatprep.mubr.msk.f32.mxu1 %vm12234_vm0, %v14769_v5 }
 0x1ad   :  { %11097 = vmatpush3.msra.mxu0 %v12852_v61  ;;  %11075 = vmatprep.mubr.msk.f32.mxu0 %vm12234_vm0, %v14769_v5  ;;  %v2116_v61 = vand.u32 4294901760, %v2115_v63 }
 0x1ae   :  { %v1106_v14 = vpop.f32.mrf.mxu0  ;;  %11076 = vmatmul.mubr.f32.gmra.mxu0 %v2106_v59  ;;  %11107 = vmatprep.subr.mxu1 %v14769_v5 }
 0x1af   :  { %v1107_v60 = vadd.f32 %v1106_v14, %v12922_v2  ;;  %v1396_v58 = vpop.f32.mrf.mxu1  ;;  %11066 = vmatmul.mubr.msk.f32.gmra.mxu1 %vm1457_vm8, %v12817_v17  ;;  %11078 = vmatprep.mubr.msk.f32.mxu0 %vm12234_vm0, %v14769_v5 }
 0x1b0   :  { %v10911_v19 = vpop.f32.mrf.mxu0  ;;  %11085 = vmatprep.mubr.msk.f32.mxu1 %vm12234_vm0, %v14769_v5  ;;  %11120 = vmatprep.subr.mxu0 %v14769_v5 }
 0x1b1   :  { %v10983_v8 = vpop.f32.mrf.mxu1  ;;  %v1203_v9 = vadd.f32 %v1202_v43, %v1107_v60 }
 0x1b2   :  { %11079 = vmatmul.mubr.f32.gmra.mxu0 %v2116_v61 }
 0x1b3   :  { %v1113_v10 = vpop.f32.mrf.mxu0  ;;  %11086 = vmatmul.mubr.msk.f32.vlgmr.msra.gmra.mxu1 %vm1457_vm8, %v12908_v41  ;;  %11098 = vmatprep.mubr.msk.f32.mxu0 %vm12234_vm0, %v14769_v5 }
 0x1b4   :  { %v1114_v17 = vadd.f32 %v1113_v10, %v12947_v28  ;;  %11108 = vmatpush3.msra.mxu1 %v12836_v54  ;;  %11088 = vmatprep.mubr.msk.f32.mxu1 %vm12234_vm0, %v14769_v5 }
 0x1b5   :  { %v10914_v20 = vpop.f32.mrf.mxu0  ;;  %11109 = vmatprep.subr.mxu1 %v14769_v5  ;;  %v1402_v22 = vpop.f32.mrf.mxu1 }
 0x1b6   :  { %11110 = vmatpush3.msra.mxu1 %v12839_v55  ;;  %11099 = vmatmul.mubr.f32.vlgmr.msra.gmra.mxu0 %v12933_v13  ;;  %v1211_v23 = vadd.f32 %v1210_v57, %v1114_v17 }
 0x1b7   :  { %v1305_v24 = vpop.f32.mrf.mxu0  ;;  %11089 = vmatmul.mubr.msk.f32.gmra.mxu1 %vm1457_vm8, %v12925_v7  ;;  %11121 = vmatpush3.msra.mxu0 %v12856_v62  ;;  %v10986_v25 = vpop.f32.mrf.mxu1 }
 0x1b8   :  { %v1306_v26 = vadd.f32 %v1305_v24, %v1195_v50  ;;  %11122 = vmatprep.subr.mxu0 %v14769_v5  ;;  %11091 = vmatprep.mubr.msk.f32.mxu1 %vm12234_vm0, %v14769_v5 }
 0x1b9   :  { %v10958_v27 = vpop.f32.mrf.mxu0  ;;  %11123 = vmatpush3.msra.mxu0 %v12860_v18  ;;  %11101 = vmatprep.mubr.msk.f32.mxu0 %vm12234_vm0, %v14769_v5  ;;  %v1408_v29 = vpop.f32.mrf.mxu1 }
 0x1ba   :  { %v13036_v30 = vadd.f32 %v1396_v58, %v1306_v26  ;;  %11102 = vmatmul.mubr.f32.gmra.mxu0 %v12953_v34  ;;  %11133 = vmatprep.subr.mxu1 %v14769_v5 }
 0x1bb   :  { %11092 = vmatmul.mubr.msk.f32.gmra.mxu1 %vm1457_vm8, %v12942_v1  ;;  %11104 = vmatprep.mubr.msk.f32.mxu0 %vm12234_vm0, %v14769_v5  ;;  %v1311_v62 = vpop.f32.mrf.mxu0  ;;  %v10989_v35 = vpop.f32.mrf.mxu1 }
 0x1bc   :  { %11111 = vmatprep.mubr.msk.f32.mxu1 %vm12234_vm0, %v14769_v5  ;;  %v1312_v18 = vadd.f32 %v1311_v62, %v1203_v9  ;;  %11146 = vmatprep.subr.mxu0 %v14769_v5 }
 0x1bd   :  { %v10961_v40 = vpop.f32.mrf.mxu0 }
 0x1be   :  { %11105 = vmatmul.mubr.f32.gmra.mxu0 %v12973_v39  ;;  %v13048_v44 = vadd.f32 %v1402_v22, %v1312_v18  ;;  %v13139_v39 = vsub.f32 %v2574_v6, %v13130_v37 }
 0x1bf   :  { %11112 = vmatmul.mubr.f32.vlgmr.msra.gmra.mxu1 %v2094_v31  ;;  %11124 = vmatprep.mubr.msk.f32.mxu0 %vm12234_vm0, %v14769_v5  ;;  %v1317_v47 = vpop.f32.mrf.mxu0 }
 0x1c0   :  { %11134 = vmatpush3.msra.mxu1 %v12836_v54  ;;  %11114 = vmatprep.mubr.msk.f32.mxu1 %vm12234_vm0, %v14769_v5  ;;  %v1318_v0 = vadd.f32 %v1317_v47, %v1211_v23  ;;  %v2577_v54 = vld [vmem:[%s14760_s9 + $0x38] sm:$0xff] }
 0x1c1   :  { %11135 = vmatprep.subr.mxu1 %v14769_v5  ;;  %v10964_v2 = vpop.f32.mrf.mxu0 }
 0x1c2   :  { %11136 = vmatpush3.msra.mxu1 %v12839_v55  ;;  %11125 = vmatmul.mubr.msk.f32.vlgmr.msra.gmra.mxu0 %vm1457_vm8, %v12908_v41  ;;  %v13061_v3 = vadd.f32 %v1408_v29, %v1318_v0  ;;  %v13097_v55 = vand.u32 4294901760, %v2577_v54 }
 0x1c3   :  { %11115 = vmatmul.mubr.f32.gmra.mxu1 %v2104_v46  ;;  %11127 = vmatprep.mubr.msk.f32.mxu0 %vm12234_vm0, %v14769_v5  ;;  %v2735_v46 = vand.u32 4294901760, %v13139_v39 }
 0x1c4   :  { %11117 = vmatprep.mubr.msk.f32.mxu1 %vm12234_vm0, %v14769_v5  ;;  %11163 = vmatprep.subr.mxu1 %v14769_v5 }
 0x1c5   :  { %11147 = vmatpush3.msra.mxu0 %v13097_v55  ;;  %v2736_v48 = vsub.f32 %v13139_v39, %v2735_v46 }
 0x1c6   :  { %11128 = vmatmul.mubr.msk.f32.gmra.mxu0 %vm1457_vm8, %v12925_v7  ;;  %11148 = vmatprep.subr.mxu0 %v14769_v5 }
 0x1c7   :  { %11118 = vmatmul.mubr.f32.gmra.mxu1 %v2114_v56  ;;  %11130 = vmatprep.mubr.msk.f32.mxu0 %vm12234_vm0, %v14769_v5  ;;  %v2737_v50 = vand.u32 4294901760, %v2736_v48 }
 0x1c8   :  { %11137 = vmatprep.mubr.msk.f32.mxu1 %vm12234_vm0, %v14769_v5 }
 0x1ca   :  { %11131 = vmatmul.mubr.msk.f32.gmra.mxu0 %vm1457_vm8, %v12942_v1 }
 0x1cb   :  { %11138 = vmatmul.mubr.msk.f32.vlgmr.msra.gmra.mxu1 %vm1457_vm8, %v12908_v41  ;;  %11154 = vmatprep.mubr.msk.f32.mxu0 %vm12234_vm0, %v14769_v5  ;;  %v2576_v41 = vld [vmem:[%s14760_s9 + $0x30] sm:$0xff] }
 0x1cc   :  { %11140 = vmatprep.mubr.msk.f32.mxu1 %vm12234_vm0, %v14769_v5  ;;  %v13105_v11 = vand.u32 4294901760, %v2576_v41 }
 0x1ce   :  { %v13114_v21 = vsub.f32 %v2576_v41, %v13105_v11  ;;  %11149 = vmatpush3.msra.mxu0 %v13105_v11 }
 0x1cf   :  { %11141 = vmatmul.mubr.msk.f32.gmra.mxu1 %vm1457_vm8, %v12925_v7  ;;  %v13103_v7 = vsub.f32 %v2577_v54, %v13097_v55  ;;  %11150 = vmatprep.subr.mxu0 %v14769_v5 }
 0x1d0   :  { %11143 = vmatprep.mubr.msk.f32.mxu1 %vm12234_vm0, %v14769_v5  ;;  %v2721_v31 = vand.u32 4294901760, %v13114_v21 }
 0x1d1   :  { %v2714_v13 = vand.u32 4294901760, %v13103_v7 }
 0x1d2   :  { %v2722_v32 = vsub.f32 %v13114_v21, %v2721_v31 }
 0x1d3   :  { %11144 = vmatmul.mubr.msk.f32.gmra.mxu1 %vm1457_vm8, %v12942_v1  ;;  %v13116_v1 = vand.u32 4294901760, %v2575_v12  ;;  %v2715_v28 = vsub.f32 %v13103_v7, %v2714_v13 }
 0x1d4   :  { %11171 = vmatprep.mubr.msk.f32.mxu1 %vm12234_vm0, %v14769_v5  ;;  %v2723_v42 = vand.u32 4294901760, %v2722_v32 }
 0x1d5   :  { %v13128_v34 = vsub.f32 %v2575_v12, %v13116_v1  ;;  %11151 = vmatpush3.msra.mxu0 %v13116_v1  ;;  %v2716_v33 = vand.u32 4294901760, %v2715_v28 }
 0x1d6   :  { %11152 = vmatprep.subr.mxu0 %v14769_v5 }
 0x1d7   :  { %v2728_v38 = vand.u32 4294901760, %v13128_v34  ;;  %11153 = vmatpush3.msra.mxu0 %v13130_v37  ;;  %11164 = vmatpush3.msra.mxu1 %v2716_v33 }
 0x1d8   :  { %11180 = vmatprep.subr.mxu0 %v14769_v5  ;;  %11165 = vmatprep.subr.mxu1 %v14769_v5 }
 0x1d9   :  { %v2729_v43 = vsub.f32 %v13128_v34, %v2728_v38  ;;  %11166 = vmatpush3.msra.mxu1 %v2723_v42 }
 0x1da   :  { %11167 = vmatprep.subr.mxu1 %v14769_v5 }
 0x1db   :  { %v2730_v49 = vand.u32 4294901760, %v2729_v43 }
 0x1dd   :  { %11168 = vmatpush3.msra.mxu1 %v2730_v49 }
 0x1de   :  { %11169 = vmatprep.subr.mxu1 %v14769_v5 }
 0x1df   :  { %11170 = vmatpush3.msra.mxu1 %v2737_v50 }
 0x1e0   :  { %11197 = vmatprep.subr.mxu1 %v14769_v5 }
 0x246   :  { %v1544_v51 = vpop.f32.mrf.mxu0 }
 0x248   :  { %v10996_v53 = vpop.f32.mrf.mxu0 }
 0x24a   :  { %v1554_v56 = vpop.f32.mrf.mxu0 }
 0x24c   :  { %v10999_v57 = vpop.f32.mrf.mxu0 }
 0x24e   :  { %v1564_v36 = vpop.f32.mrf.mxu0  ;;  %v1645_v59 = vpop.f32.mrf.mxu1 }
 0x24f   :  { %v1646_v63 = vadd.f32 %v1645_v59, %v1544_v51 }
 0x250   :  { %v11002_v14 = vpop.f32.mrf.mxu0  ;;  %v11009_v60 = vpop.f32.mrf.mxu1 }
 0x252   :  { %v1733_v58 = vpop.f32.mrf.mxu0 }
 0x253   :  { %v1651_v19 = vpop.f32.mrf.mxu1  ;;  %v1734_v61 = vadd.f32 %v1733_v58, %v1646_v63 }
 0x254   :  { %v1652_v8 = vadd.f32 %v1651_v19, %v1554_v56  ;;  %v11022_v9 = vpop.f32.mrf.mxu0 }
 0x255   :  { %v11012_v10 = vpop.f32.mrf.mxu1 }
 0x256   :  { %v1740_v17 = vpop.f32.mrf.mxu0 }
 0x257   :  { %v1657_v20 = vpop.f32.mrf.mxu1  ;;  %v1741_v22 = vadd.f32 %v1740_v17, %v1652_v8 }
 0x258   :  { %v1658_v23 = vadd.f32 %v1657_v20, %v1564_v36  ;;  %v11025_v24 = vpop.f32.mrf.mxu0 }
 0x259   :  { %v11015_v25 = vpop.f32.mrf.mxu1 }
 0x25a   :  { %v1747_v26 = vpop.f32.mrf.mxu0 }
 0x25b   :  { %v1748_v27 = vadd.f32 %v1747_v26, %v1658_v23  ;;  %v1822_v29 = vpop.f32.mrf.mxu1 }
 0x25c   :  { %v1823_v62 = vadd.f32 %v1822_v29, %v1734_v61  ;;  %v11028_v35 = vpop.f32.mrf.mxu0 }
 0x25d   :  { %v11035_v18 = vpop.f32.mrf.mxu1 }
 0x25e   :  { %v1915_v40 = vpop.f32.mrf.mxu0 }
 0x25f   :  { %v1830_v47 = vpop.f32.mrf.mxu1  ;;  %v1916_v0 = vadd.f32 %v1915_v40, %v1823_v62 }
 0x260   :  { %v1831_v2 = vadd.f32 %v1830_v47, %v1741_v22  ;;  %v11048_v54 = vpop.f32.mrf.mxu0 }
 0x261   :  { %v11038_v41 = vpop.f32.mrf.mxu1 }
 0x262   :  { %v1921_v12 = vpop.f32.mrf.mxu0 }
 0x263   :  { %v1838_v6 = vpop.f32.mrf.mxu1  ;;  %v1922_v28 = vadd.f32 %v1921_v12, %v1831_v2 }
 0x264   :  { %v1839_v33 = vadd.f32 %v1838_v6, %v1748_v27  ;;  %v11051_v32 = vpop.f32.mrf.mxu0 }
 0x265   :  { %v11041_v42 = vpop.f32.mrf.mxu1 }
 0x266   :  { %v1927_v43 = vpop.f32.mrf.mxu0 }
 0x267   :  { %v1928_v49 = vadd.f32 %v1927_v43, %v1839_v33  ;;  %v2000_v48 = vpop.f32.mrf.mxu1 }
 0x268   :  { %v13154_v50 = vadd.f32 %v2000_v48, %v1916_v0  ;;  %v11054_v51 = vpop.f32.mrf.mxu0 }
 0x269   :  { %v11061_v53 = vpop.f32.mrf.mxu1 }
 0x26a   :  { %v2098_v56 = vpop.f32.mrf.mxu0 }
 0x26b   :  { %v2006_v57 = vpop.f32.mrf.mxu1 }
 0x26c   :  { %v13156_v36 = vadd.f32 %v2006_v57, %v1922_v28  ;;  %v11074_v59 = vpop.f32.mrf.mxu0 }
 0x26d   :  { %v11064_v63 = vpop.f32.mrf.mxu1 }
 0x26e   :  { %v2108_v14 = vpop.f32.mrf.mxu0 }
 0x26f   :  { %v2012_v60 = vpop.f32.mrf.mxu1 }
 0x270   :  { %v13158_v58 = vadd.f32 %v2012_v60, %v1928_v49  ;;  %v11077_v19 = vpop.f32.mrf.mxu0 }
 0x271   :  { %v11067_v61 = vpop.f32.mrf.mxu1 }
 0x272   :  { %v2118_v8 = vpop.f32.mrf.mxu0 }
 0x273   :  { %v2199_v9 = vpop.f32.mrf.mxu1 }
 0x274   :  { %v11080_v10 = vpop.f32.mrf.mxu0  ;;  %v2200_v2 = vadd.f32 %v2199_v9, %v2098_v56 }
 0x275   :  { %v11087_v17 = vpop.f32.mrf.mxu1 }
 0x276   :  { %v2287_v20 = vpop.f32.mrf.mxu0 }
 0x277   :  { %v2205_v22 = vpop.f32.mrf.mxu1  ;;  %v2288_v12 = vadd.f32 %v2287_v20, %v2200_v2 }
 0x278   :  { %v11100_v23 = vpop.f32.mrf.mxu0  ;;  %v2206_v33 = vadd.f32 %v2205_v22, %v2108_v14 }
 0x279   :  { %v11090_v24 = vpop.f32.mrf.mxu1 }
 0x27a   :  { %v2294_v25 = vpop.f32.mrf.mxu0 }
 0x27b   :  { %v2211_v26 = vpop.f32.mrf.mxu1  ;;  %v2295_v49 = vadd.f32 %v2294_v25, %v2206_v33 }
 0x27c   :  { %v11103_v27 = vpop.f32.mrf.mxu0  ;;  %v2212_v57 = vadd.f32 %v2211_v26, %v2118_v8 }
 0x27d   :  { %v11093_v29 = vpop.f32.mrf.mxu1 }
 0x27e   :  { %v2301_v62 = vpop.f32.mrf.mxu0 }
 0x27f   :  { %v2376_v35 = vpop.f32.mrf.mxu1  ;;  %v2302_v56 = vadd.f32 %v2301_v62, %v2212_v57 }
 0x280   :  { %v11106_v18 = vpop.f32.mrf.mxu0  ;;  %v2377_v32 = vadd.f32 %v2376_v35, %v2288_v12 }
 0x281   :  { %v11113_v40 = vpop.f32.mrf.mxu1 }
 0x282   :  { %v2469_v47 = vpop.f32.mrf.mxu0 }
 0x283   :  { %v2384_v0 = vpop.f32.mrf.mxu1  ;;  %v2470_v48 = vadd.f32 %v2469_v47, %v2377_v32  ;;  %v2572_v32 = vld [vmem:[%s14760_s9 + $0x10] sm:$0xff] }
 0x284   :  { %v11126_v54 = vpop.f32.mrf.mxu0  ;;  %v2385_v59 = vadd.f32 %v2384_v0, %v2295_v49  ;;  %v2571_v49 = vld [vmem:[%s14760_s9 + $0x8] sm:$0xff] }
 0x285   :  { %v11116_v41 = vpop.f32.mrf.mxu1  ;;  %v2573_v54 = vld [vmem:[%s14760_s9 + $0x18] sm:$0xff]  ;;  %v13232_v57 = vand.u32 4294901760, %v2571_v49 }
 0x286   :  { %v2475_v6 = vpop.f32.mrf.mxu0  ;;  %v13206_v33 = vand.u32 4294901760, %v2573_v54 }
 0x287   :  { %v2392_v28 = vpop.f32.mrf.mxu1  ;;  %v2476_v61 = vadd.f32 %v2475_v6, %v2385_v59 }
 0x288   :  { %v11129_v42 = vpop.f32.mrf.mxu0  ;;  %v2393_v17 = vadd.f32 %v2392_v28, %v2302_v56 }
 0x289   :  { %v11119_v43 = vpop.f32.mrf.mxu1 }
 0x28a   :  { %v2481_v51 = vpop.f32.mrf.mxu0  ;;  %v13216_v43 = vand.u32 4294901760, %v2572_v32 }
 0x28b   :  { %v2554_v53 = vpop.f32.mrf.mxu1  ;;  %v2482_v8 = vadd.f32 %v2481_v51, %v2393_v17  ;;  %v13225_v51 = vsub.f32 %v2573_v54, %v13206_v33  ;;  %v3739_v54 = vld [vmem:[%s14760_s9 + $0x40] sm:$0xff] }
 0x28c   :  { %v2555_v63 = vadd.f32 %v2554_v53, %v2470_v48  ;;  %v11132_v60 = vpop.f32.mrf.mxu0  ;;  %v2570_v53 = vld [vmem:[%s14760_s9] sm:$0xff]  ;;  %v13237_v59 = vsub.f32 %v2572_v32, %v13216_v43  ;;  %v13434_v32 = vand.u32 4294901760, %v3739_v54 }
 0x28d   :  { %v11139_v19 = vpop.f32.mrf.mxu1  ;;  %v13250_v60 = vsub.f32 %v2571_v49, %v13232_v57 }
 0x28e   :  { %v2580_v9 = vsel %vm2578_vm15, %v2555_v63, 0  ;;  %v13243_v63 = vand.u32 4294901760, %v2570_v53  ;;  %v3301_v19 = vand.u32 4294901760, %v13237_v59 }
 0x28f   :  { %v13161_v10 = vand.u32 4294901760, %v2580_v9  ;;  %v2560_v14 = vpop.f32.mrf.mxu1 }
 0x290   :  { %v2561_v20 = vadd.f32 %v2560_v14, %v2476_v61  ;;  %v13263_v56 = vsub.f32 %v2570_v53, %v13243_v63  ;;  %v3302_v61 = vsub.f32 %v13237_v59, %v3301_v19  ;;  %v3160_v14 = vsel %vm2578_vm15, %v13154_v50, 0 }
 0x291   :  { %v13164_v22 = vsub.f32 %v2580_v9, %v13161_v10  ;;  %v11142_v23 = vpop.f32.mrf.mxu1  ;;  %11172 = vmatmul.mubr.f32.vlgmr.msra.gmra.mxu1 %v13161_v10  ;;  %v13293_v50 = vand.u32 4294901760, %v3160_v14 }
 0x292   :  { %v2583_v24 = vsel %vm2578_vm15, %v2561_v20, 0  ;;  %11174 = vmatprep.mubr.msk.f32.mxu1 %vm12234_vm0, %v14769_v5  ;;  %11198 = vmatpush3.msra.mxu1 %v13097_v55 }
 0x293   :  { %v2659_v25 = vand.u32 4294901760, %v13164_v22  ;;  %v13172_v26 = vand.u32 4294901760, %v2583_v24  ;;  %v2566_v27 = vpop.f32.mrf.mxu1  ;;  %11199 = vmatprep.subr.mxu1 %v14769_v5 }
 0x294   :  { %v2567_v29 = vadd.f32 %v2566_v27, %v2482_v8  ;;  %11200 = vmatpush3.msra.mxu1 %v13105_v11 }
 0x295   :  { %v2660_v62 = vsub.f32 %v13164_v22, %v2659_v25  ;;  %v13178_v35 = vsub.f32 %v2583_v24, %v13172_v26  ;;  %v11145_v18 = vpop.f32.mrf.mxu1  ;;  %11175 = vmatmul.mubr.f32.gmra.mxu1 %v13172_v26  ;;  %11201 = vmatprep.subr.mxu1 %v14769_v5 }
 0x296   :  { %v2586_v40 = vsel %vm2578_vm15, %v2567_v29, 0  ;;  %11177 = vmatprep.mubr.msk.f32.mxu1 %vm12234_vm0, %v14769_v5  ;;  %11202 = vmatpush3.msra.mxu1 %v13116_v1 }
 0x297   :  { %v2661_v47 = vand.u32 4294901760, %v2660_v62  ;;  %v13186_v0 = vand.u32 4294901760, %v2586_v40  ;;  %11203 = vmatprep.subr.mxu1 %v14769_v5  ;;  %v2669_v2 = vand.u32 4294901760, %v13178_v35 }
 0x298   :  { %11204 = vmatpush3.msra.mxu1 %v13130_v37 }
 0x299   :  { %v13195_v41 = vsub.f32 %v2586_v40, %v13186_v0  ;;  %11155 = vmatmul.mubr.f32.vlgmr.msra.gmra.mxu0 %v2661_v47  ;;  %11178 = vmatmul.mubr.f32.gmra.mxu1 %v13186_v0  ;;  %v2670_v12 = vsub.f32 %v13178_v35, %v2669_v2  ;;  %v3740_v47 = vld [vmem:[%s14760_s9 + $0x48] sm:$0xff] }
 0x29a   :  { %11157 = vmatprep.mubr.msk.f32.mxu0 %vm12234_vm0, %v14769_v5  ;;  %11205 = vmatprep.mubr.msk.f32.mxu1 %vm12234_vm0, %v14769_v5 }
 0x29b   :  { %v2671_v6 = vand.u32 4294901760, %v2670_v12  ;;  %11181 = vmatpush3.msra.mxu0 %v13103_v7  ;;  %v2679_v28 = vand.u32 4294901760, %v13195_v41  ;;  %11231 = vmatprep.subr.mxu1 %v14769_v5 }
 0x29c   :  { %11182 = vmatprep.subr.mxu0 %v14769_v5 }
 0x29d   :  { %11158 = vmatmul.mubr.f32.gmra.mxu0 %v2671_v6  ;;  %11206 = vmatmul.mubr.f32.vlgmr.msra.gmra.mxu1 %v2659_v25  ;;  %v2680_v42 = vsub.f32 %v13195_v41, %v2679_v28  ;;  %v769_v6 = vpop.xlane.xlu0 %768 }
 0x29e   :  { %11160 = vmatprep.mubr.msk.f32.mxu0 %vm12234_vm0, %v14769_v5  ;;  %11183 = vmatpush3.msra.mxu0 %v13114_v21  ;;  %vm775_vm2 = vcmp.gt.f32.partialorder %v769_v6, 0.5 }
 0x29f   :  { %11208 = vmatprep.mubr.msk.f32.mxu1 %vm12234_vm0, %v14769_v5  ;;  %v2681_v48 = vand.u32 4294901760, %v2680_v42  ;;  %11184 = vmatprep.subr.mxu0 %v14769_v5 }
 0x2a0   :  { %11185 = vmatpush3.msra.mxu0 %v13128_v34  ;;  %11232 = vmatpush3.msra.mxu1 %v13097_v55  ;;  %v3294_v55 = vand.u32 4294901760, %v13225_v51 }
 0x2a1   :  { %11161 = vmatmul.mubr.f32.gmra.mxu0 %v2681_v48  ;;  %11209 = vmatmul.mubr.f32.gmra.mxu1 %v2669_v2  ;;  %v773_v53 = vpop.xlane.xlu0 %772 }
 0x2a2   :  { %11186 = vmatprep.subr.mxu0 %v14769_v5  ;;  %11233 = vmatprep.subr.mxu1 %v14769_v5  ;;  %vm776_vm3 = vcmp.gt.f32.partialorder %v773_v53, 0.5 }
 0x2a3   :  { %11187 = vmatpush3.msra.mxu0 %v13139_v39  ;;  %11188 = vmatprep.mubr.msk.f32.mxu0 %vm12234_vm0, %v14769_v5  ;;  %v3166_v39 = vsel %vm2578_vm15, %v13158_v58, 0 }
 0x2a4   :  { %11211 = vmatprep.mubr.msk.f32.mxu1 %vm12234_vm0, %v14769_v5  ;;  %11234 = vmatpush3.msra.mxu1 %v13105_v11  ;;  %v3295_v11 = vsub.f32 %v13225_v51, %v3294_v55  ;;  %v13332_v58 = vand.u32 4294901760, %v3166_v39 }
 0x2a5   :  { %11189 = vmatmul.mubr.f32.vlgmr.msra.gmra.mxu0 %v13164_v22  ;;  %11212 = vmatmul.mubr.f32.gmra.mxu1 %v2679_v28 }
 0x2a6   :  { %11235 = vmatprep.subr.mxu1 %v14769_v5  ;;  %11191 = vmatprep.mubr.msk.f32.mxu0 %vm12234_vm0, %v14769_v5  ;;  %v3296_v9 = vand.u32 4294901760, %v3295_v11  ;;  %v13346_v22 = vsub.f32 %v3166_v39, %v13332_v58  ;;  %v13455_v11 = vsub.f32 %v3739_v54, %v13434_v32 }
 0x2a7   :  { %11236 = vmatpush3.msra.mxu1 %v13116_v1  ;;  %11239 = vmatprep.mubr.msk.f32.mxu1 %vm12234_vm0, %v14769_v5  ;;  %v3308_v1 = vand.u32 4294901760, %v13250_v60 }
 0x2a8   :  { %11237 = vmatprep.subr.mxu1 %v14769_v5  ;;  %11214 = vmatprep.subr.mxu0 %v14769_v5  ;;  %14784 = vst [vmem:[#allocation8_spill] sm:$0xff] %v13346_v22  ;;  %v13367_v25 = vand.u32 4294901760, %v13346_v22 }
 0x2a9   :  { %11238 = vmatpush3.msra.mxu1 %v13130_v37  ;;  %11192 = vmatmul.mubr.f32.gmra.mxu0 %v13178_v35  ;;  %v3315_v37 = vand.u32 4294901760, %v13263_v56  ;;  %v3309_v7 = vsub.f32 %v13250_v60, %v3308_v1  ;;  %v3741_v35 = vld [vmem:[%s14760_s9 + $0x50] sm:$0xff] }
 0x2aa   :  { %11240 = vmatmul.mubr.f32.vlgmr.msra.gmra.mxu1 %v13161_v10  ;;  %11215 = vmatpush3.msra.mxu0 %v2714_v13  ;;  %v3303_v13 = vand.u32 4294901760, %v3302_v61  ;;  %v3260_v29 = vsub.f32 %v13346_v22, %v13367_v25  ;;  %v13406_v40 = vand.u32 4294901760, %v3741_v35 }
 0x2ab   :  { %11216 = vmatprep.subr.mxu0 %v14769_v5  ;;  %11194 = vmatprep.mubr.msk.f32.mxu0 %vm12234_vm0, %v14769_v5  ;;  %v3316_v21 = vsub.f32 %v13263_v56, %v3315_v37  ;;  %v3310_v34 = vand.u32 4294901760, %v3309_v7 }
 0x2ac   :  { %11217 = vmatpush3.msra.mxu0 %v2721_v31  ;;  %11242 = vmatprep.mubr.msk.f32.mxu1 %vm12234_vm0, %v14769_v5  ;;  %v3163_v31 = vsel %vm2578_vm15, %v13156_v36, 0  ;;  %v13401_v18 = vand.u32 4294901760, %v3260_v29  ;;  %v13428_v12 = vsub.f32 %v3741_v35, %v13406_v40 }
 0x2ad   :  { %11195 = vmatmul.mubr.f32.gmra.mxu0 %v13195_v41  ;;  %11218 = vmatprep.subr.mxu0 %v14769_v5  ;;  %v13313_v17 = vand.u32 4294901760, %v3163_v31  ;;  %v3317_v36 = vand.u32 4294901760, %v3316_v21  ;;  %v13423_v41 = vand.u32 4294901760, %v3740_v47 }
 0x2ae   :  { %11243 = vmatmul.mubr.f32.gmra.mxu1 %v13172_v26  ;;  %11265 = vmatprep.subr.mxu1 %v14769_v5  ;;  %v3885_v48 = vand.u32 4294901760, %v13428_v12 }
 0x2af   :  { %11219 = vmatpush3.msra.mxu0 %v2728_v38  ;;  %11266 = vmatpush3.msra.mxu1 %v3296_v9  ;;  %v13311_v38 = vsub.f32 %v3160_v14, %v13293_v50  ;;  %v13442_v49 = vsub.f32 %v3740_v47, %v13423_v41  ;;  %v3899_v14 = vand.u32 4294901760, %v13455_v11 }
 0x2b0   :  { %11220 = vmatprep.subr.mxu0 %v14769_v5  ;;  %11267 = vmatprep.subr.mxu1 %v14769_v5 }
 0x2b1   :  { %11221 = vmatpush3.msra.mxu0 %v2735_v46  ;;  %11222 = vmatprep.mubr.msk.f32.mxu0 %vm12234_vm0, %v14769_v5  ;;  %v13327_v46 = vand.u32 4294901760, %v13311_v38 }
 0x2b2   :  { %11245 = vmatprep.mubr.msk.f32.mxu1 %vm12234_vm0, %v14769_v5  ;;  %11268 = vmatpush3.msra.mxu1 %v3303_v13 }
 0x2b3   :  { %11223 = vmatmul.mubr.f32.vlgmr.msra.gmra.mxu0 %v13161_v10  ;;  %11246 = vmatmul.mubr.f32.gmra.mxu1 %v13186_v0  ;;  %v13330_v10 = vsub.f32 %v3163_v31, %v13313_v17  ;;  %v3240_v20 = vsub.f32 %v13311_v38, %v13327_v46 }
 0x2b4   :  { %11269 = vmatprep.subr.mxu1 %v14769_v5  ;;  %11225 = vmatprep.mubr.msk.f32.mxu0 %vm12234_vm0, %v14769_v5 }
 0x2b5   :  { %11270 = vmatpush3.msra.mxu1 %v3310_v34  ;;  %11273 = vmatprep.mubr.msk.f32.mxu1 %vm12234_vm0, %v14769_v5  ;;  %14783 = vst [vmem:[#allocation7_spill] sm:$0xff] %v13330_v10  ;;  %v13351_v23 = vand.u32 4294901760, %v13330_v10  ;;  %v13362_v8 = vand.u32 4294901760, %v3240_v20 }
 0x2b6   :  { %11271 = vmatprep.subr.mxu1 %v14769_v5  ;;  %11248 = vmatprep.subr.mxu0 %v14769_v5 }
 0x2b7   :  { %11272 = vmatpush3.msra.mxu1 %v3317_v36  ;;  %11226 = vmatmul.mubr.f32.gmra.mxu0 %v13172_v26  ;;  %v3250_v24 = vsub.f32 %v13330_v10, %v13351_v23  ;;  %v3742_v26 = vld [vmem:[%s14760_s9 + $0x58] sm:$0xff] }
 0x2b8   :  { %11274 = vmatmul.mubr.f32.vlgmr.msra.gmra.mxu1 %v13293_v50  ;;  %11249 = vmatpush3.msra.mxu0 %v13206_v33  ;;  %v13391_v62 = vand.u32 4294901760, %v3742_v26 }
 0x2b9   :  { %11250 = vmatprep.subr.mxu0 %v14769_v5  ;;  %11228 = vmatprep.mubr.msk.f32.mxu0 %vm12234_vm0, %v14769_v5  ;;  %v13383_v27 = vand.u32 4294901760, %v3250_v24 }
 0x2ba   :  { %11251 = vmatpush3.msra.mxu0 %v13216_v43  ;;  %11276 = vmatprep.mubr.msk.f32.mxu1 %vm12234_vm0, %v14769_v5  ;;  %v13414_v2 = vsub.f32 %v3742_v26, %v13391_v62 }
 0x2bb   :  { %11229 = vmatmul.mubr.f32.gmra.mxu0 %v13186_v0  ;;  %11252 = vmatprep.subr.mxu0 %v14769_v5  ;;  %v766_v0 = vpop.xlane.xlu1 %765 }
 0x2bc   :  { %11277 = vmatmul.mubr.f32.gmra.mxu1 %v13313_v17  ;;  %11299 = vmatprep.subr.mxu1 %v14769_v5  ;;  %vm774_vm1 = vcmp.gt.f32.partialorder %v766_v0, 0.5  ;;  %v3878_v28 = vand.u32 4294901760, %v13414_v2 }
 0x2bd   :  { %11253 = vmatpush3.msra.mxu0 %v13232_v57  ;;  %11300 = vmatpush3.msra.mxu1 %v13206_v33 }
 0x2be   :  { %11254 = vmatprep.subr.mxu0 %v14769_v5  ;;  %11301 = vmatprep.subr.mxu1 %v14769_v5 }
 0x2bf   :  { %11255 = vmatpush3.msra.mxu0 %v13243_v63  ;;  %11256 = vmatprep.mubr.msk.f32.mxu0 %vm12234_vm0, %v14769_v5 }
 0x2c0   :  { %11279 = vmatprep.mubr.msk.f32.mxu1 %vm12234_vm0, %v14769_v5  ;;  %11302 = vmatpush3.msra.mxu1 %v13216_v43 }
 0x2c1   :  { %11257 = vmatmul.mubr.f32.vlgmr.msra.gmra.mxu0 %v13362_v8  ;;  %11280 = vmatmul.mubr.f32.gmra.mxu1 %v13332_v58 }
 0x2c2   :  { %11303 = vmatprep.subr.mxu1 %v14769_v5  ;;  %11259 = vmatprep.mubr.msk.f32.mxu0 %vm12234_vm0, %v14769_v5 }
 0x2c3   :  { %11304 = vmatpush3.msra.mxu1 %v13232_v57  ;;  %11307 = vmatprep.mubr.msk.f32.mxu1 %vm12234_vm0, %v14769_v5 }
 0x2c4   :  { %11305 = vmatprep.subr.mxu1 %v14769_v5  ;;  %11282 = vmatprep.subr.mxu0 %v14769_v5 }
 0x2c5   :  { %11306 = vmatpush3.msra.mxu1 %v13243_v63  ;;  %11260 = vmatmul.mubr.f32.gmra.mxu0 %v13383_v27 }
 0x2c6   :  { %11308 = vmatmul.mubr.f32.vlgmr.msra.gmra.mxu1 %v13327_v46  ;;  %11283 = vmatpush3.msra.mxu0 %v13225_v51 }
 0x2c7   :  { %11284 = vmatprep.subr.mxu0 %v14769_v5  ;;  %11262 = vmatprep.mubr.msk.f32.mxu0 %vm12234_vm0, %v14769_v5 }
 0x2c8   :  { %11285 = vmatpush3.msra.mxu0 %v13237_v59  ;;  %11310 = vmatprep.mubr.msk.f32.mxu1 %vm12234_vm0, %v14769_v5  ;;  %v3900_v59 = vsub.f32 %v13455_v11, %v3899_v14 }
 0x2c9   :  { %11263 = vmatmul.mubr.f32.gmra.mxu0 %v13401_v18  ;;  %11286 = vmatprep.subr.mxu0 %v14769_v5 }
 0x2ca   :  { %11311 = vmatmul.mubr.f32.gmra.mxu1 %v13351_v23  ;;  %11333 = vmatprep.subr.mxu1 %v14769_v5 }
 0x2cb   :  { %11287 = vmatpush3.msra.mxu0 %v13250_v60  ;;  %11334 = vmatpush3.msra.mxu1 %v13206_v33  ;;  %v12235_v33 = vmov 1.0  }
 0x2cc   :  { %11288 = vmatprep.subr.mxu0 %v14769_v5  ;;  %11335 = vmatprep.subr.mxu1 %v14769_v5  ;;  %v777_v42 = vsel %vm774_vm1, -1.0, %v12235_v33  ;;  %v778_v9 = vsel %vm775_vm2, -1.0, %v12235_v33  ;;  %v779_v51 = vsel %vm776_vm3, -1.0, %v12235_v33 }
 0x2cd   :  { %11289 = vmatpush3.msra.mxu0 %v13263_v56  ;;  %11290 = vmatprep.mubr.msk.f32.mxu0 %vm12234_vm0, %v14769_v5  ;;  %v1412_v61 = vmul.f32 %v13036_v30, %v777_v42  ;;  %v3886_v30 = vsub.f32 %v13428_v12, %v3885_v48  ;;  %v1413_v13 = vmul.f32 %v13048_v44, %v778_v9 }
 0x2ce   :  { %11313 = vmatprep.mubr.msk.f32.mxu1 %vm12234_vm0, %v14769_v5  ;;  %11336 = vmatpush3.msra.mxu1 %v13216_v43  ;;  %v3879_v43 = vsub.f32 %v13414_v2, %v3878_v28  ;;  %v1414_v31 = vmul.f32 %v13061_v3, %v779_v51  ;;  %v3901_v3 = vand.u32 4294901760, %v3900_v59 }
 0x2cf   :  { %11291 = vmatmul.mubr.f32.vlgmr.msra.gmra.mxu0 %v13311_v38  ;;  %11314 = vmatmul.mubr.f32.gmra.mxu1 %v13367_v25  ;;  %v3744_v7 = vsel %vm2578_vm15, %v1412_v61, 0  ;;  %v3887_v44 = vand.u32 4294901760, %v3886_v30 }
 0x2d0   :  { %11337 = vmatprep.subr.mxu1 %v14769_v5  ;;  %11293 = vmatprep.mubr.msk.f32.mxu0 %vm12234_vm0, %v14769_v5  ;;  %v13486_v21 = vand.u32 4294901760, %v3744_v7  ;;  %v3750_v56 = vsel %vm2578_vm15, %v1414_v31, 0 }
 0x2d1   :  { %11338 = vmatpush3.msra.mxu1 %v13232_v57  ;;  %11341 = vmatprep.mubr.msk.f32.mxu1 %vm12234_vm0, %v14769_v5  ;;  %v3892_v57 = vand.u32 4294901760, %v13442_v49  ;;  %v13522_v39 = vand.u32 4294901760, %v3750_v56 }
 0x2d2   :  { %11339 = vmatprep.subr.mxu1 %v14769_v5  ;;  %11316 = vmatprep.subr.mxu0 %v14769_v5 }
 0x2d3   :  { %11340 = vmatpush3.msra.mxu1 %v13243_v63  ;;  %11294 = vmatmul.mubr.f32.gmra.mxu0 %v13330_v10  ;;  %v3880_v63 = vand.u32 4294901760, %v3879_v43  ;;  %v13535_v24 = vsub.f32 %v3750_v56, %v13522_v39 }
 0x2d4   :  { %11342 = vmatmul.mubr.f32.vlgmr.msra.gmra.mxu1 %v13293_v50  ;;  %11317 = vmatpush3.msra.mxu0 %v3294_v55  ;;  %v3893_v55 = vsub.f32 %v13442_v49, %v3892_v57 }
 0x2d5   :  { %11318 = vmatprep.subr.mxu0 %v14769_v5  ;;  %11296 = vmatprep.mubr.msk.f32.mxu0 %vm12234_vm0, %v14769_v5  ;;  %v3843_v47 = vand.u32 4294901760, %v13535_v24 }
 0x2d6   :  { %11319 = vmatpush3.msra.mxu0 %v3301_v19  ;;  %11344 = vmatprep.mubr.msk.f32.mxu1 %vm12234_vm0, %v14769_v5  ;;  %v3747_v19 = vsel %vm2578_vm15, %v1413_v13, 0  ;;  %v3894_v60 = vand.u32 4294901760, %v3893_v55 }
 0x2d7   :  { %11297 = vmatmul.mubr.f32.gmra.mxu0 %v13346_v22  ;;  %11320 = vmatprep.subr.mxu0 %v14769_v5  ;;  %v13506_v34 = vand.u32 4294901760, %v3747_v19  ;;  %v3844_v54 = vsub.f32 %v13535_v24, %v3843_v47 }
 0x2d8   :  { %11345 = vmatmul.mubr.f32.gmra.mxu1 %v13313_v17  ;;  %11367 = vmatprep.subr.mxu1 %v14769_v5 }
 0x2d9   :  { %11321 = vmatpush3.msra.mxu0 %v3308_v1  ;;  %11368 = vmatpush3.msra.mxu1 %v3880_v63  ;;  %v13504_v1 = vsub.f32 %v3744_v7, %v13486_v21  ;;  %v13520_v36 = vsub.f32 %v3747_v19, %v13506_v34  ;;  %v3845_v6 = vand.u32 4294901760, %v3844_v54 }
 0x2da   :  { %11322 = vmatprep.subr.mxu0 %v14769_v5  ;;  %11369 = vmatprep.subr.mxu1 %v14769_v5 }
 0x2db   :  { %11323 = vmatpush3.msra.mxu0 %v3315_v37  ;;  %11324 = vmatprep.mubr.msk.f32.mxu0 %vm12234_vm0, %v14769_v5  ;;  %v3823_v37 = vand.u32 4294901760, %v13504_v1  ;;  %v3833_v26 = vand.u32 4294901760, %v13520_v36 }
 0x2dc   :  { %11347 = vmatprep.mubr.msk.f32.mxu1 %vm12234_vm0, %v14769_v5  ;;  %11370 = vmatpush3.msra.mxu1 %v3887_v44 }
 0x2dd   :  { %11325 = vmatmul.mubr.f32.vlgmr.msra.gmra.mxu0 %v13293_v50  ;;  %11348 = vmatmul.mubr.f32.gmra.mxu1 %v13332_v58  ;;  %v3824_v20 = vsub.f32 %v13504_v1, %v3823_v37  ;;  %v3834_v35 = vsub.f32 %v13520_v36, %v3833_v26 }
 0x2de   :  { %11371 = vmatprep.subr.mxu1 %v14769_v5  ;;  %11327 = vmatprep.mubr.msk.f32.mxu0 %vm12234_vm0, %v14769_v5 }
 0x2df   :  { %11372 = vmatpush3.msra.mxu1 %v3894_v60  ;;  %11375 = vmatprep.mubr.msk.f32.mxu1 %vm12234_vm0, %v14769_v5  ;;  %v3825_v29 = vand.u32 4294901760, %v3824_v20  ;;  %v3835_v0 = vand.u32 4294901760, %v3834_v35 }
 0x2e0   :  { %11373 = vmatprep.subr.mxu1 %v14769_v5  ;;  %11350 = vmatprep.subr.mxu0 %v14769_v5 }
 0x2e1   :  { %11374 = vmatpush3.msra.mxu1 %v3901_v3  ;;  %11328 = vmatmul.mubr.f32.gmra.mxu0 %v13313_v17 }
 0x2e2   :  { %11376 = vmatmul.mubr.f32.vlgmr.msra.gmra.mxu1 %v13486_v21  ;;  %11351 = vmatpush3.msra.mxu0 %v13391_v62 }
 0x2e3   :  { %11352 = vmatprep.subr.mxu0 %v14769_v5  ;;  %11330 = vmatprep.mubr.msk.f32.mxu0 %vm12234_vm0, %v14769_v5 }
 0x2e4   :  { %11353 = vmatpush3.msra.mxu0 %v13406_v40  ;;  %11378 = vmatprep.mubr.msk.f32.mxu1 %vm12234_vm0, %v14769_v5 }
 0x2e5   :  { %11331 = vmatmul.mubr.f32.gmra.mxu0 %v13332_v58  ;;  %11354 = vmatprep.subr.mxu0 %v14769_v5 }
 0x2e6   :  { %11379 = vmatmul.mubr.f32.gmra.mxu1 %v13506_v34  ;;  %11401 = vmatprep.subr.mxu1 %v14769_v5 }
 0x2e7   :  { %11355 = vmatpush3.msra.mxu0 %v13423_v41  ;;  %11402 = vmatpush3.msra.mxu1 %v13391_v62 }
 0x2e8   :  { %11356 = vmatprep.subr.mxu0 %v14769_v5  ;;  %11403 = vmatprep.subr.mxu1 %v14769_v5 }
 0x2e9   :  { %11357 = vmatpush3.msra.mxu0 %v13434_v32  ;;  %11358 = vmatprep.mubr.msk.f32.mxu0 %vm12234_vm0, %v14769_v5 }
 0x2ea   :  { %11381 = vmatprep.mubr.msk.f32.mxu1 %vm12234_vm0, %v14769_v5  ;;  %11404 = vmatpush3.msra.mxu1 %v13406_v40 }
 0x2eb   :  { %11359 = vmatmul.mubr.f32.vlgmr.msra.gmra.mxu0 %v3825_v29  ;;  %11382 = vmatmul.mubr.f32.gmra.mxu1 %v13522_v39 }
 0x2ec   :  { %11405 = vmatprep.subr.mxu1 %v14769_v5  ;;  %11361 = vmatprep.mubr.msk.f32.mxu0 %vm12234_vm0, %v14769_v5 }
 0x2ed   :  { %11406 = vmatpush3.msra.mxu1 %v13423_v41  ;;  %11409 = vmatprep.mubr.msk.f32.mxu1 %vm12234_vm0, %v14769_v5 }
 0x2ee   :  { %11407 = vmatprep.subr.mxu1 %v14769_v5  ;;  %11384 = vmatprep.subr.mxu0 %v14769_v5 }
 0x2ef   :  { %11408 = vmatpush3.msra.mxu1 %v13434_v32  ;;  %11362 = vmatmul.mubr.f32.gmra.mxu0 %v3835_v0 }
 0x2f0   :  { %11410 = vmatmul.mubr.f32.vlgmr.msra.gmra.mxu1 %v3823_v37  ;;  %11385 = vmatpush3.msra.mxu0 %v13414_v2  ;;  %v4339_v2 = vld [vmem:[%s14760_s9 + $0x70] sm:$0xff] }
 0x2f1   :  { %11386 = vmatprep.subr.mxu0 %v14769_v5  ;;  %11364 = vmatprep.mubr.msk.f32.mxu0 %vm12234_vm0, %v14769_v5 }
 0x2f2   :  { %11387 = vmatpush3.msra.mxu0 %v13428_v12  ;;  %11412 = vmatprep.mubr.msk.f32.mxu1 %vm12234_vm0, %v14769_v5  ;;  %v13642_v12 = vand.u32 4294901760, %v4339_v2 }
 0x2f3   :  { %11365 = vmatmul.mubr.f32.gmra.mxu0 %v3845_v6  ;;  %11388 = vmatprep.subr.mxu0 %v14769_v5 }
 0x2f4   :  { %11413 = vmatmul.mubr.f32.gmra.mxu1 %v3833_v26  ;;  %11435 = vmatprep.subr.mxu1 %v14769_v5  ;;  %v13651_v33 = vsub.f32 %v4339_v2, %v13642_v12 }
 0x2f5   :  { %11389 = vmatpush3.msra.mxu0 %v13442_v49  ;;  %11436 = vmatpush3.msra.mxu1 %v13391_v62  ;;  %v4340_v62 = vld [vmem:[%s14760_s9 + $0x78] sm:$0xff]  ;;  %v4337_v49 = vld [vmem:[%s14760_s9 + $0x60] sm:$0xff] }
 0x2f6   :  { %11390 = vmatprep.subr.mxu0 %v14769_v5  ;;  %11437 = vmatprep.subr.mxu1 %v14769_v5  ;;  %v14767_v53 = vand.u32 4294901760, %v13651_v33 }
 0x2f7   :  { %11391 = vmatpush3.msra.mxu0 %v13455_v11  ;;  %11392 = vmatprep.mubr.msk.f32.mxu0 %vm12234_vm0, %v14769_v5  ;;  %v13667_v11 = vand.u32 4294901760, %v4337_v49 }
 0x2f8   :  { %11415 = vmatprep.mubr.msk.f32.mxu1 %vm12234_vm0, %v14769_v5  ;;  %11438 = vmatpush3.msra.mxu1 %v13406_v40  ;;  %v13634_v40 = vand.u32 4294901760, %v4340_v62  ;;  %v4489_v9 = vsub.f32 %v13651_v33, %v14767_v53 }
 0x2f9   :  { %11393 = vmatmul.mubr.f32.vlgmr.msra.gmra.mxu0 %v13504_v1  ;;  %11416 = vmatmul.mubr.f32.gmra.mxu1 %v3843_v47  ;;  %v13676_v30 = vsub.f32 %v4337_v49, %v13667_v11 }
 0x2fa   :  { %11439 = vmatprep.subr.mxu1 %v14769_v5  ;;  %11395 = vmatprep.mubr.msk.f32.mxu0 %vm12234_vm0, %v14769_v5  ;;  %v4490_v63 = vand.u32 4294901760, %v4489_v9 }
 0x2fb   :  { %11440 = vmatpush3.msra.mxu1 %v13423_v41  ;;  %11443 = vmatprep.mubr.msk.f32.mxu1 %vm12234_vm0, %v14769_v5  ;;  %v13640_v41 = vsub.f32 %v4340_v62, %v13634_v40  ;;  %v14765_v7 = vand.u32 4294901760, %v13676_v30 }
 0x2fc   :  { %11441 = vmatprep.subr.mxu1 %v14769_v5  ;;  %11418 = vmatprep.subr.mxu0 %v14769_v5 }
 0x2fd   :  { %11442 = vmatpush3.msra.mxu1 %v13434_v32  ;;  %11396 = vmatmul.mubr.f32.gmra.mxu0 %v13520_v36  ;;  %v14768_v32 = vand.u32 4294901760, %v13640_v41  ;;  %v4503_v51 = vsub.f32 %v13676_v30, %v14765_v7 }
 0x2fe   :  { %11444 = vmatmul.mubr.f32.vlgmr.msra.gmra.mxu1 %v13486_v21  ;;  %11419 = vmatpush3.msra.mxu0 %v3878_v28  ;;  %v4338_v28 = vld [vmem:[%s14760_s9 + $0x68] sm:$0xff] }
 0x2ff   :  { %11420 = vmatprep.subr.mxu0 %v14769_v5  ;;  %11398 = vmatprep.mubr.msk.f32.mxu0 %vm12234_vm0, %v14769_v5  ;;  %v13653_v42 = vand.u32 4294901760, %v4338_v28  ;;  %v4504_v44 = vand.u32 4294901760, %v4503_v51 }
 0x300   :  { %11421 = vmatpush3.msra.mxu0 %v3885_v48  ;;  %11446 = vmatprep.mubr.msk.f32.mxu1 %vm12234_vm0, %v14769_v5  ;;  %v4482_v48 = vsub.f32 %v13640_v41, %v14768_v32 }
 0x301   :  { %11399 = vmatmul.mubr.f32.gmra.mxu0 %v13535_v24  ;;  %11422 = vmatprep.subr.mxu0 %v14769_v5  ;;  %v13665_v43 = vsub.f32 %v4338_v28, %v13653_v42 }
 0x302   :  { %11447 = vmatmul.mubr.f32.gmra.mxu1 %v13506_v34  ;;  %11423 = vmatpush3.msra.mxu0 %v3892_v57  ;;  %v4483_v61 = vand.u32 4294901760, %v4482_v48 }
 0x303   :  { %11424 = vmatprep.subr.mxu0 %v14769_v5  ;;  %11426 = vmatprep.mubr.msk.f32.mxu0 %vm12234_vm0, %v14769_v5  ;;  %v14766_v57 = vand.u32 4294901760, %v13665_v43 }
 0x304   :  { %11425 = vmatpush3.msra.mxu0 %v3899_v14  ;;  %11449 = vmatprep.mubr.msk.f32.mxu1 %vm12234_vm0, %v14769_v5 }
 0x305   :  { %11427 = vmatmul.mubr.f32.vlgmr.msra.gmra.mxu0 %v13486_v21  ;;  %11469 = vmatprep.subr.mxu1 %v14769_v5  ;;  %v4496_v14 = vsub.f32 %v13665_v43, %v14766_v57 }
 0x306   :  { %11450 = vmatmul.mubr.f32.gmra.mxu1 %v13522_v39  ;;  %11429 = vmatprep.mubr.msk.f32.mxu0 %vm12234_vm0, %v14769_v5 }
 0x307   :  { %11477 = vmatprep.mubr.msk.f32.mxu1 %vm12234_vm0, %v14769_v5  ;;  %11452 = vmatprep.subr.mxu0 %v14769_v5  ;;  %v4497_v13 = vand.u32 4294901760, %v4496_v14 }
 0x308   :  { %11453 = vmatpush3.msra.mxu0 %v13634_v40  ;;  %11470 = vmatpush3.msra.mxu1 %v4483_v61 }
 0x309   :  { %11430 = vmatmul.mubr.f32.gmra.mxu0 %v13506_v34  ;;  %11454 = vmatprep.subr.mxu0 %v14769_v5 }
 0x30a   :  { %11432 = vmatprep.mubr.msk.f32.mxu0 %vm12234_vm0, %v14769_v5  ;;  %11455 = vmatpush3.msra.mxu0 %v13642_v12 }
 0x30b   :  { %11456 = vmatprep.subr.mxu0 %v14769_v5  ;;  %11471 = vmatprep.subr.mxu1 %v14769_v5 }
 0x30c   :  { %11457 = vmatpush3.msra.mxu0 %v13653_v42  ;;  %11472 = vmatpush3.msra.mxu1 %v4490_v63 }
 0x30d   :  { %11433 = vmatmul.mubr.f32.gmra.mxu0 %v13522_v39  ;;  %11458 = vmatprep.subr.mxu0 %v14769_v5 }
 0x30e   :  { %11460 = vmatprep.mubr.msk.f32.mxu0 %vm12234_vm0, %v14769_v5  ;;  %11459 = vmatpush3.msra.mxu0 %v13667_v11 }
 0x30f   :  { %11486 = vmatprep.subr.mxu0 %v14769_v5  ;;  %11473 = vmatprep.subr.mxu1 %v14769_v5 }
 0x310   :  { %11474 = vmatpush3.msra.mxu1 %v4497_v13 }
 0x311   :  { %11475 = vmatprep.subr.mxu1 %v14769_v5 }
 0x312   :  { %11476 = vmatpush3.msra.mxu1 %v4504_v44 }
 0x313   :  { %11503 = vmatprep.subr.mxu1 %v14769_v5 }
 0x351   :  { %v2774_v55 = vpop.f32.mrf.mxu1 }
 0x353   :  { %v11173_v21 = vpop.f32.mrf.mxu1 }
 0x355   :  { %v2780_v59 = vpop.f32.mrf.mxu1 }
 0x357   :  { %v11176_v19 = vpop.f32.mrf.mxu1 }
 0x359   :  { %v2663_v31 = vpop.f32.mrf.mxu0  ;;  %v2786_v60 = vpop.f32.mrf.mxu1 }
 0x35a   :  { %v2775_v1 = vadd.f32 %v2774_v55, %v2663_v31 }
 0x35b   :  { %v11156_v34 = vpop.f32.mrf.mxu0  ;;  %v11179_v3 = vpop.f32.mrf.mxu1 }
 0x35d   :  { %v2673_v56 = vpop.f32.mrf.mxu0  ;;  %v2957_v37 = vpop.f32.mrf.mxu1 }
 0x35e   :  { %v2781_v36 = vadd.f32 %v2780_v59, %v2673_v56 }
 0x35f   :  { %v11159_v39 = vpop.f32.mrf.mxu0  ;;  %v11207_v20 = vpop.f32.mrf.mxu1 }
 0x361   :  { %v2683_v24 = vpop.f32.mrf.mxu0  ;;  %v2965_v26 = vpop.f32.mrf.mxu1 }
 0x362   :  { %v2787_v29 = vadd.f32 %v2786_v60, %v2683_v24 }
 0x363   :  { %v11162_v35 = vpop.f32.mrf.mxu0  ;;  %v11210_v47 = vpop.f32.mrf.mxu1 }
 0x365   :  { %v2866_v0 = vpop.f32.mrf.mxu0  ;;  %v2973_v54 = vpop.f32.mrf.mxu1 }
 0x366   :  { %v2867_v6 = vadd.f32 %v2866_v0, %v2775_v1 }
 0x367   :  { %v11190_v62 = vpop.f32.mrf.mxu0  ;;  %v11213_v2 = vpop.f32.mrf.mxu1 }
 0x368   :  { %v2958_v28 = vadd.f32 %v2957_v37, %v2867_v6 }
 0x369   :  { %v2873_v49 = vpop.f32.mrf.mxu0 }
 0x36a   :  { %v2874_v48 = vadd.f32 %v2873_v49, %v2781_v36  ;;  %v3143_v61 = vpop.f32.mrf.mxu1 }
 0x36b   :  { %v11193_v9 = vpop.f32.mrf.mxu0 }
 0x36c   :  { %v11241_v63 = vpop.f32.mrf.mxu1  ;;  %v2966_v14 = vadd.f32 %v2965_v26, %v2874_v48 }
 0x36d   :  { %v2880_v13 = vpop.f32.mrf.mxu0 }
 0x36e   :  { %v2881_v51 = vadd.f32 %v2880_v13, %v2787_v29  ;;  %v3149_v55 = vpop.f32.mrf.mxu1 }
 0x36f   :  { %v11196_v44 = vpop.f32.mrf.mxu0 }
 0x370   :  { %v11244_v21 = vpop.f32.mrf.mxu1  ;;  %v2974_v59 = vadd.f32 %v2973_v54, %v2881_v51 }
 0x373   :  { %v3056_v19 = vpop.f32.mrf.mxu0  ;;  %v3155_v31 = vpop.f32.mrf.mxu1 }
 0x374   :  { %v3057_v60 = vadd.f32 %v3056_v19, %v2958_v28 }
 0x375   :  { %v11224_v34 = vpop.f32.mrf.mxu0  ;;  %v11247_v1 = vpop.f32.mrf.mxu1 }
 0x376   :  { %v3144_v3 = vadd.f32 %v3143_v61, %v3057_v60 }
 0x377   :  { %v3062_v56 = vpop.f32.mrf.mxu0 }
 0x378   :  { %v3063_v37 = vadd.f32 %v3062_v56, %v2966_v14  ;;  %v3354_v39 = vpop.f32.mrf.mxu1 }
 0x379   :  { %v11227_v36 = vpop.f32.mrf.mxu0 }
 0x37a   :  { %v11275_v20 = vpop.f32.mrf.mxu1  ;;  %v3150_v24 = vadd.f32 %v3149_v55, %v3063_v37 }
 0x37b   :  { %v3068_v35 = vpop.f32.mrf.mxu0 }
 0x37c   :  { %v3069_v26 = vadd.f32 %v3068_v35, %v2974_v59  ;;  %v3360_v47 = vpop.f32.mrf.mxu1 }
 0x37d   :  { %v11230_v29 = vpop.f32.mrf.mxu0 }
 0x37e   :  { %v11278_v0 = vpop.f32.mrf.mxu1  ;;  %v3156_v6 = vadd.f32 %v3155_v31, %v3069_v26 }
 0x381   :  { %v3243_v62 = vpop.f32.mrf.mxu0  ;;  %v3366_v54 = vpop.f32.mrf.mxu1 }
 0x382   :  { %v3244_v2 = vadd.f32 %v3243_v62, %v3144_v3 }
 0x383   :  { %v11258_v49 = vpop.f32.mrf.mxu0  ;;  %v11281_v28 = vpop.f32.mrf.mxu1 }
 0x384   :  { %v3355_v48 = vadd.f32 %v3354_v39, %v3244_v2 }
 0x385   :  { %v3253_v9 = vpop.f32.mrf.mxu0 }
 0x386   :  { %v3254_v61 = vadd.f32 %v3253_v9, %v3150_v24  ;;  %v3537_v63 = vpop.f32.mrf.mxu1 }
 0x387   :  { %v11261_v14 = vpop.f32.mrf.mxu0 }
 0x388   :  { %v11309_v13 = vpop.f32.mrf.mxu1  ;;  %v3361_v51 = vadd.f32 %v3360_v47, %v3254_v61 }
 0x389   :  { %v3263_v44 = vpop.f32.mrf.mxu0 }
 0x38a   :  { %v3264_v55 = vadd.f32 %v3263_v44, %v3156_v6  ;;  %v3545_v21 = vpop.f32.mrf.mxu1 }
 0x38b   :  { %v11264_v59 = vpop.f32.mrf.mxu0 }
 0x38c   :  { %v11312_v19 = vpop.f32.mrf.mxu1  ;;  %v3367_v60 = vadd.f32 %v3366_v54, %v3264_v55 }
 0x38f   :  { %v3446_v34 = vpop.f32.mrf.mxu0  ;;  %v13691_v31 = vpop.f32.mrf.mxu1 }
 0x390   :  { %v3447_v53 = vadd.f32 %v3446_v34, %v3355_v48 }
 0x391   :  { %v11292_v1 = vpop.f32.mrf.mxu0  ;;  %v11315_v3 = vpop.f32.mrf.mxu1 }
 0x392   :  { %v3538_v52 = vadd.f32 %v3537_v63, %v3447_v53 }
 0x393   :  { %v3453_v56 = vpop.f32.mrf.mxu0 }
 0x394   :  { %v3723_v37 = vpop.f32.mrf.mxu1 }
 0x395   :  { %v11295_v39 = vpop.f32.mrf.mxu0 }
 0x396   :  { %v11343_v36 = vpop.f32.mrf.mxu1 }
 0x397   :  { %v3460_v20 = vpop.f32.mrf.mxu0 }
 0x398   :  { %v13693_v24 = vpop.f32.mrf.mxu1 }
 0x399   :  { %v11298_v35 = vpop.f32.mrf.mxu0 }
 0x39a   :  { %v11346_v26 = vpop.f32.mrf.mxu1 }
 0x39d   :  { %v3636_v47 = vpop.f32.mrf.mxu0  ;;  %v13695_v29 = vpop.f32.mrf.mxu1 }
 0x39e   :  { %v3637_v15 = vadd.f32 %v3636_v47, %v3538_v52 }
 0x39f   :  { %v11326_v0 = vpop.f32.mrf.mxu0  ;;  %v11349_v6 = vpop.f32.mrf.mxu1 }
 0x3a1   :  { %v3642_v62 = vpop.f32.mrf.mxu0 }
 0x3a2   :  { %v3938_v54 = vpop.f32.mrf.mxu1 }
 0x3a3   :  { %v11329_v2 = vpop.f32.mrf.mxu0 }
 0x3a4   :  { %v11377_v49 = vpop.f32.mrf.mxu1 }
 0x3a5   :  { %v3648_v28 = vpop.f32.mrf.mxu0 }
 0x3a6   :  { %v3944_v9 = vpop.f32.mrf.mxu1 }
 0x3a7   :  { %v11332_v61 = vpop.f32.mrf.mxu0 }
 0x3a8   :  { %v11380_v14 = vpop.f32.mrf.mxu1 }
 0x3ab   :  { %v3827_v13 = vpop.f32.mrf.mxu0  ;;  %v3950_v44 = vpop.f32.mrf.mxu1 }
 0x3ac   :  { %v3939_v61 = vadd.f32 %v3938_v54, %v3827_v13  ;;  %v3724_v13 = vadd.f32 %v3723_v37, %v3637_v15 }
 0x3ad   :  { %v11360_v55 = vpop.f32.mrf.mxu0  ;;  %v11383_v59 = vpop.f32.mrf.mxu1 }
 0x3ae   :  { %v3454_v59 = vadd.f32 %v3453_v56, %v3361_v51 }
 0x3af   :  { %v3837_v19 = vpop.f32.mrf.mxu0 }
 0x3b0   :  { %v4121_v1 = vpop.f32.mrf.mxu1  ;;  %v3546_v22 = vadd.f32 %v3545_v21, %v3454_v59 }
 0x3b1   :  { %v11363_v3 = vpop.f32.mrf.mxu0 }
 0x3b2   :  { %v11411_v39 = vpop.f32.mrf.mxu1  ;;  %v3945_v3 = vadd.f32 %v3944_v9, %v3837_v19  ;;  %v3643_v54 = vadd.f32 %v3642_v62, %v3546_v22 }
 0x3b3   :  { %v3847_v36 = vpop.f32.mrf.mxu0 }
 0x3b4   :  { %v4129_v35 = vpop.f32.mrf.mxu1  ;;  %v3951_v10 = vadd.f32 %v3950_v44, %v3847_v36  ;;  %v3730_v21 = vadd.f32 %v13693_v24, %v3643_v54 }
 0x3b5   :  { %v11366_v26 = vpop.f32.mrf.mxu0 }
 0x3b6   :  { %v11414_v0 = vpop.f32.mrf.mxu1 }
 0x3b9   :  { %v4030_v6 = vpop.f32.mrf.mxu0  ;;  %v4137_v7 = vpop.f32.mrf.mxu1 }
 0x3ba   :  { %v4031_v5 = vadd.f32 %v4030_v6, %v3939_v61 }
 0x3bb   :  { %v11394_v2 = vpop.f32.mrf.mxu0  ;;  %v11417_v49 = vpop.f32.mrf.mxu1 }
 0x3bc   :  { %v4122_v4 = vadd.f32 %v4121_v1, %v4031_v5  ;;  %v3461_v49 = vadd.f32 %v3460_v20, %v3367_v60 }
 0x3bd   :  { %v4037_v57 = vpop.f32.mrf.mxu0 }
 0x3be   :  { %v4307_v14 = vpop.f32.mrf.mxu1  ;;  %v4038_v26 = vadd.f32 %v4037_v57, %v3945_v3  ;;  %v3554_v5 = vadd.f32 %v13691_v31, %v3461_v49 }
 0x3bf   :  { %v11397_v32 = vpop.f32.mrf.mxu0 }
 0x3c0   :  { %v11445_v55 = vpop.f32.mrf.mxu1  ;;  %v4130_v53 = vadd.f32 %v4129_v35, %v4038_v26  ;;  %v3649_v60 = vadd.f32 %v3648_v28, %v3554_v5  ;;  %v14785_v35 = vmov 0.0  }
 0x3c1   :  { %v4044_v45 = vpop.f32.mrf.mxu0 }
 0x3c2   :  { %v4313_v39 = vpop.f32.mrf.mxu1  ;;  %v4045_v6 = vadd.f32 %v4044_v45, %v3951_v10  ;;  %v3736_v9 = vadd.f32 %v13695_v29, %v3649_v60 }
 0x3c3   :  { %v11400_v16 = vpop.f32.mrf.mxu0 }
 0x3c4   :  { %v11448_v0 = vpop.f32.mrf.mxu1  ;;  %v10028_v16 = vld [vmem:[%s14761_s10] ss:$0 sm:$0xff]  ;;  %v4138_v15 = vadd.f32 %v4137_v7, %v4045_v6 }
 0x3c5   :  { %v4220_v2 = vpop.f32.mrf.mxu0 }
 0x3c6   :  { %v4221_v48 = vadd.f32 %v4220_v2, %v4122_v4  ;;  %v4319_v34 = vpop.f32.mrf.mxu1 }
 0x3c7   :  { %v11428_v32 = vpop.f32.mrf.mxu0 }
 0x3c8   :  { %v4308_v51 = vadd.f32 %v4307_v14, %v4221_v48  ;;  %v11451_v56 = vpop.f32.mrf.mxu1 }
 0x3c9   :  { %v4226_v52 = vpop.f32.mrf.mxu0 }
 0x3ca   :  { %v4323_v57 = vadd.f32 %v4308_v51, %v3724_v13  ;;  %v4227_v63 = vadd.f32 %v4226_v52, %v4130_v53  ;;  %v4931_v51 = vld [vmem:[%s14760_s9 + $0xa8] sm:$0xff]  ;;  %v4930_v52 = vld [vmem:[%s14760_s9 + $0xa0] sm:$0xff] }
 0x3cb   :  { %v11431_v4 = vpop.f32.mrf.mxu0 }
 0x3cc   :  { %v4331_v22 = vadd.f32 %v10028_v16, %v4323_v57  ;;  %v4314_v20 = vadd.f32 %v4313_v39, %v4227_v63 }
 0x3cd   :  { %v4232_v45 = vpop.f32.mrf.mxu0 }
 0x3ce   :  { %v4334_v10 = vmax.f32 %v4331_v22, 0.0  ;;  %v4324_v37 = vadd.f32 %v4314_v20, %v3730_v21  ;;  %v4233_v47 = vadd.f32 %v4232_v45, %v4138_v15  ;;  %v13832_v21 = vand.u32 4294901760, %v4930_v52 }
 0x3cf   :  { %v11434_v62 = vpop.f32.mrf.mxu0 }
 0x3d0   :  { %v4347_v44 = vsel %vm2578_vm15, %v4334_v10, 0  ;;  %v4332_v19 = vadd.f32 %v10028_v16, %v4324_v37  ;;  %v4320_v31 = vadd.f32 %v4319_v34, %v4233_v47  ;;  %v13841_v20 = vsub.f32 %v4930_v52, %v13832_v21 }
 0x3d1   :  { %v13704_v1 = vand.u32 4294901760, %v4347_v44 }
 0x3d2   :  { %v4335_v36 = vmax.f32 %v4332_v19, 0.0  ;;  %v4325_v24 = vadd.f32 %v4320_v31, %v3736_v9  ;;  %v5090_v10 = vand.u32 4294901760, %v13841_v20 }
 0x3d3   :  { %v4425_v28 = vsub.f32 %v4347_v44, %v13704_v1  ;;  %11478 = vmatmul.mubr.f32.vlgmr.msra.gmra.mxu1 %v13704_v1 }
 0x3d4   :  { %v4333_v7 = vadd.f32 %v10028_v16, %v4325_v24  ;;  %11480 = vmatprep.mubr.msk.f32.mxu1 %vm12234_vm0, %v14785_v35  ;;  %v4350_v61 = vsel %vm2578_vm15, %v4335_v36, 0  ;;  %11504 = vmatpush3.msra.mxu1 %v13634_v40  ;;  %v13818_v16 = vand.u32 4294901760, %v4931_v51  ;;  %v5091_v47 = vsub.f32 %v13841_v20, %v5090_v10 }
 0x3d5   :  { %v4426_v29 = vand.u32 4294901760, %v4425_v28  ;;  %v13712_v14 = vand.u32 4294901760, %v4350_v61  ;;  %11505 = vmatprep.subr.mxu1 %v14785_v35 }
 0x3d6   :  { %v4336_v55 = vmax.f32 %v4333_v7, 0.0  ;;  %11506 = vmatpush3.msra.mxu1 %v13642_v12  ;;  %v13830_v63 = vsub.f32 %v4931_v51, %v13818_v16  ;;  %v5092_v62 = vand.u32 4294901760, %v5091_v47 }
 0x3d7   :  { %v4427_v59 = vsub.f32 %v4425_v28, %v4426_v29  ;;  %v4435_v3 = vsub.f32 %v4350_v61, %v13712_v14  ;;  %11481 = vmatmul.mubr.f32.gmra.mxu1 %v13712_v14  ;;  %11507 = vmatprep.subr.mxu1 %v14785_v35 }
 0x3d8   :  { %11483 = vmatprep.mubr.msk.f32.mxu1 %vm12234_vm0, %v14785_v35  ;;  %v4353_v39 = vsel %vm2578_vm15, %v4336_v55, 0  ;;  %11508 = vmatpush3.msra.mxu1 %v13653_v42  ;;  %v5083_v22 = vand.u32 4294901760, %v13830_v63 }
 0x3d9   :  { %v4428_v26 = vand.u32 4294901760, %v4427_v59  ;;  %v13723_v0 = vand.u32 4294901760, %v4353_v39  ;;  %11509 = vmatprep.subr.mxu1 %v14785_v35  ;;  %v4436_v2 = vand.u32 4294901760, %v4435_v3 }
 0x3da   :  { %11510 = vmatpush3.msra.mxu1 %v13667_v11  ;;  %v5084_v45 = vsub.f32 %v13830_v63, %v5083_v22 }
 0x3db   :  { %11461 = vmatmul.mubr.f32.vlgmr.msra.gmra.mxu0 %v4428_v26  ;;  %v4445_v49 = vsub.f32 %v4353_v39, %v13723_v0  ;;  %11484 = vmatmul.mubr.f32.gmra.mxu1 %v13723_v0  ;;  %v4437_v48 = vsub.f32 %v4435_v3, %v4436_v2 }
 0x3dc   :  { %11463 = vmatprep.mubr.msk.f32.mxu0 %vm12234_vm0, %v14785_v35  ;;  %11511 = vmatprep.mubr.msk.f32.mxu1 %vm12234_vm0, %v14785_v35  ;;  %v5085_v37 = vand.u32 4294901760, %v5084_v45 }
 0x3dd   :  { %v4438_v34 = vand.u32 4294901760, %v4437_v48  ;;  %11487 = vmatpush3.msra.mxu0 %v13640_v41  ;;  %v4446_v54 = vand.u32 4294901760, %v4445_v49  ;;  %11537 = vmatprep.subr.mxu1 %v14785_v35 }
 0x3de   :  { %11488 = vmatprep.subr.mxu0 %v14785_v35 }
 0x3df   :  { %11464 = vmatmul.mubr.f32.gmra.mxu0 %v4438_v34  ;;  %11512 = vmatmul.mubr.f32.vlgmr.msra.gmra.mxu1 %v4426_v29  ;;  %v4447_v32 = vsub.f32 %v4445_v49, %v4446_v54 }
 0x3e0   :  { %11466 = vmatprep.mubr.msk.f32.mxu0 %vm12234_vm0, %v14785_v35  ;;  %11489 = vmatpush3.msra.mxu0 %v13651_v33 }
 0x3e1   :  { %11514 = vmatprep.mubr.msk.f32.mxu1 %vm12234_vm0, %v14785_v35  ;;  %v4448_v13 = vand.u32 4294901760, %v4447_v32  ;;  %11490 = vmatprep.subr.mxu0 %v14785_v35 }
 0x3e2   :  { %11491 = vmatpush3.msra.mxu0 %v13665_v43  ;;  %11538 = vmatpush3.msra.mxu1 %v13634_v40  ;;  %v14786_v40 = vand.u32 4294901760, %v13640_v41  ;;  %v14789_v41 = vand.u32 4294901760, %v13676_v30 }
 0x3e3   :  { %11467 = vmatmul.mubr.f32.gmra.mxu0 %v4448_v13  ;;  %11515 = vmatmul.mubr.f32.gmra.mxu1 %v4436_v2 }
 0x3e4   :  { %11492 = vmatprep.subr.mxu0 %v14785_v35  ;;  %11539 = vmatprep.subr.mxu1 %v14785_v35 }
 0x3e5   :  { %11493 = vmatpush3.msra.mxu0 %v13676_v30  ;;  %11494 = vmatprep.mubr.msk.f32.mxu0 %vm12234_vm0, %v14785_v35 }
 0x3e6   :  { %11517 = vmatprep.mubr.msk.f32.mxu1 %vm12234_vm0, %v14785_v35  ;;  %11540 = vmatpush3.msra.mxu1 %v13642_v12  ;;  %v14787_v12 = vand.u32 4294901760, %v13651_v33  ;;  %v4933_v33 = vld [vmem:[%s14760_s9 + $0xb8] sm:$0xff] }
 0x3e7   :  { %11495 = vmatmul.mubr.f32.vlgmr.msra.gmra.mxu0 %v4425_v28  ;;  %11518 = vmatmul.mubr.f32.gmra.mxu1 %v4446_v54 }
 0x3e8   :  { %11541 = vmatprep.subr.mxu1 %v14785_v35  ;;  %11497 = vmatprep.mubr.msk.f32.mxu0 %vm12234_vm0, %v14785_v35 }
 0x3e9   :  { %11542 = vmatpush3.msra.mxu1 %v13653_v42  ;;  %11545 = vmatprep.mubr.msk.f32.mxu1 %vm12234_vm0, %v14785_v35  ;;  %v14788_v42 = vand.u32 4294901760, %v13665_v43  ;;  %v13799_v43 = vand.u32 4294901760, %v4933_v33 }
 0x3ea   :  { %11543 = vmatprep.subr.mxu1 %v14785_v35  ;;  %11520 = vmatprep.subr.mxu0 %v14785_v35 }
 0x3eb   :  { %11544 = vmatpush3.msra.mxu1 %v13667_v11  ;;  %11498 = vmatmul.mubr.f32.gmra.mxu0 %v4435_v3  ;;  %v4932_v11 = vld [vmem:[%s14760_s9 + $0xb0] sm:$0xff]  ;;  %v13805_v30 = vsub.f32 %v4933_v33, %v13799_v43  ;;  %v10029_v3 = vld [vmem:[%s14761_s10 + $0x1] ss:$0 sm:$0xff] }
 0x3ec   :  { %11546 = vmatmul.mubr.f32.vlgmr.msra.gmra.mxu1 %v13704_v1  ;;  %11521 = vmatpush3.msra.mxu0 %v14786_v40  ;;  %v13807_v6 = vand.u32 4294901760, %v4932_v11 }
 0x3ed   :  { %11522 = vmatprep.subr.mxu0 %v14785_v35  ;;  %11500 = vmatprep.mubr.msk.f32.mxu0 %vm12234_vm0, %v14785_v35  ;;  %v5069_v56 = vand.u32 4294901760, %v13805_v30 }
 0x3ee   :  { %11523 = vmatpush3.msra.mxu0 %v14787_v12  ;;  %11548 = vmatprep.mubr.msk.f32.mxu1 %vm12234_vm0, %v14785_v35  ;;  %v13816_v53 = vsub.f32 %v4932_v11, %v13807_v6 }
 0x3ef   :  { %11501 = vmatmul.mubr.f32.gmra.mxu0 %v4445_v49  ;;  %11524 = vmatprep.subr.mxu0 %v14785_v35  ;;  %v5070_v5 = vsub.f32 %v13805_v30, %v5069_v56 }
 0x3f0   :  { %11549 = vmatmul.mubr.f32.gmra.mxu1 %v13712_v14  ;;  %11525 = vmatpush3.msra.mxu0 %v14788_v42  ;;  %v5076_v57 = vand.u32 4294901760, %v13816_v53 }
 0x3f1   :  { %11526 = vmatprep.subr.mxu0 %v14785_v35  ;;  %11528 = vmatprep.mubr.msk.f32.mxu0 %vm12234_vm0, %v14785_v35  ;;  %v5071_v4 = vand.u32 4294901760, %v5070_v5 }
 0x3f2   :  { %11527 = vmatpush3.msra.mxu0 %v14789_v41  ;;  %11551 = vmatprep.mubr.msk.f32.mxu1 %vm12234_vm0, %v14785_v35  ;;  %v5077_v60 = vsub.f32 %v13816_v53, %v5076_v57 }
 0x3f3   :  { %11529 = vmatmul.mubr.f32.vlgmr.msra.gmra.mxu0 %v13704_v1  ;;  %11571 = vmatprep.subr.mxu1 %v14785_v35 }
 0x3f4   :  { %11552 = vmatmul.mubr.f32.gmra.mxu1 %v13723_v0  ;;  %11531 = vmatprep.mubr.msk.f32.mxu0 %vm12234_vm0, %v14785_v35  ;;  %v5078_v15 = vand.u32 4294901760, %v5077_v60 }
 0x3f5   :  { %11579 = vmatprep.mubr.msk.f32.mxu1 %vm12234_vm0, %v14785_v35  ;;  %11554 = vmatprep.subr.mxu0 %v14785_v35 }
 0x3f6   :  { %11555 = vmatpush3.msra.mxu0 %v13799_v43  ;;  %11572 = vmatpush3.msra.mxu1 %v5071_v4 }
 0x3f7   :  { %11532 = vmatmul.mubr.f32.gmra.mxu0 %v13712_v14  ;;  %11556 = vmatprep.subr.mxu0 %v14785_v35 }
 0x3f8   :  { %11534 = vmatprep.mubr.msk.f32.mxu0 %vm12234_vm0, %v14785_v35  ;;  %11557 = vmatpush3.msra.mxu0 %v13807_v6 }
 0x3f9   :  { %11558 = vmatprep.subr.mxu0 %v14785_v35  ;;  %11573 = vmatprep.subr.mxu1 %v14785_v35 }
 0x3fa   :  { %11559 = vmatpush3.msra.mxu0 %v13818_v16  ;;  %11574 = vmatpush3.msra.mxu1 %v5078_v15 }
 0x3fb   :  { %11535 = vmatmul.mubr.f32.gmra.mxu0 %v13723_v0  ;;  %11560 = vmatprep.subr.mxu0 %v14785_v35 }
 0x3fc   :  { %11562 = vmatprep.mubr.msk.f32.mxu0 %vm12234_vm0, %v14785_v35  ;;  %11561 = vmatpush3.msra.mxu0 %v13832_v21 }
 0x3fd   :  { %11588 = vmatprep.subr.mxu0 %v14785_v35  ;;  %11575 = vmatprep.subr.mxu1 %v14785_v35 }
 0x3fe   :  { %11576 = vmatpush3.msra.mxu1 %v5085_v37 }
 0x3ff   :  { %11577 = vmatprep.subr.mxu1 %v14785_v35 }
 0x400   :  { %11578 = vmatpush3.msra.mxu1 %v5092_v62 }
 0x401   :  { %11605 = vmatprep.subr.mxu1 %v14785_v35 }
 0x493   :  { %v4541_v9 = vpop.f32.mrf.mxu1 }
 0x495   :  { %v11479_v44 = vpop.f32.mrf.mxu1 }
 0x497   :  { %v4547_v19 = vpop.f32.mrf.mxu1 }
 0x499   :  { %v11482_v31 = vpop.f32.mrf.mxu1 }
 0x49b   :  { %v4430_v1 = vpop.f32.mrf.mxu0  ;;  %v4553_v36 = vpop.f32.mrf.mxu1 }
 0x49c   :  { %v4431_v49 = vadd.f32 %v10029_v3, %v4430_v1 }
 0x49d   :  { %v11462_v24 = vpop.f32.mrf.mxu0  ;;  %v11485_v28 = vpop.f32.mrf.mxu1 }
 0x49e   :  { %v4542_v13 = vadd.f32 %v4541_v9, %v4431_v49 }
 0x49f   :  { %v4440_v7 = vpop.f32.mrf.mxu0  ;;  %v4724_v61 = vpop.f32.mrf.mxu1 }
 0x4a0   :  { %v4441_v32 = vadd.f32 %v10029_v3, %v4440_v7 }
 0x4a1   :  { %v11465_v29 = vpop.f32.mrf.mxu0  ;;  %v11513_v14 = vpop.f32.mrf.mxu1 }
 0x4a2   :  { %v4548_v51 = vadd.f32 %v4547_v19, %v4441_v32 }
 0x4a3   :  { %v4450_v55 = vpop.f32.mrf.mxu0  ;;  %v4732_v59 = vpop.f32.mrf.mxu1 }
 0x4a4   :  { %v4451_v11 = vadd.f32 %v10029_v3, %v4450_v55 }
 0x4a5   :  { %v11468_v39 = vpop.f32.mrf.mxu0  ;;  %v11516_v26 = vpop.f32.mrf.mxu1 }
 0x4a6   :  { %v4554_v37 = vadd.f32 %v4553_v36, %v4451_v11 }
 0x4a7   :  { %v4633_v0 = vpop.f32.mrf.mxu0  ;;  %v4740_v2 = vpop.f32.mrf.mxu1 }
 0x4a8   :  { %v4634_v42 = vadd.f32 %v4633_v0, %v4542_v13 }
 0x4a9   :  { %v11496_v48 = vpop.f32.mrf.mxu0  ;;  %v11519_v34 = vpop.f32.mrf.mxu1 }
 0x4aa   :  { %v4725_v15 = vadd.f32 %v4724_v61, %v4634_v42 }
 0x4ab   :  { %v4640_v54 = vpop.f32.mrf.mxu0 }
 0x4ac   :  { %v4910_v40 = vpop.f32.mrf.mxu1  ;;  %v4641_v4 = vadd.f32 %v4640_v54, %v4548_v51 }
 0x4ad   :  { %v11499_v12 = vpop.f32.mrf.mxu0 }
 0x4ae   :  { %v11547_v41 = vpop.f32.mrf.mxu1  ;;  %v4733_v24 = vadd.f32 %v4732_v59, %v4641_v4  ;;  %v4929_v12 = vld [vmem:[%s14760_s9 + $0x98] sm:$0xff] }
 0x4af   :  { %v4647_v33 = vpop.f32.mrf.mxu0  ;;  %v13916_v51 = vand.u32 4294901760, %v4929_v12 }
 0x4b0   :  { %v4916_v52 = vpop.f32.mrf.mxu1  ;;  %v4648_v31 = vadd.f32 %v4647_v33, %v4554_v37  ;;  %v4926_v37 = vld [vmem:[%s14760_s9 + $0x80] sm:$0xff] }
 0x4b1   :  { %v11502_v5 = vpop.f32.mrf.mxu0 }
 0x4b2   :  { %v11550_v60 = vpop.f32.mrf.mxu1  ;;  %v4741_v14 = vadd.f32 %v4740_v2, %v4648_v31 }
 0x4b3   :  { %v4823_v45 = vpop.f32.mrf.mxu0  ;;  %v4927_v60 = vld [vmem:[%s14760_s9 + $0x88] sm:$0xff] }
 0x4b4   :  { %v4824_v47 = vadd.f32 %v4823_v45, %v4725_v15  ;;  %v4922_v62 = vpop.f32.mrf.mxu1  ;;  %v13935_v45 = vsub.f32 %v4929_v12, %v13916_v51 }
 0x4b5   :  { %v11530_v44 = vpop.f32.mrf.mxu0 }
 0x4b6   :  { %v4911_v1 = vadd.f32 %v4910_v40, %v4824_v47  ;;  %v11553_v9 = vpop.f32.mrf.mxu1  ;;  %v13942_v47 = vand.u32 4294901760, %v4927_v60  ;;  %v13953_v44 = vand.u32 4294901760, %v4926_v37 }
 0x4b7   :  { %v4829_v28 = vpop.f32.mrf.mxu0 }
 0x4b8   :  { %v4935_v7 = vsel %vm2578_vm15, %v4911_v1, 0  ;;  %9977 = vst.msk [vmem:[%s14762_s11 + $0x10] sm:$0xff] %vm2578_vm15, %v4911_v1  ;;  %v4830_v19 = vadd.f32 %v4829_v28, %v4733_v24  ;;  %v13960_v31 = vsub.f32 %v4927_v60, %v13942_v47  ;;  %v13973_v9 = vsub.f32 %v4926_v37, %v13953_v44 }
 0x4b9   :  { %v13864_v29 = vand.u32 4294901760, %v4935_v7  ;;  %v11533_v61 = vpop.f32.mrf.mxu0 }
 0x4ba   :  { %v4917_v36 = vadd.f32 %v4916_v52, %v4830_v19  ;;  %v4928_v52 = vld [vmem:[%s14760_s9 + $0x90] sm:$0xff] }
 0x4bb   :  { %v13867_v55 = vsub.f32 %v4935_v7, %v13864_v29  ;;  %v4835_v3 = vpop.f32.mrf.mxu0  ;;  %11580 = vmatmul.mubr.f32.vlgmr.msra.gmra.mxu1 %v13864_v29  ;;  %v13926_v4 = vand.u32 4294901760, %v4928_v52 }
 0x4bc   :  { %v4938_v59 = vsel %vm2578_vm15, %v4917_v36, 0  ;;  %9978 = vst.msk [vmem:[%s14762_s11 + $0x18] sm:$0xff] %vm2578_vm15, %v4917_v36  ;;  %v4836_v39 = vadd.f32 %v4835_v3, %v4741_v14  ;;  %11582 = vmatprep.mubr.msk.f32.mxu1 %vm12234_vm0, %v14785_v35  ;;  %11606 = vmatpush3.msra.mxu1 %v13799_v43 }
 0x4bd   :  { %v5014_v26 = vand.u32 4294901760, %v13867_v55  ;;  %v13879_v0 = vand.u32 4294901760, %v4938_v59  ;;  %v11536_v2 = vpop.f32.mrf.mxu0  ;;  %11607 = vmatprep.subr.mxu1 %v14785_v35 }
 0x4be   :  { %v4923_v49 = vadd.f32 %v4922_v62, %v4836_v39  ;;  %11608 = vmatpush3.msra.mxu1 %v13807_v6  ;;  %v13947_v62 = vsub.f32 %v4928_v52, %v13926_v4 }
 0x4bf   :  { %v5015_v48 = vsub.f32 %v13867_v55, %v5014_v26  ;;  %v13885_v34 = vsub.f32 %v4938_v59, %v13879_v0  ;;  %11583 = vmatmul.mubr.f32.gmra.mxu1 %v13879_v0  ;;  %11609 = vmatprep.subr.mxu1 %v14785_v35 }
 0x4c0   :  { %v4941_v54 = vsel %vm2578_vm15, %v4923_v49, 0  ;;  %9980 = vst.msk [vmem:[%s14762_s11 + $0x20] sm:$0x3] %vm9979_vm5, %v4923_v49  ;;  %11585 = vmatprep.mubr.msk.f32.mxu1 %vm12234_vm0, %v14785_v35  ;;  %11610 = vmatpush3.msra.mxu1 %v13818_v16  ;;  %v5647_v1 = vand.u32 4294901760, %v13947_v62 }
 0x4c1   :  { %v5016_v32 = vand.u32 4294901760, %v5015_v48  ;;  %v13896_v13 = vand.u32 4294901760, %v4941_v54  ;;  %11611 = vmatprep.subr.mxu1 %v14785_v35  ;;  %v5024_v40 = vand.u32 4294901760, %v13885_v34 }
 0x4c2   :  { %11612 = vmatpush3.msra.mxu1 %v13832_v21  ;;  %v5648_v24 = vsub.f32 %v13947_v62, %v5647_v1 }
 0x4c3   :  { %v13905_v42 = vsub.f32 %v4941_v54, %v13896_v13  ;;  %11563 = vmatmul.mubr.f32.vlgmr.msra.gmra.mxu0 %v5016_v32  ;;  %11586 = vmatmul.mubr.f32.gmra.mxu1 %v13896_v13  ;;  %v5025_v41 = vsub.f32 %v13885_v34, %v5024_v40 }
 0x4c4   :  { %11565 = vmatprep.mubr.msk.f32.mxu0 %vm12234_vm0, %v14785_v35  ;;  %11613 = vmatprep.mubr.msk.f32.mxu1 %vm12234_vm0, %v14785_v35 }
 0x4c5   :  { %v5026_v33 = vand.u32 4294901760, %v5025_v41  ;;  %11589 = vmatpush3.msra.mxu0 %v13805_v30  ;;  %v5034_v11 = vand.u32 4294901760, %v13905_v42  ;;  %11639 = vmatprep.subr.mxu1 %v14785_v35 }
 0x4c6   :  { %11590 = vmatprep.subr.mxu0 %v14785_v35 }
 0x4c7   :  { %11566 = vmatmul.mubr.f32.gmra.mxu0 %v5026_v33  ;;  %11614 = vmatmul.mubr.f32.vlgmr.msra.gmra.mxu1 %v5014_v26  ;;  %v5035_v5 = vsub.f32 %v13905_v42, %v5034_v11 }
 0x4c8   :  { %11568 = vmatprep.mubr.msk.f32.mxu0 %vm12234_vm0, %v14785_v35  ;;  %11591 = vmatpush3.msra.mxu0 %v13816_v53 }
 0x4c9   :  { %11616 = vmatprep.mubr.msk.f32.mxu1 %vm12234_vm0, %v14785_v35  ;;  %v5036_v15 = vand.u32 4294901760, %v5035_v5  ;;  %11592 = vmatprep.subr.mxu0 %v14785_v35 }
 0x4ca   :  { %11593 = vmatpush3.msra.mxu0 %v13830_v63  ;;  %11640 = vmatpush3.msra.mxu1 %v13799_v43  ;;  %v5640_v43 = vand.u32 4294901760, %v13935_v45 }
 0x4cb   :  { %11569 = vmatmul.mubr.f32.gmra.mxu0 %v5036_v15  ;;  %11617 = vmatmul.mubr.f32.gmra.mxu1 %v5024_v40 }
 0x4cc   :  { %11594 = vmatprep.subr.mxu0 %v14785_v35  ;;  %11641 = vmatprep.subr.mxu1 %v14785_v35 }
 0x4cd   :  { %11595 = vmatpush3.msra.mxu0 %v13841_v20  ;;  %11596 = vmatprep.mubr.msk.f32.mxu0 %vm12234_vm0, %v14785_v35  ;;  %v6096_v20 = vld [vmem:[%s14760_s9 + $0xc0] sm:$0xff] }
 0x4ce   :  { %11619 = vmatprep.mubr.msk.f32.mxu1 %vm12234_vm0, %v14785_v35  ;;  %11642 = vmatpush3.msra.mxu1 %v13807_v6  ;;  %v5641_v6 = vsub.f32 %v13935_v45, %v5640_v43 }
 0x4cf   :  { %11597 = vmatmul.mubr.f32.vlgmr.msra.gmra.mxu0 %v13867_v55  ;;  %11620 = vmatmul.mubr.f32.gmra.mxu1 %v5034_v11 }
 0x4d0   :  { %11643 = vmatprep.subr.mxu1 %v14785_v35  ;;  %11599 = vmatprep.mubr.msk.f32.mxu0 %vm12234_vm0, %v14785_v35  ;;  %v5642_v28 = vand.u32 4294901760, %v5641_v6 }
 0x4d1   :  { %11644 = vmatpush3.msra.mxu1 %v13818_v16  ;;  %11647 = vmatprep.mubr.msk.f32.mxu1 %vm12234_vm0, %v14785_v35  ;;  %v5654_v16 = vand.u32 4294901760, %v13960_v31 }
 0x4d2   :  { %11645 = vmatprep.subr.mxu1 %v14785_v35  ;;  %11622 = vmatprep.subr.mxu0 %v14785_v35 }
 0x4d3   :  { %11646 = vmatpush3.msra.mxu1 %v13832_v21  ;;  %11600 = vmatmul.mubr.f32.gmra.mxu0 %v13885_v34  ;;  %v5661_v21 = vand.u32 4294901760, %v13973_v9  ;;  %v5655_v30 = vsub.f32 %v13960_v31, %v5654_v16 }
 0x4d4   :  { %11648 = vmatmul.mubr.f32.vlgmr.msra.gmra.mxu1 %v13864_v29  ;;  %11623 = vmatpush3.msra.mxu0 %v5069_v56  ;;  %v5649_v56 = vand.u32 4294901760, %v5648_v24 }
 0x4d5   :  { %11624 = vmatprep.subr.mxu0 %v14785_v35  ;;  %11602 = vmatprep.mubr.msk.f32.mxu0 %vm12234_vm0, %v14785_v35  ;;  %v5662_v53 = vsub.f32 %v13973_v9, %v5661_v21 }
 0x4d6   :  { %11625 = vmatpush3.msra.mxu0 %v5076_v57  ;;  %11650 = vmatprep.mubr.msk.f32.mxu1 %vm12234_vm0, %v14785_v35  ;;  %v5656_v57 = vand.u32 4294901760, %v5655_v30 }
 0x4d7   :  { %11603 = vmatmul.mubr.f32.gmra.mxu0 %v13905_v42  ;;  %11626 = vmatprep.subr.mxu0 %v14785_v35  ;;  %v5663_v63 = vand.u32 4294901760, %v5662_v53 }
 0x4d8   :  { %11651 = vmatmul.mubr.f32.gmra.mxu1 %v13879_v0  ;;  %11673 = vmatprep.subr.mxu1 %v14785_v35 }
 0x4d9   :  { %11627 = vmatpush3.msra.mxu0 %v5083_v22  ;;  %11674 = vmatpush3.msra.mxu1 %v5642_v28 }
 0x4da   :  { %11628 = vmatprep.subr.mxu0 %v14785_v35  ;;  %11675 = vmatprep.subr.mxu1 %v14785_v35 }
 0x4db   :  { %11629 = vmatpush3.msra.mxu0 %v5090_v10  ;;  %11630 = vmatprep.mubr.msk.f32.mxu0 %vm12234_vm0, %v14785_v35 }
 0x4dc   :  { %11653 = vmatprep.mubr.msk.f32.mxu1 %vm12234_vm0, %v14785_v35  ;;  %11676 = vmatpush3.msra.mxu1 %v5649_v56 }
 0x4dd   :  { %11631 = vmatmul.mubr.f32.vlgmr.msra.gmra.mxu0 %v13864_v29  ;;  %11654 = vmatmul.mubr.f32.gmra.mxu1 %v13896_v13  ;;  %v14164_v29 = vand.u32 4294901760, %v6096_v20 }
 0x4de   :  { %11677 = vmatprep.subr.mxu1 %v14785_v35  ;;  %11633 = vmatprep.mubr.msk.f32.mxu0 %vm12234_vm0, %v14785_v35 }
 0x4df   :  { %11678 = vmatpush3.msra.mxu1 %v5656_v57  ;;  %11681 = vmatprep.mubr.msk.f32.mxu1 %vm12234_vm0, %v14785_v35  ;;  %v14173_v55 = vsub.f32 %v6096_v20, %v14164_v29 }
 0x4e0   :  { %11679 = vmatprep.subr.mxu1 %v14785_v35  ;;  %11656 = vmatprep.subr.mxu0 %v14785_v35 }
 0x4e1   :  { %11680 = vmatpush3.msra.mxu1 %v5663_v63  ;;  %11634 = vmatmul.mubr.f32.gmra.mxu0 %v13879_v0  ;;  %v6261_v39 = vand.u32 4294901760, %v14173_v55 }
 0x4e2   :  { %11682 = vmatmul.mubr.f32.vlgmr.msra.gmra.mxu1 %v13293_v50  ;;  %11657 = vmatpush3.msra.mxu0 %v13916_v51 }
 0x4e3   :  { %11658 = vmatprep.subr.mxu0 %v14785_v35  ;;  %11636 = vmatprep.mubr.msk.f32.mxu0 %vm12234_vm0, %v14785_v35  ;;  %v6262_v0 = vsub.f32 %v14173_v55, %v6261_v39 }
 0x4e4   :  { %11659 = vmatpush3.msra.mxu0 %v13926_v4  ;;  %11684 = vmatprep.mubr.msk.f32.mxu1 %vm12234_vm0, %v14785_v35 }
 0x4e5   :  { %11637 = vmatmul.mubr.f32.gmra.mxu0 %v13896_v13  ;;  %11660 = vmatprep.subr.mxu0 %v14785_v35  ;;  %v6263_v2 = vand.u32 4294901760, %v6262_v0 }
 0x4e6   :  { %11685 = vmatmul.mubr.f32.gmra.mxu1 %v13313_v17  ;;  %11707 = vmatprep.subr.mxu1 %v14785_v35 }
 0x4e7   :  { %11661 = vmatpush3.msra.mxu0 %v13942_v47  ;;  %11708 = vmatpush3.msra.mxu1 %v13916_v51 }
 0x4e8   :  { %11662 = vmatprep.subr.mxu0 %v14785_v35  ;;  %11709 = vmatprep.subr.mxu1 %v14785_v35 }
 0x4e9   :  { %11663 = vmatpush3.msra.mxu0 %v13953_v44  ;;  %11664 = vmatprep.mubr.msk.f32.mxu0 %vm12234_vm0, %v14785_v35 }
 0x4ea   :  { %11687 = vmatprep.mubr.msk.f32.mxu1 %vm12234_vm0, %v14785_v35  ;;  %11710 = vmatpush3.msra.mxu1 %v13926_v4 }
 0x4eb   :  { %11665 = vmatmul.mubr.f32.vlgmr.msra.gmra.mxu0 %v13362_v8  ;;  %11688 = vmatmul.mubr.f32.gmra.mxu1 %v13332_v58  ;;  %v6098_v8 = vld [vmem:[%s14760_s9 + $0xd0] sm:$0xff] }
 0x4ec   :  { %11711 = vmatprep.subr.mxu1 %v14785_v35  ;;  %11667 = vmatprep.mubr.msk.f32.mxu0 %vm12234_vm0, %v14785_v35 }
 0x4ed   :  { %11712 = vmatpush3.msra.mxu1 %v13942_v47  ;;  %11715 = vmatprep.mubr.msk.f32.mxu1 %vm12234_vm0, %v14785_v35 }
 0x4ee   :  { %11713 = vmatprep.subr.mxu1 %v14785_v35  ;;  %11690 = vmatprep.subr.mxu0 %v14785_v35 }
 0x4ef   :  { %11714 = vmatpush3.msra.mxu1 %v13953_v44  ;;  %11668 = vmatmul.mubr.f32.gmra.mxu0 %v13383_v27 }
 0x4f0   :  { %11716 = vmatmul.mubr.f32.vlgmr.msra.gmra.mxu1 %v13327_v46  ;;  %11691 = vmatpush3.msra.mxu0 %v13935_v45  ;;  %v14790_v46 = vld [vmem:[#allocation7_spill] sm:$0xff] }
 0x4f1   :  { %11692 = vmatprep.subr.mxu0 %v14785_v35  ;;  %11670 = vmatprep.mubr.msk.f32.mxu0 %vm12234_vm0, %v14785_v35 }
 0x4f2   :  { %11693 = vmatpush3.msra.mxu0 %v13947_v62  ;;  %11718 = vmatprep.mubr.msk.f32.mxu1 %vm12234_vm0, %v14785_v35 }
 0x4f3   :  { %11671 = vmatmul.mubr.f32.gmra.mxu0 %v13401_v18  ;;  %11694 = vmatprep.subr.mxu0 %v14785_v35 }
 0x4f4   :  { %11719 = vmatmul.mubr.f32.gmra.mxu1 %v13351_v23  ;;  %11741 = vmatprep.subr.mxu1 %v14785_v35 }
 0x4f5   :  { %11695 = vmatpush3.msra.mxu0 %v13960_v31  ;;  %11742 = vmatpush3.msra.mxu1 %v13916_v51 }
 0x4f6   :  { %11696 = vmatprep.subr.mxu0 %v14785_v35  ;;  %11743 = vmatprep.subr.mxu1 %v14785_v35 }
 0x4f7   :  { %11697 = vmatpush3.msra.mxu0 %v13973_v9  ;;  %11698 = vmatprep.mubr.msk.f32.mxu0 %vm12234_vm0, %v14785_v35 }
 0x4f8   :  { %11721 = vmatprep.mubr.msk.f32.mxu1 %vm12234_vm0, %v14785_v35  ;;  %11744 = vmatpush3.msra.mxu1 %v13926_v4 }
 0x4f9   :  { %11699 = vmatmul.mubr.f32.vlgmr.msra.gmra.mxu0 %v13311_v38  ;;  %11722 = vmatmul.mubr.f32.gmra.mxu1 %v13367_v25  ;;  %v14791_v38 = vld [vmem:[#allocation8_spill] sm:$0xff]  ;;  %v14139_v25 = vand.u32 4294901760, %v6098_v8 }
 0x4fa   :  { %11745 = vmatprep.subr.mxu1 %v14785_v35  ;;  %11701 = vmatprep.mubr.msk.f32.mxu0 %vm12234_vm0, %v14785_v35 }
 0x4fb   :  { %11746 = vmatpush3.msra.mxu1 %v13942_v47  ;;  %11749 = vmatprep.mubr.msk.f32.mxu1 %vm12234_vm0, %v14785_v35  ;;  %v14148_v18 = vsub.f32 %v6098_v8, %v14139_v25 }
 0x4fc   :  { %11747 = vmatprep.subr.mxu1 %v14785_v35  ;;  %11724 = vmatprep.subr.mxu0 %v14785_v35 }
 0x4fd   :  { %11748 = vmatpush3.msra.mxu1 %v13953_v44  ;;  %11702 = vmatmul.mubr.f32.gmra.mxu0 %v14790_v46  ;;  %v6247_v7 = vand.u32 4294901760, %v14148_v18 }
 0x4fe   :  { %11750 = vmatmul.mubr.f32.vlgmr.msra.gmra.mxu1 %v13293_v50  ;;  %11725 = vmatpush3.msra.mxu0 %v5640_v43 }
 0x4ff   :  { %11726 = vmatprep.subr.mxu0 %v14785_v35  ;;  %11704 = vmatprep.mubr.msk.f32.mxu0 %vm12234_vm0, %v14785_v35  ;;  %v6248_v36 = vsub.f32 %v14148_v18, %v6247_v7 }
 0x500   :  { %11727 = vmatpush3.msra.mxu0 %v5647_v1  ;;  %11752 = vmatprep.mubr.msk.f32.mxu1 %vm12234_vm0, %v14785_v35 }
 0x501   :  { %11705 = vmatmul.mubr.f32.gmra.mxu0 %v14791_v38  ;;  %11728 = vmatprep.subr.mxu0 %v14785_v35  ;;  %v6249_v3 = vand.u32 4294901760, %v6248_v36 }
 0x502   :  { %11753 = vmatmul.mubr.f32.gmra.mxu1 %v13313_v17  ;;  %11729 = vmatpush3.msra.mxu0 %v5654_v16 }
 0x503   :  { %11730 = vmatprep.subr.mxu0 %v14785_v35  ;;  %11732 = vmatprep.mubr.msk.f32.mxu0 %vm12234_vm0, %v14785_v35 }
 0x504   :  { %11731 = vmatpush3.msra.mxu0 %v5661_v21  ;;  %11755 = vmatprep.mubr.msk.f32.mxu1 %vm12234_vm0, %v14785_v35 }
 0x505   :  { %11733 = vmatmul.mubr.f32.vlgmr.msra.gmra.mxu0 %v13293_v50  ;;  %11775 = vmatprep.subr.mxu1 %v14785_v35  ;;  %v6099_v50 = vld [vmem:[%s14760_s9 + $0xd8] sm:$0xff] }
 0x506   :  { %11756 = vmatmul.mubr.f32.gmra.mxu1 %v13332_v58  ;;  %11735 = vmatprep.mubr.msk.f32.mxu0 %vm12234_vm0, %v14785_v35  ;;  %v14131_v23 = vand.u32 4294901760, %v6099_v50 }
 0x507   :  { %11783 = vmatprep.mubr.msk.f32.mxu1 %vm12234_vm0, %v14785_v35  ;;  %11758 = vmatprep.subr.mxu0 %v14785_v35 }
 0x508   :  { %11759 = vmatpush3.msra.mxu0 %v14131_v23 }
 0x509   :  { %11736 = vmatmul.mubr.f32.gmra.mxu0 %v13313_v17  ;;  %v14137_v17 = vsub.f32 %v6099_v50, %v14131_v23  ;;  %11760 = vmatprep.subr.mxu0 %v14785_v35 }
 0x50a   :  { %11738 = vmatprep.mubr.msk.f32.mxu0 %vm12234_vm0, %v14785_v35  ;;  %11761 = vmatpush3.msra.mxu0 %v14139_v25 }
 0x50b   :  { %v6240_v27 = vand.u32 4294901760, %v14137_v17  ;;  %11762 = vmatprep.subr.mxu0 %v14785_v35 }
 0x50d   :  { %11739 = vmatmul.mubr.f32.gmra.mxu0 %v13332_v58  ;;  %v6097_v58 = vld [vmem:[%s14760_s9 + $0xc8] sm:$0xff]  ;;  %v6241_v10 = vsub.f32 %v14137_v17, %v6240_v27 }
 0x50e   :  { %11766 = vmatprep.mubr.msk.f32.mxu0 %vm12234_vm0, %v14785_v35  ;;  %v14150_v22 = vand.u32 4294901760, %v6097_v58 }
 0x50f   :  { %v6242_v61 = vand.u32 4294901760, %v6241_v10 }
 0x510   :  { %v14162_v19 = vsub.f32 %v6097_v58, %v14150_v22  ;;  %11763 = vmatpush3.msra.mxu0 %v14150_v22 }
 0x511   :  { %11764 = vmatprep.subr.mxu0 %v14785_v35  ;;  %11776 = vmatpush3.msra.mxu1 %v6242_v61 }
 0x512   :  { %v6254_v14 = vand.u32 4294901760, %v14162_v19  ;;  %11765 = vmatpush3.msra.mxu0 %v14164_v29  ;;  %11777 = vmatprep.subr.mxu1 %v14785_v35 }
 0x513   :  { %11792 = vmatprep.subr.mxu0 %v14785_v35  ;;  %11778 = vmatpush3.msra.mxu1 %v6249_v3 }
 0x514   :  { %v6255_v59 = vsub.f32 %v14162_v19, %v6254_v14  ;;  %11779 = vmatprep.subr.mxu1 %v14785_v35 }
 0x516   :  { %v6256_v26 = vand.u32 4294901760, %v6255_v59 }
 0x518   :  { %11780 = vmatpush3.msra.mxu1 %v6256_v26 }
 0x519   :  { %11781 = vmatprep.subr.mxu1 %v14785_v35 }
 0x51a   :  { %11782 = vmatpush3.msra.mxu1 %v6263_v2 }
 0x51b   :  { %11809 = vmatprep.subr.mxu1 %v14785_v35 }
 0x57b   :  { %v5129_v49 = vpop.f32.mrf.mxu1 }
 0x57d   :  { %v11581_v48 = vpop.f32.mrf.mxu1 }
 0x57f   :  { %v5135_v34 = vpop.f32.mrf.mxu1 }
 0x581   :  { %v11584_v54 = vpop.f32.mrf.mxu1 }
 0x583   :  { %v5018_v32 = vpop.f32.mrf.mxu0  ;;  %v5141_v13 = vpop.f32.mrf.mxu1 }
 0x584   :  { %v5130_v20 = vadd.f32 %v5129_v49, %v5018_v32 }
 0x585   :  { %v11564_v40 = vpop.f32.mrf.mxu0  ;;  %v11587_v12 = vpop.f32.mrf.mxu1 }
 0x587   :  { %v5028_v42 = vpop.f32.mrf.mxu0  ;;  %v5312_v41 = vpop.f32.mrf.mxu1 }
 0x588   :  { %v5136_v59 = vadd.f32 %v5135_v34, %v5028_v42 }
 0x589   :  { %v11567_v33 = vpop.f32.mrf.mxu0  ;;  %v11615_v11 = vpop.f32.mrf.mxu1 }
 0x58b   :  { %v5038_v51 = vpop.f32.mrf.mxu0  ;;  %v5320_v52 = vpop.f32.mrf.mxu1 }
 0x58c   :  { %v5142_v12 = vadd.f32 %v5141_v13, %v5038_v51 }
 0x58d   :  { %v11570_v5 = vpop.f32.mrf.mxu0  ;;  %v11618_v4 = vpop.f32.mrf.mxu1 }
 0x58f   :  { %v5221_v60 = vpop.f32.mrf.mxu0  ;;  %v5328_v15 = vpop.f32.mrf.mxu1 }
 0x590   :  { %v5222_v36 = vadd.f32 %v5221_v60, %v5130_v20 }
 0x591   :  { %v11598_v45 = vpop.f32.mrf.mxu0  ;;  %v11621_v37 = vpop.f32.mrf.mxu1 }
 0x592   :  { %v5313_v48 = vadd.f32 %v5312_v41, %v5222_v36 }
 0x593   :  { %v5228_v47 = vpop.f32.mrf.mxu0 }
 0x594   :  { %v5498_v62 = vpop.f32.mrf.mxu1  ;;  %v5229_v2 = vadd.f32 %v5228_v47, %v5136_v59 }
 0x595   :  { %v11601_v43 = vpop.f32.mrf.mxu0 }
 0x596   :  { %v11649_v44 = vpop.f32.mrf.mxu1  ;;  %v5321_v45 = vadd.f32 %v5320_v52, %v5229_v2 }
 0x597   :  { %v5235_v31 = vpop.f32.mrf.mxu0 }
 0x598   :  { %v5504_v1 = vpop.f32.mrf.mxu1  ;;  %v5236_v4 = vadd.f32 %v5235_v31, %v5142_v12 }
 0x599   :  { %v11604_v6 = vpop.f32.mrf.mxu0 }
 0x59a   :  { %v11652_v9 = vpop.f32.mrf.mxu1  ;;  %v5329_v60 = vadd.f32 %v5328_v15, %v5236_v4 }
 0x59d   :  { %v5411_v16 = vpop.f32.mrf.mxu0  ;;  %v5510_v24 = vpop.f32.mrf.mxu1 }
 0x59e   :  { %v5412_v33 = vadd.f32 %v5411_v16, %v5313_v48 }
 0x59f   :  { %v11632_v28 = vpop.f32.mrf.mxu0  ;;  %v11655_v21 = vpop.f32.mrf.mxu1 }
 0x5a0   :  { %v5499_v49 = vadd.f32 %v5498_v62, %v5412_v33 }
 0x5a1   :  { %v5417_v30 = vpop.f32.mrf.mxu0 }
 0x5a2   :  { %v5700_v56 = vpop.f32.mrf.mxu1  ;;  %v5418_v43 = vadd.f32 %v5417_v30, %v5321_v45 }
 0x5a3   :  { %v11635_v53 = vpop.f32.mrf.mxu0 }
 0x5a4   :  { %v11683_v57 = vpop.f32.mrf.mxu1  ;;  %v5505_v47 = vadd.f32 %v5504_v1, %v5418_v43 }
 0x5a5   :  { %v5423_v63 = vpop.f32.mrf.mxu0 }
 0x5a6   :  { %v5706_v46 = vpop.f32.mrf.mxu1  ;;  %v5424_v9 = vadd.f32 %v5423_v63, %v5329_v60 }
 0x5a7   :  { %v11638_v38 = vpop.f32.mrf.mxu0 }
 0x5a8   :  { %v11686_v50 = vpop.f32.mrf.mxu1  ;;  %v5511_v16 = vadd.f32 %v5510_v24, %v5424_v9 }
 0x5ab   :  { %v5589_v8 = vpop.f32.mrf.mxu0  ;;  %v5712_v58 = vpop.f32.mrf.mxu1 }
 0x5ac   :  { %v5590_v6 = vadd.f32 %v5589_v8, %v5499_v49 }
 0x5ad   :  { %v11666_v10 = vpop.f32.mrf.mxu0  ;;  %v11689_v61 = vpop.f32.mrf.mxu1 }
 0x5ae   :  { %v5701_v21 = vadd.f32 %v5700_v56, %v5590_v6  ;;  %v10030_v56 = vld [vmem:[%s14761_s10 + $0x2] ss:$0 sm:$0xff] }
 0x5af   :  { %v5599_v3 = vpop.f32.mrf.mxu0 }
 0x5b0   :  { %v5883_v26 = vpop.f32.mrf.mxu1  ;;  %v5600_v28 = vadd.f32 %v5599_v3, %v5505_v47 }
 0x5b1   :  { %v11669_v0 = vpop.f32.mrf.mxu0 }
 0x5b2   :  { %v11717_v54 = vpop.f32.mrf.mxu1  ;;  %v5707_v30 = vadd.f32 %v5706_v46, %v5600_v28 }
 0x5b3   :  { %v5609_v40 = vpop.f32.mrf.mxu0 }
 0x5b4   :  { %v5891_v11 = vpop.f32.mrf.mxu1  ;;  %v5610_v57 = vadd.f32 %v5609_v40, %v5511_v16 }
 0x5b5   :  { %v11672_v5 = vpop.f32.mrf.mxu0 }
 0x5b6   :  { %v11720_v37 = vpop.f32.mrf.mxu1  ;;  %v5713_v10 = vadd.f32 %v5712_v58, %v5610_v57 }
 0x5b9   :  { %v5792_v32 = vpop.f32.mrf.mxu0  ;;  %v5899_v44 = vpop.f32.mrf.mxu1 }
 0x5ba   :  { %v5793_v53 = vadd.f32 %v5792_v32, %v5701_v21 }
 0x5bb   :  { %v11700_v34 = vpop.f32.mrf.mxu0  ;;  %v11723_v42 = vpop.f32.mrf.mxu1 }
 0x5bc   :  { %v5884_v8 = vadd.f32 %v5883_v26, %v5793_v53 }
 0x5bd   :  { %v5799_v41 = vpop.f32.mrf.mxu0 }
 0x5be   :  { %v6069_v13 = vpop.f32.mrf.mxu1  ;;  %v5800_v50 = vadd.f32 %v5799_v41, %v5707_v30 }
 0x5bf   :  { %v11703_v51 = vpop.f32.mrf.mxu0 }
 0x5c0   :  { %v11751_v31 = vpop.f32.mrf.mxu1  ;;  %v5892_v59 = vadd.f32 %v5891_v11, %v5800_v50 }
 0x5c1   :  { %v5806_v52 = vpop.f32.mrf.mxu0 }
 0x5c2   :  { %v6075_v62 = vpop.f32.mrf.mxu1  ;;  %v5807_v24 = vadd.f32 %v5806_v52, %v5713_v10 }
 0x5c3   :  { %v11706_v38 = vpop.f32.mrf.mxu0 }
 0x5c4   :  { %v11754_v15 = vpop.f32.mrf.mxu1  ;;  %v5900_v26 = vadd.f32 %v5899_v44, %v5807_v24 }
 0x5c5   :  { %v5982_v20 = vpop.f32.mrf.mxu0 }
 0x5c6   :  { %v5983_v63 = vadd.f32 %v5982_v20, %v5884_v8  ;;  %v6081_v1 = vpop.f32.mrf.mxu1 }
 0x5c7   :  { %v11734_v61 = vpop.f32.mrf.mxu0 }
 0x5c8   :  { %v6070_v36 = vadd.f32 %v6069_v13, %v5983_v63  ;;  %v11757_v3 = vpop.f32.mrf.mxu1 }
 0x5c9   :  { %v5988_v0 = vpop.f32.mrf.mxu0 }
 0x5ca   :  { %v6090_v46 = vadd.f32 %v10030_v56, %v6070_v36  ;;  %v5989_v2 = vadd.f32 %v5988_v0, %v5892_v59  ;;  %v10031_v59 = vld [vmem:[%s14761_s10 + $0x3] ss:$0 sm:$0xff] }
 0x5cb   :  { %v11737_v48 = vpop.f32.mrf.mxu0 }
 0x5cc   :  { %v6093_v54 = vmax.f32 %v6090_v46, 0.0  ;;  %v6076_v40 = vadd.f32 %v6075_v62, %v5989_v2 }
 0x5cd   :  { %v5994_v12 = vpop.f32.mrf.mxu0 }
 0x5ce   :  { %v6106_v58 = vsel %vm2578_vm15, %v6093_v54, 0  ;;  %v6091_v33 = vadd.f32 %v10030_v56, %v6076_v40  ;;  %v5995_v5 = vadd.f32 %v5994_v12, %v5900_v26 }
 0x5cf   :  { %v14192_v4 = vand.u32 4294901760, %v6106_v58  ;;  %v11740_v45 = vpop.f32.mrf.mxu0 }
 0x5d0   :  { %v6094_v37 = vmax.f32 %v6091_v33, 0.0  ;;  %v6082_v43 = vadd.f32 %v6081_v1, %v5995_v5 }
 0x5d1   :  { %v6184_v49 = vsub.f32 %v6106_v58, %v14192_v4  ;;  %11784 = vmatmul.mubr.f32.vlgmr.msra.gmra.mxu1 %v14192_v4 }
 0x5d2   :  { %v6109_v11 = vsel %vm2578_vm15, %v6094_v37, 0  ;;  %v6092_v32 = vadd.f32 %v10030_v56, %v6082_v43  ;;  %11786 = vmatprep.mubr.msk.f32.mxu1 %vm12234_vm0, %v14785_v35  ;;  %11810 = vmatpush3.msra.mxu1 %v14131_v23 }
 0x5d3   :  { %v6185_v44 = vand.u32 4294901760, %v6184_v49  ;;  %v14200_v60 = vand.u32 4294901760, %v6109_v11  ;;  %11811 = vmatprep.subr.mxu1 %v14785_v35 }
 0x5d4   :  { %v6095_v6 = vmax.f32 %v6092_v32, 0.0  ;;  %11812 = vmatpush3.msra.mxu1 %v14139_v25 }
 0x5d5   :  { %v6186_v34 = vsub.f32 %v6184_v49, %v6185_v44  ;;  %11787 = vmatmul.mubr.f32.gmra.mxu1 %v14200_v60  ;;  %11813 = vmatprep.subr.mxu1 %v14785_v35  ;;  %v6194_v42 = vsub.f32 %v6109_v11, %v14200_v60 }
 0x5d6   :  { %v6112_v9 = vsel %vm2578_vm15, %v6095_v6, 0  ;;  %11789 = vmatprep.mubr.msk.f32.mxu1 %vm12234_vm0, %v14785_v35  ;;  %11814 = vmatpush3.msra.mxu1 %v14150_v22 }
 0x5d7   :  { %v6187_v47 = vand.u32 4294901760, %v6186_v34  ;;  %v14211_v41 = vand.u32 4294901760, %v6112_v9  ;;  %11815 = vmatprep.subr.mxu1 %v14785_v35  ;;  %v6195_v28 = vand.u32 4294901760, %v6194_v42 }
 0x5d8   :  { %11816 = vmatpush3.msra.mxu1 %v14164_v29 }
 0x5d9   :  { %11767 = vmatmul.mubr.f32.vlgmr.msra.gmra.mxu0 %v6187_v47  ;;  %11790 = vmatmul.mubr.f32.gmra.mxu1 %v14211_v41  ;;  %v6196_v21 = vsub.f32 %v6194_v42, %v6195_v28  ;;  %v6204_v13 = vsub.f32 %v6112_v9, %v14211_v41 }
 0x5da   :  { %11769 = vmatprep.mubr.msk.f32.mxu0 %vm12234_vm0, %v14785_v35  ;;  %11817 = vmatprep.mubr.msk.f32.mxu1 %vm12234_vm0, %v14785_v35 }
 0x5db   :  { %v6197_v51 = vand.u32 4294901760, %v6196_v21  ;;  %11793 = vmatpush3.msra.mxu0 %v14137_v17  ;;  %v6205_v16 = vand.u32 4294901760, %v6204_v13  ;;  %11843 = vmatprep.subr.mxu1 %v14785_v35  ;;  %v14792_v17 = vld [vmem:[#allocation2_spill] sm:$0xff] }
 0x5dc   :  { %11794 = vmatprep.subr.mxu0 %v14785_v35 }
 0x5dd   :  { %11770 = vmatmul.mubr.f32.gmra.mxu0 %v6197_v51  ;;  %11818 = vmatmul.mubr.f32.vlgmr.msra.gmra.mxu1 %v6185_v44  ;;  %v6206_v53 = vsub.f32 %v6204_v13, %v6205_v16 }
 0x5de   :  { %11772 = vmatprep.mubr.msk.f32.mxu0 %vm12234_vm0, %v14785_v35  ;;  %11795 = vmatpush3.msra.mxu0 %v14148_v18 }
 0x5df   :  { %11820 = vmatprep.mubr.msk.f32.mxu1 %vm12234_vm0, %v14785_v35  ;;  %v6207_v31 = vand.u32 4294901760, %v6206_v53  ;;  %11796 = vmatprep.subr.mxu0 %v14785_v35 }
 0x5e0   :  { %11797 = vmatpush3.msra.mxu0 %v14162_v19  ;;  %11844 = vmatpush3.msra.mxu1 %v14131_v23  ;;  %v12229_v23 = vld [vmem:[%s14759_s4] ss:$0 sm:$0xff] }
 0x5e1   :  { %11773 = vmatmul.mubr.f32.gmra.mxu0 %v6207_v31  ;;  %11821 = vmatmul.mubr.f32.gmra.mxu1 %v6195_v28  ;;  %vm6690_vm6 = vcmp.eq.s32.totalorder %v14792_v17, %v12229_v23 }
 0x5e2   :  { %11798 = vmatprep.subr.mxu0 %v14785_v35  ;;  %11845 = vmatprep.subr.mxu1 %v14785_v35 }
 0x5e3   :  { %11799 = vmatpush3.msra.mxu0 %v14173_v55  ;;  %11800 = vmatprep.mubr.msk.f32.mxu0 %vm12234_vm0, %v14785_v35  ;;  %v14299_v55 = vsel %vm6691_vm4, 1.0, %v14785_v35  ;;  %vm6703_vm4 = vcmask 1041408  }
 0x5e4   :  { %11823 = vmatprep.mubr.msk.f32.mxu1 %vm12234_vm0, %v14785_v35  ;;  %11846 = vmatpush3.msra.mxu1 %v14139_v25  ;;  %v14276_v25 = vsel %vm6690_vm6, 1.0, %v14785_v35 }
 0x5e5   :  { %11801 = vmatmul.mubr.f32.vlgmr.msra.gmra.mxu0 %v6184_v49  ;;  %11824 = vmatmul.mubr.f32.gmra.mxu1 %v6205_v16 }
 0x5e6   :  { %11847 = vmatprep.subr.mxu1 %v14785_v35  ;;  %11803 = vmatprep.mubr.msk.f32.mxu0 %vm12234_vm0, %v14785_v35 }
 0x5e7   :  { %11848 = vmatpush3.msra.mxu1 %v14150_v22  ;;  %11851 = vmatprep.mubr.msk.f32.mxu1 %vm12234_vm0, %v14785_v35 }
 0x5e8   :  { %11849 = vmatprep.subr.mxu1 %v14785_v35  ;;  %11826 = vmatprep.subr.mxu0 %v14785_v35 }
 0x5e9   :  { %11850 = vmatpush3.msra.mxu1 %v14164_v29  ;;  %11804 = vmatmul.mubr.f32.gmra.mxu0 %v6194_v42 }
 0x5ea   :  { %11852 = vmatmul.mubr.f32.vlgmr.msra.gmra.mxu1 %v14192_v4  ;;  %11827 = vmatpush3.msra.mxu0 %v6240_v27  ;;  %v6698_v27 = vsel %vm6696_vm7, %v14276_v25, 0 }
 0x5eb   :  { %11828 = vmatprep.subr.mxu0 %v14785_v35  ;;  %11806 = vmatprep.mubr.msk.f32.mxu0 %vm12234_vm0, %v14785_v35  ;;  %v14289_v18 = vsub.f32 %v6698_v27, %v6698_v27 }
 0x5ec   :  { %11829 = vmatpush3.msra.mxu0 %v6247_v7  ;;  %11854 = vmatprep.mubr.msk.f32.mxu1 %vm12234_vm0, %v14785_v35 }
 0x5ed   :  { %11807 = vmatmul.mubr.f32.gmra.mxu0 %v6204_v13  ;;  %11830 = vmatprep.subr.mxu0 %v14785_v35  ;;  %v6777_v22 = vand.u32 4294901760, %v14289_v18 }
 0x5ee   :  { %11855 = vmatmul.mubr.f32.gmra.mxu1 %v14200_v60  ;;  %11831 = vmatpush3.msra.mxu0 %v6254_v14 }
 0x5ef   :  { %11832 = vmatprep.subr.mxu0 %v14785_v35  ;;  %11834 = vmatprep.mubr.msk.f32.mxu0 %vm12234_vm0, %v14785_v35  ;;  %v6778_v7 = vsub.f32 %v14289_v18, %v6777_v22 }
 0x5f0   :  { %11833 = vmatpush3.msra.mxu0 %v6261_v39  ;;  %11857 = vmatprep.mubr.msk.f32.mxu1 %vm12234_vm0, %v14785_v35  ;;  %v7222_v39 = vsel %vm6696_vm7, %v14276_v25, 0.0 }
 0x5f1   :  { %11835 = vmatmul.mubr.f32.vlgmr.msra.gmra.mxu0 %v14192_v4  ;;  %v6779_v19 = vand.u32 4294901760, %v6778_v7  ;;  %7223 = vadd.xlane.f32.xlu1 %v7222_v39 }
 0x5f2   :  { %11858 = vmatmul.mubr.f32.gmra.mxu1 %v14211_v41  ;;  %11837 = vmatprep.mubr.msk.f32.mxu0 %vm12234_vm0, %v14785_v35 }
 0x5f3   :  { %11875 = vmatprep.mubr.msk.f32.mxu1 %vm6696_vm7, %v14276_v25 }
 0x5f5   :  { %11838 = vmatmul.mubr.f32.gmra.mxu0 %v14200_v60 }
 0x5f6   :  { %11840 = vmatprep.mubr.msk.f32.mxu0 %vm12234_vm0, %v14785_v35  ;;  %vm7225_vm0 = vcmask 142336  }
 0x5f7   :  { %v7226_v52 = vsel %vm7225_vm0, %v14299_v55, 0.0 }
 0x5f8   :  { %7227 = vadd.xlane.f32.xlu0 %v7226_v52 }
 0x5f9   :  { %11841 = vmatmul.mubr.f32.gmra.mxu0 %v14211_v41  ;;  %v6701_v41 = vsel %vm6696_vm7, %v14299_v55, 0 }
 0x5fa   :  { %11866 = vmatprep.mubr.f32.mxu0 %v6779_v19  ;;  %v14309_v53 = vsub.f32 %v6701_v41, %v6701_v41 }
 0x5fc   :  { %v6787_v14 = vand.u32 4294901760, %v14309_v53 }
 0x691   :  { %v6300_v57 = vpop.f32.mrf.mxu1 }
 0x693   :  { %v11785_v30 = vpop.f32.mrf.mxu1 }
 0x695   :  { %v6306_v62 = vpop.f32.mrf.mxu1 }
 0x697   :  { %v11788_v38 = vpop.f32.mrf.mxu1 }
 0x699   :  { %v6189_v50 = vpop.f32.mrf.mxu0  ;;  %v6312_v15 = vpop.f32.mrf.mxu1 }
 0x69a   :  { %v6190_v2 = vadd.f32 %v10031_v59, %v6189_v50 }
 0x69b   :  { %v11768_v8 = vpop.f32.mrf.mxu0  ;;  %v11791_v20 = vpop.f32.mrf.mxu1 }
 0x69c   :  { %v6301_v58 = vadd.f32 %v6300_v57, %v6190_v2 }
 0x69d   :  { %v6199_v10 = vpop.f32.mrf.mxu0  ;;  %v6483_v63 = vpop.f32.mrf.mxu1 }
 0x69e   :  { %v6200_v26 = vadd.f32 %v10031_v59, %v6199_v10 }
 0x69f   :  { %v11771_v1 = vpop.f32.mrf.mxu0  ;;  %v11819_v56 = vpop.f32.mrf.mxu1 }
 0x6a0   :  { %v6307_v43 = vadd.f32 %v6306_v62, %v6200_v26 }
 0x6a1   :  { %v6209_v61 = vpop.f32.mrf.mxu0  ;;  %v6491_v24 = vpop.f32.mrf.mxu1 }
 0x6a2   :  { %v6210_v37 = vadd.f32 %v10031_v59, %v6209_v61 }
 0x6a3   :  { %v11774_v36 = vpop.f32.mrf.mxu0  ;;  %v11822_v3 = vpop.f32.mrf.mxu1 }
 0x6a4   :  { %v6313_v34 = vadd.f32 %v6312_v15, %v6210_v37  ;;  %v6788_v15 = vsub.f32 %v14309_v53, %v6787_v14 }
 0x6a5   :  { %v6392_v0 = vpop.f32.mrf.mxu0  ;;  %v6499_v46 = vpop.f32.mrf.mxu1 }
 0x6a6   :  { %v6393_v4 = vadd.f32 %v6392_v0, %v6301_v58  ;;  %v6789_v10 = vand.u32 4294901760, %v6788_v15  ;;  %v7241_v0 = vld [vmem:[%s14760_s9 + $0x110] sm:$0xff] }
 0x6a7   :  { %v11802_v48 = vpop.f32.mrf.mxu0  ;;  %v11825_v54 = vpop.f32.mrf.mxu1 }
 0x6a8   :  { %v6484_v60 = vadd.f32 %v6483_v63, %v6393_v4 }
 0x6a9   :  { %v6399_v40 = vpop.f32.mrf.mxu0 }
 0x6aa   :  { %v6669_v12 = vpop.f32.mrf.mxu1  ;;  %v6400_v32 = vadd.f32 %v6399_v40, %v6307_v43  ;;  %v7239_v40 = vld [vmem:[%s14760_s9 + $0x100] sm:$0xff] }
 0x6ab   :  { %v11805_v33 = vpop.f32.mrf.mxu0 }
 0x6ac   :  { %v11853_v5 = vpop.f32.mrf.mxu1  ;;  %v6492_v13 = vadd.f32 %v6491_v24, %v6400_v32  ;;  %v14384_v33 = vand.u32 4294901760, %v7239_v40 }
 0x6ad   :  { %v6406_v45 = vpop.f32.mrf.mxu0 }
 0x6ae   :  { %v6675_v49 = vpop.f32.mrf.mxu1  ;;  %v6407_v28 = vadd.f32 %v6406_v45, %v6313_v34  ;;  %v14394_v37 = vsub.f32 %v7239_v40, %v14384_v33 }
 0x6af   :  { %v11808_v11 = vpop.f32.mrf.mxu0 }
 0x6b0   :  { %v11856_v44 = vpop.f32.mrf.mxu1  ;;  %v6500_v27 = vadd.f32 %v6499_v46, %v6407_v28  ;;  %v14356_v46 = vand.u32 4294901760, %v7241_v0  ;;  %v14401_v11 = vand.u32 4294901760, %v14394_v37 }
 0x6b1   :  { %v6582_v6 = vpop.f32.mrf.mxu0 }
 0x6b2   :  { %v6681_v42 = vpop.f32.mrf.mxu1  ;;  %v6583_v9 = vadd.f32 %v6582_v6, %v6484_v60  ;;  %v14367_v48 = vsub.f32 %v7241_v0, %v14356_v46  ;;  %v7387_v44 = vsub.f32 %v14394_v37, %v14401_v11  ;;  %v7228_v6 = vpop.xlane.xlu0 %7227 }
 0x6b3   :  { %v11836_v47 = vpop.f32.mrf.mxu0 }
 0x6b4   :  { %v11859_v21 = vpop.f32.mrf.mxu1  ;;  %v6670_v31 = vadd.f32 %v6669_v12, %v6583_v9  ;;  %v14379_v12 = vand.u32 4294901760, %v14367_v48  ;;  %v7388_v60 = vand.u32 4294901760, %v7387_v44  ;;  %v7230_v9 = vmax.f32 %v7228_v6, 1.0 }
 0x6b5   :  { %v6588_v51 = vpop.f32.mrf.mxu0 }
 0x6b6   :  { %v6589_v16 = vadd.f32 %v6588_v51, %v6492_v13  ;;  %v14314_v39 = vand.u32 4294901760, %v6670_v31  ;;  %v7373_v4 = vsub.f32 %v14367_v48, %v14379_v12  ;;  %12217 = vrcp.f32 %v7230_v9  ;;  %v14795_v9 = vld [vmem:[#allocation6_spill] sm:$0xff] }
 0x6b7   :  { %v11839_v23 = vpop.f32.mrf.mxu0 }
 0x6b8   :  { %v6676_v17 = vadd.f32 %v6675_v49, %v6589_v16  ;;  %v6837_v38 = vsub.f32 %v6670_v31, %v14314_v39  ;;  %v7374_v43 = vand.u32 4294901760, %v7373_v4 }
 0x6b9   :  { %v6594_v7 = vpop.f32.mrf.mxu0 }
 0x6ba   :  { %v14311_v19 = vand.u32 4294901760, %v6676_v17  ;;  %v6595_v29 = vadd.f32 %v6594_v7, %v6500_v27  ;;  %v6838_v1 = vand.u32 4294901760, %v6837_v38 }
 0x6bb   :  { %v11842_v52 = vpop.f32.mrf.mxu0 }
 0x6bc   :  { %v6682_v57 = vadd.f32 %v6681_v42, %v6595_v29  ;;  %v6830_v30 = vsub.f32 %v6676_v17, %v14311_v19  ;;  %v6839_v36 = vsub.f32 %v6837_v38, %v6838_v1  ;;  %v7224_v42 = vpop.xlane.xlu1 %7223 }
 0x6bd   :  { %v7229_v41 = vmax.f32 %v7224_v42, 1.0 }
 0x6be   :  { %v6705_v62 = vsel %vm6703_vm4, %v6682_v57, 0  ;;  %v6831_v20 = vand.u32 4294901760, %v6830_v30  ;;  %v6840_v59 = vand.u32 4294901760, %v6839_v36 }
 0x6bf   :  { %v6734_v50 = vand.u32 4294901760, %v6705_v62  ;;  %12219 = vrcp.f32 %v7229_v41 }
 0x6c0   :  { %v6832_v61 = vsub.f32 %v6830_v30, %v6831_v20 }
 0x6c1   :  { %v6823_v8 = vsub.f32 %v6705_v62, %v6734_v50  ;;  %11860 = vmatprep.subr.mxu0 %v6734_v50 }
 0x6c2   :  { %11861 = vmatpush3.msra.mxu0 %v6734_v50  ;;  %v6833_v3 = vand.u32 4294901760, %v6832_v61 }
 0x6c3   :  { %11862 = vmatprep.subr.mxu0 %v14311_v19  ;;  %v6824_v63 = vand.u32 4294901760, %v6823_v8  ;;  %v12218_v52 = vpop.eup %12217 }
 0x6c4   :  { %11863 = vmatpush3.msra.mxu0 %v14311_v19 }
 0x6c5   :  { %11864 = vmatprep.subr.mxu0 %v14314_v39  ;;  %v6825_v56 = vsub.f32 %v6823_v8, %v6824_v63 }
 0x6c6   :  { %11865 = vmatpush3.msra.mxu0 %v14314_v39 }
 0x6c7   :  { %11878 = vmatprep.subr.mxu0 %v6823_v8  ;;  %11867 = vmatmul.mubr.f32.vlgmr.msra.gmra.mxu0 %v6789_v10  ;;  %v6826_v24 = vand.u32 4294901760, %v6825_v56  ;;  %v7238_v56 = vld [vmem:[%s14760_s9 + $0xf8] sm:$0xff] }
 0x6c8   :  { %11879 = vmatpush3.msra.mxu0 %v6823_v8  ;;  %11884 = vmatprep.mubr.f32.mxu0 %v14289_v18  ;;  %v7242_v18 = vld [vmem:[%s14760_s9 + $0x118] sm:$0xff] }
 0x6c9   :  { %11869 = vmatprep.subr.mxu1 %v6826_v24  ;;  %11880 = vmatprep.subr.mxu0 %v6830_v30 }
 0x6ca   :  { %11870 = vmatpush3.msra.mxu1 %v6826_v24  ;;  %11881 = vmatpush3.msra.mxu0 %v6830_v30 }
 0x6cb   :  { %11871 = vmatprep.subr.mxu1 %v6833_v3  ;;  %11882 = vmatprep.subr.mxu0 %v6837_v38 }
 0x6cc   :  { %11872 = vmatpush3.msra.mxu1 %v6833_v3  ;;  %11883 = vmatpush3.msra.mxu0 %v6837_v38  ;;  %v12220_v38 = vpop.eup %12219 }
 0x6cd   :  { %11873 = vmatprep.subr.mxu1 %v6840_v59  ;;  %11896 = vmatprep.subr.mxu0 %v6824_v63 }
 0x6ce   :  { %11874 = vmatpush3.msra.mxu1 %v6840_v59  ;;  %11885 = vmatmul.mubr.f32.vlgmr.msra.gmra.mxu0 %v14309_v53  ;;  %v14419_v59 = vand.u32 4294901760, %v7238_v56 }
 0x6cf   :  { %11897 = vmatpush3.msra.mxu0 %v6824_v63  ;;  %11887 = vmatprep.subr.mxu1 %v6734_v50 }
 0x6d0   :  { %11898 = vmatprep.subr.mxu0 %v6831_v20  ;;  %11876 = vmatmul.mubr.msk.f32.vlgmr.msra.gmra.mxu1 %vm6696_vm7, %v14299_v55  ;;  %v14434_v4 = vsub.f32 %v7238_v56, %v14419_v59 }
 0x6d1   :  { %11888 = vmatpush3.msra.mxu1 %v6734_v50  ;;  %11899 = vmatpush3.msra.mxu0 %v6831_v20 }
 0x6d2   :  { %11889 = vmatprep.subr.mxu1 %v14311_v19  ;;  %11900 = vmatprep.subr.mxu0 %v6838_v1 }
 0x6d3   :  { %11890 = vmatpush3.msra.mxu1 %v14311_v19  ;;  %11901 = vmatpush3.msra.mxu0 %v6838_v1 }
 0x6d4   :  { %11891 = vmatprep.subr.mxu1 %v14314_v39  ;;  %11893 = vmatprep.mubr.f32.mxu1 %v6777_v22  ;;  %v14348_v22 = vand.u32 4294901760, %v7242_v18 }
 0x6d5   :  { %11892 = vmatpush3.msra.mxu1 %v14314_v39  ;;  %11902 = vmatprep.mubr.msk.f32.mxu0 %vm6696_vm7, %v14276_v25 }
 0x6d6   :  { %11905 = vmatprep.subr.mxu1 %v6734_v50  ;;  %11894 = vmatmul.mubr.f32.vlgmr.msra.gmra.mxu1 %v6787_v14 }
 0x6d7   :  { %11906 = vmatpush3.msra.mxu1 %v6734_v50  ;;  %11903 = vmatmul.mubr.msk.f32.vlgmr.msra.gmra.mxu0 %vm6696_vm7, %v14299_v55 }
 0x6d8   :  { %11907 = vmatprep.subr.mxu1 %v14311_v19  ;;  %11911 = vmatprep.mubr.msk.f32.mxu1 %vm6696_vm7, %v14276_v25  ;;  %v14354_v25 = vsub.f32 %v7242_v18, %v14348_v22  ;;  %v7237_v18 = vld [vmem:[%s14760_s9 + $0xf0] sm:$0xff] }
 0x6d9   :  { %11908 = vmatpush3.msra.mxu1 %v14311_v19  ;;  %11914 = vmatprep.subr.mxu0 %v14348_v22  ;;  %v14430_v40 = vand.u32 4294901760, %v7237_v18 }
 0x6da   :  { %11909 = vmatprep.subr.mxu1 %v14314_v39  ;;  %11915 = vmatpush3.msra.mxu0 %v14348_v22  ;;  %v14364_v2 = vand.u32 4294901760, %v14354_v25 }
 0x6db   :  { %11910 = vmatpush3.msra.mxu1 %v14314_v39  ;;  %11916 = vmatprep.subr.mxu0 %v14356_v46  ;;  %v14445_v44 = vsub.f32 %v7237_v18, %v14430_v40 }
 0x6dc   :  { %11912 = vmatmul.mubr.msk.f32.vlgmr.msra.gmra.mxu1 %vm6696_vm7, %v14299_v55  ;;  %v7240_v55 = vld [vmem:[%s14760_s9 + $0x108] sm:$0xff]  ;;  %11917 = vmatpush3.msra.mxu0 %v14356_v46  ;;  %v7366_v26 = vsub.f32 %v14354_v25, %v14364_v2 }
 0x6dd   :  { %v14369_v54 = vand.u32 4294901760, %v7240_v55  ;;  %v14463_v41 = vand.u32 4294901760, %v14445_v44 }
 0x6de   :  { %v7367_v5 = vand.u32 4294901760, %v7366_v26 }
 0x6df   :  { %v14382_v58 = vsub.f32 %v7240_v55, %v14369_v54  ;;  %11918 = vmatprep.subr.mxu0 %v14369_v54  ;;  %v7236_v55 = vld [vmem:[%s14760_s9 + $0xe8] sm:$0xff] }
 0x6e0   :  { %11919 = vmatpush3.msra.mxu0 %v14369_v54  ;;  %11925 = vmatprep.subr.mxu1 %v7367_v5 }
 0x6e1   :  { %v14391_v45 = vand.u32 4294901760, %v14382_v58  ;;  %11920 = vmatprep.subr.mxu0 %v14384_v33  ;;  %11926 = vmatpush3.msra.mxu1 %v7367_v5 }
 0x6e2   :  { %11921 = vmatpush3.msra.mxu0 %v14384_v33  ;;  %11927 = vmatprep.subr.mxu1 %v7374_v43 }
 0x6e3   :  { %v7380_v49 = vsub.f32 %v14382_v58, %v14391_v45  ;;  %11936 = vmatprep.subr.mxu0 %v14354_v25  ;;  %11928 = vmatpush3.msra.mxu1 %v7374_v43  ;;  %v7235_v43 = vld [vmem:[%s14760_s9 + $0xe0] sm:$0xff] }
 0x6e5   :  { %v7381_v32 = vand.u32 4294901760, %v7380_v49  ;;  %v14440_v49 = vand.u32 4294901760, %v7236_v55 }
 0x6e7   :  { %11929 = vmatprep.subr.mxu1 %v7381_v32  ;;  %v14455_v42 = vsub.f32 %v7236_v55, %v14440_v49 }
 0x6e8   :  { %11930 = vmatpush3.msra.mxu1 %v7381_v32 }
 0x6e9   :  { %11931 = vmatprep.subr.mxu1 %v7388_v60 }
 0x6ea   :  { %11932 = vmatpush3.msra.mxu1 %v7388_v60  ;;  %v14447_v60 = vand.u32 4294901760, %v7235_v43 }
 0x6eb   :  { %11947 = vmatprep.subr.mxu1 %v14348_v22 }
 0x787   :  { %v11868_v34 = vpop.f32.mrf.mxu0 }
 0x789   :  { %v6781_v47 = vpop.f32.mrf.mxu0 }
 0x78e   :  { %v11886_v21 = vpop.f32.mrf.mxu0 }
 0x790   :  { %v11877_v28 = vpop.f32.mrf.mxu1  ;;  %v6961_v53 = vpop.f32.mrf.mxu0 }
 0x791   :  { %v6884_v13 = vadd.f32 %v11877_v28, %v11868_v34  ;;  %v14451_v34 = vand.u32 4294901760, %v14434_v4  ;;  %v14466_v28 = vsub.f32 %v7235_v43, %v14447_v60 }
 0x792   :  { %v6877_v51 = vpop.f32.mrf.mxu1 }
 0x793   :  { %v6878_v16 = vadd.f32 %v6877_v51, %v6781_v47  ;;  %v6969_v31 = vadd.f32 %v11886_v21, %v6884_v13  ;;  %v7778_v47 = vsel %vm2578_vm15, %v14795_v9, 0  ;;  %v7899_v21 = vsub.f32 %v14434_v4, %v14451_v34 }
 0x794   :  { %v7906_v13 = vsub.f32 %v14445_v44, %v14463_v41  ;;  %v14485_v51 = vand.u32 4294901760, %v14466_v28 }
 0x795   :  { %v6962_v17 = vadd.f32 %v6961_v53, %v6878_v16  ;;  %v14796_v16 = vld [vmem:[#allocation5_spill] sm:$0xff] }
 0x796   :  { %v11895_v23 = vpop.f32.mrf.mxu1 }
 0x797   :  { %v7053_v27 = vadd.f32 %v11895_v23, %v6969_v31  ;;  %v11904_v7 = vpop.f32.mrf.mxu0  ;;  %v7920_v31 = vsub.f32 %v14466_v28, %v14485_v51 }
 0x798   :  { %v7044_v19 = vpop.f32.mrf.mxu1 }
 0x799   :  { %v7045_v29 = vadd.f32 %v7044_v19, %v6962_v17  ;;  %v7132_v14 = vpop.f32.mrf.mxu0  ;;  %v7139_v39 = vadd.f32 %v11904_v7, %v7053_v27  ;;  %v8322_v19 = vld [vmem:[%s14760_s9 + $0x138] sm:$0xff] }
 0x79b   :  { %v7133_v30 = vadd.f32 %v7132_v14, %v7045_v29  ;;  %v14562_v29 = vand.u32 4294901760, %v8322_v19  ;;  %v8321_v14 = vld [vmem:[%s14760_s9 + $0x130] sm:$0xff] }
 0x79c   :  { %v11913_v57 = vpop.f32.mrf.mxu1 }
 0x79d   :  { %v7219_v62 = vadd.f32 %v11913_v57, %v7139_v39  ;;  %v14568_v39 = vsub.f32 %v8322_v19, %v14562_v29  ;;  %v8320_v57 = vld [vmem:[%s14760_s9 + $0x128] sm:$0xff] }
 0x79e   :  { %v7212_v50 = vpop.f32.mrf.mxu1 }
 0x79f   :  { %v7234_v15 = vmul.f32 %v12218_v52, %v7219_v62  ;;  %v7213_v8 = vadd.f32 %v7212_v50, %v7133_v30  ;;  %v14570_v52 = vand.u32 4294901760, %v8321_v14  ;;  %v14578_v30 = vand.u32 4294901760, %v14568_v39  ;;  %v8319_v50 = vld [vmem:[%s14760_s9 + $0x120] sm:$0xff] }
 0x7a1   :  { %v7247_v20 = vsel %vm2578_vm15, %v7234_v15, 0  ;;  %v7232_v10 = vmul.f32 %v12220_v38, %v7213_v8  ;;  %v14581_v62 = vsub.f32 %v8321_v14, %v14570_v52  ;;  %v14583_v38 = vand.u32 4294901760, %v8320_v57 }
 0x7a2   :  { %v14408_v63 = vand.u32 4294901760, %v7247_v20  ;;  %v8451_v15 = vsub.f32 %v14568_v39, %v14578_v30 }
 0x7a3   :  { %v7244_v1 = vsel %vm2578_vm15, %v7232_v10, 0  ;;  %v14593_v8 = vand.u32 4294901760, %v14581_v62  ;;  %v14598_v10 = vand.u32 4294901760, %v8319_v50 }
 0x7a4   :  { %v7329_v61 = vsub.f32 %v7247_v20, %v14408_v63  ;;  %v14415_v24 = vand.u32 4294901760, %v7244_v1  ;;  %v14596_v20 = vsub.f32 %v8320_v57, %v14583_v38  ;;  %v10041_v57 = vld [vmem:[%s14761_s10 + $0x4] ss:$0 sm:$0xff] }
 0x7a6   :  { %v7330_v36 = vand.u32 4294901760, %v7329_v61  ;;  %v7319_v3 = vsub.f32 %v7244_v1, %v14415_v24  ;;  %11933 = vmatprep.mubr.f32.mxu1 %v14415_v24  ;;  %v8458_v1 = vsub.f32 %v14581_v62, %v14593_v8  ;;  %v14605_v56 = vand.u32 4294901760, %v14596_v20 }
 0x7a7   :  { %11934 = vmatmul.mubr.f32.vlgmr.msra.gmra.mxu1 %v14408_v63 }
 0x7a8   :  { %11948 = vmatpush3.msra.mxu1 %v14348_v22  ;;  %v7320_v0 = vand.u32 4294901760, %v7319_v3  ;;  %v7331_v26 = vsub.f32 %v7329_v61, %v7330_v36 }
 0x7a9   :  { %11949 = vmatprep.subr.mxu1 %v14356_v46 }
 0x7aa   :  { %11950 = vmatpush3.msra.mxu1 %v14356_v46  ;;  %11955 = vmatprep.mubr.f32.mxu1 %v7320_v0  ;;  %v7321_v5 = vsub.f32 %v7319_v3, %v7320_v0  ;;  %v7332_v6 = vand.u32 4294901760, %v7331_v26 }
 0x7ab   :  { %11951 = vmatprep.subr.mxu1 %v14369_v54 }
 0x7ac   :  { %11952 = vmatpush3.msra.mxu1 %v14369_v54  ;;  %v7322_v32 = vand.u32 4294901760, %v7321_v5 }
 0x7ad   :  { %11953 = vmatprep.subr.mxu1 %v14384_v33 }
 0x7ae   :  { %11954 = vmatpush3.msra.mxu1 %v14384_v33  ;;  %11922 = vmatprep.mubr.f32.mxu0 %v7322_v32 }
 0x7af   :  { %11956 = vmatmul.mubr.f32.vlgmr.msra.gmra.mxu1 %v7330_v36  ;;  %11969 = vmatprep.subr.mxu1 %v14348_v22  ;;  %v8465_v36 = vsub.f32 %v14596_v20, %v14605_v56 }
 0x7b0   :  { %11923 = vmatmul.mubr.f32.vlgmr.msra.gmra.mxu0 %v7332_v6  ;;  %11970 = vmatpush3.msra.mxu1 %v14348_v22  ;;  %v14473_v22 = vand.u32 4294901760, %v7778_v47 }
 0x7b1   :  { %11937 = vmatpush3.msra.mxu0 %v14354_v25  ;;  %11977 = vmatprep.mubr.f32.mxu1 %v14415_v24  ;;  %v14476_v25 = vand.u32 4294901760, %v14455_v42 }
 0x7b2   :  { %11938 = vmatprep.subr.mxu0 %v14367_v48  ;;  %11944 = vmatprep.mubr.f32.mxu0 %v7319_v3  ;;  %v7852_v53 = vsub.f32 %v7778_v47, %v14473_v22 }
 0x7b3   :  { %11971 = vmatprep.subr.mxu1 %v14356_v46  ;;  %11939 = vmatpush3.msra.mxu0 %v14367_v48  ;;  %v7900_v48 = vand.u32 4294901760, %v7899_v21 }
 0x7b4   :  { %11972 = vmatpush3.msra.mxu1 %v14356_v46  ;;  %11940 = vmatprep.subr.mxu0 %v14382_v58  ;;  %v7780_v46 = vsel %vm2578_vm15, %v14796_v16, 0  ;;  %v7853_v17 = vand.u32 4294901760, %v7852_v53 }
 0x7b5   :  { %11973 = vmatprep.subr.mxu1 %v14369_v54  ;;  %11941 = vmatpush3.msra.mxu0 %v14382_v58  ;;  %v7913_v58 = vsub.f32 %v14455_v42, %v14476_v25  ;;  %v14501_v23 = vand.u32 4294901760, %v7780_v46 }
 0x7b6   :  { %11974 = vmatpush3.msra.mxu1 %v14369_v54  ;;  %11942 = vmatprep.subr.mxu0 %v14394_v37  ;;  %v7907_v54 = vand.u32 4294901760, %v7906_v13 }
 0x7b7   :  { %11975 = vmatprep.subr.mxu1 %v14384_v33  ;;  %11943 = vmatpush3.msra.mxu0 %v14394_v37  ;;  %v7914_v37 = vand.u32 4294901760, %v7913_v58  ;;  %v7862_v27 = vsub.f32 %v7780_v46, %v14501_v23 }
 0x7b8   :  { %11976 = vmatpush3.msra.mxu1 %v14384_v33  ;;  %11945 = vmatmul.mubr.f32.vlgmr.msra.gmra.mxu0 %v7329_v61  ;;  %v7921_v33 = vand.u32 4294901760, %v7920_v31  ;;  %v14608_v61 = vsub.f32 %v8319_v50, %v14598_v10 }
 0x7b9   :  { %11958 = vmatprep.subr.mxu0 %v14364_v2  ;;  %11978 = vmatmul.mubr.f32.vlgmr.msra.gmra.mxu1 %v14408_v63  ;;  %v7863_v7 = vand.u32 4294901760, %v7862_v27 }
 0x7ba   :  { %11991 = vmatprep.subr.mxu1 %v7900_v48  ;;  %11959 = vmatpush3.msra.mxu0 %v14364_v2  ;;  %v7854_v2 = vsub.f32 %v7852_v53, %v7853_v17  ;;  %v14615_v3 = vand.u32 4294901760, %v14608_v61 }
 0x7bb   :  { %11966 = vmatprep.mubr.f32.mxu0 %v14415_v24  ;;  %11992 = vmatpush3.msra.mxu1 %v7900_v48  ;;  %v8459_v24 = vand.u32 4294901760, %v8458_v1 }
 0x7bc   :  { %11999 = vmatprep.mubr.f32.mxu1 %v14473_v22  ;;  %11960 = vmatprep.subr.mxu0 %v14379_v12  ;;  %v8472_v18 = vsub.f32 %v14608_v61, %v14615_v3 }
 0x7bd   :  { %11993 = vmatprep.subr.mxu1 %v7907_v54  ;;  %11961 = vmatpush3.msra.mxu0 %v14379_v12  ;;  %v7855_v12 = vand.u32 4294901760, %v7854_v2 }
 0x7be   :  { %11994 = vmatpush3.msra.mxu1 %v7907_v54  ;;  %11962 = vmatprep.subr.mxu0 %v14391_v45  ;;  %v8473_v0 = vand.u32 4294901760, %v8472_v18 }
 0x7bf   :  { %11995 = vmatprep.subr.mxu1 %v7914_v37  ;;  %11963 = vmatpush3.msra.mxu0 %v14391_v45  ;;  %v7864_v45 = vsub.f32 %v7862_v27, %v7863_v7 }
 0x7c0   :  { %11996 = vmatpush3.msra.mxu1 %v7914_v37  ;;  %11964 = vmatprep.subr.mxu0 %v14401_v11 }
 0x7c1   :  { %11997 = vmatprep.subr.mxu1 %v7921_v33  ;;  %11965 = vmatpush3.msra.mxu0 %v14401_v11  ;;  %v7865_v11 = vand.u32 4294901760, %v7864_v45 }
 0x7c2   :  { %11998 = vmatpush3.msra.mxu1 %v7921_v33  ;;  %11967 = vmatmul.mubr.f32.vlgmr.msra.gmra.mxu0 %v14408_v63  ;;  %v8452_v63 = vand.u32 4294901760, %v8451_v15 }
 0x7c3   :  { %11980 = vmatprep.subr.mxu0 %v14419_v59  ;;  %12000 = vmatmul.mubr.f32.vlgmr.msra.gmra.mxu1 %v14501_v23 }
 0x7c4   :  { %12013 = vmatprep.subr.mxu1 %v14419_v59  ;;  %11981 = vmatpush3.msra.mxu0 %v14419_v59 }
 0x7c5   :  { %11988 = vmatprep.mubr.f32.mxu0 %v7855_v12  ;;  %12014 = vmatpush3.msra.mxu1 %v14419_v59 }
 0x7c6   :  { %12021 = vmatprep.mubr.f32.mxu1 %v7853_v17  ;;  %11982 = vmatprep.subr.mxu0 %v14430_v40 }
 0x7c7   :  { %12015 = vmatprep.subr.mxu1 %v14430_v40  ;;  %11983 = vmatpush3.msra.mxu0 %v14430_v40 }
 0x7c8   :  { %12016 = vmatpush3.msra.mxu1 %v14430_v40  ;;  %11984 = vmatprep.subr.mxu0 %v14440_v49 }
 0x7c9   :  { %12017 = vmatprep.subr.mxu1 %v14440_v49  ;;  %11985 = vmatpush3.msra.mxu0 %v14440_v49 }
 0x7ca   :  { %12018 = vmatpush3.msra.mxu1 %v14440_v49  ;;  %11986 = vmatprep.subr.mxu0 %v14447_v60 }
 0x7cb   :  { %12019 = vmatprep.subr.mxu1 %v14447_v60  ;;  %11987 = vmatpush3.msra.mxu0 %v14447_v60 }
 0x7cc   :  { %12020 = vmatpush3.msra.mxu1 %v14447_v60  ;;  %11989 = vmatmul.mubr.f32.vlgmr.msra.gmra.mxu0 %v7865_v11 }
 0x7cd   :  { %12002 = vmatprep.subr.mxu0 %v14434_v4  ;;  %12022 = vmatmul.mubr.f32.vlgmr.msra.gmra.mxu1 %v7863_v7 }
 0x7ce   :  { %12035 = vmatprep.subr.mxu1 %v14419_v59  ;;  %12003 = vmatpush3.msra.mxu0 %v14434_v4 }
 0x7cf   :  { %12010 = vmatprep.mubr.f32.mxu0 %v7852_v53  ;;  %12036 = vmatpush3.msra.mxu1 %v14419_v59  ;;  %v8466_v59 = vand.u32 4294901760, %v8465_v36 }
 0x7d0   :  { %12043 = vmatprep.mubr.f32.mxu1 %v14473_v22  ;;  %12004 = vmatprep.subr.mxu0 %v14445_v44 }
 0x7d1   :  { %12037 = vmatprep.subr.mxu1 %v14430_v40  ;;  %12005 = vmatpush3.msra.mxu0 %v14445_v44 }
 0x7d2   :  { %12038 = vmatpush3.msra.mxu1 %v14430_v40  ;;  %12006 = vmatprep.subr.mxu0 %v14455_v42 }
 0x7d3   :  { %12039 = vmatprep.subr.mxu1 %v14440_v49  ;;  %12007 = vmatpush3.msra.mxu0 %v14455_v42 }
 0x7d4   :  { %12040 = vmatpush3.msra.mxu1 %v14440_v49  ;;  %12008 = vmatprep.subr.mxu0 %v14466_v28 }
 0x7d5   :  { %12041 = vmatprep.subr.mxu1 %v14447_v60  ;;  %12009 = vmatpush3.msra.mxu0 %v14466_v28 }
 0x7d6   :  { %12042 = vmatpush3.msra.mxu1 %v14447_v60  ;;  %12011 = vmatmul.mubr.f32.vlgmr.msra.gmra.mxu0 %v7862_v27 }
 0x7d7   :  { %12024 = vmatprep.subr.mxu0 %v14451_v34  ;;  %12044 = vmatmul.mubr.f32.vlgmr.msra.gmra.mxu1 %v14501_v23 }
 0x7d8   :  { %12025 = vmatpush3.msra.mxu0 %v14451_v34  ;;  %12032 = vmatprep.mubr.f32.mxu0 %v14473_v22 }
 0x7d9   :  { %12026 = vmatprep.subr.mxu0 %v14463_v41  ;;  %12057 = vmatprep.subr.mxu1 %v8452_v63 }
 0x7da   :  { %12027 = vmatpush3.msra.mxu0 %v14463_v41  ;;  %12058 = vmatpush3.msra.mxu1 %v8452_v63 }
 0x7db   :  { %12028 = vmatprep.subr.mxu0 %v14476_v25  ;;  %12059 = vmatprep.subr.mxu1 %v8459_v24 }
 0x7dc   :  { %12029 = vmatpush3.msra.mxu0 %v14476_v25  ;;  %12060 = vmatpush3.msra.mxu1 %v8459_v24 }
 0x7dd   :  { %12030 = vmatprep.subr.mxu0 %v14485_v51  ;;  %12061 = vmatprep.subr.mxu1 %v8466_v59 }
 0x7de   :  { %12031 = vmatpush3.msra.mxu0 %v14485_v51  ;;  %12062 = vmatpush3.msra.mxu1 %v8466_v59 }
 0x7df   :  { %12033 = vmatmul.mubr.f32.vlgmr.msra.gmra.mxu0 %v14501_v23  ;;  %12046 = vmatprep.subr.mxu0 %v14562_v29 }
 0x7e0   :  { %12047 = vmatpush3.msra.mxu0 %v14562_v29  ;;  %12063 = vmatprep.subr.mxu1 %v8473_v0 }
 0x7e1   :  { %12048 = vmatprep.subr.mxu0 %v14570_v52  ;;  %12064 = vmatpush3.msra.mxu1 %v8473_v0 }
 0x7e2   :  { %12049 = vmatpush3.msra.mxu0 %v14570_v52  ;;  %12079 = vmatprep.subr.mxu1 %v14562_v29 }
 0x7e3   :  { %12050 = vmatprep.subr.mxu0 %v14583_v38 }
 0x7e4   :  { %12051 = vmatpush3.msra.mxu0 %v14583_v38 }
 0x7e5   :  { %12052 = vmatprep.subr.mxu0 %v14598_v10 }
 0x7e6   :  { %12053 = vmatpush3.msra.mxu0 %v14598_v10 }
 0x7e7   :  { %12068 = vmatprep.subr.mxu0 %v14568_v39 }
 0x867   :  { %v11935_v40 = vpop.f32.mrf.mxu1 }
 0x869   :  { %v7425_v4 = vpop.f32.mrf.mxu1 }
 0x86f   :  { %v11957_v49 = vpop.f32.mrf.mxu1 }
 0x870   :  { %v11924_v55 = vpop.f32.mrf.mxu0 }
 0x871   :  { %v7432_v43 = vadd.f32 %v11935_v40, %v11924_v55  ;;  %v7595_v42 = vpop.f32.mrf.mxu1 }
 0x872   :  { %v7324_v26 = vpop.f32.mrf.mxu0 }
 0x873   :  { %v7426_v44 = vadd.f32 %v7425_v4, %v7324_v26 }
 0x878   :  { %v11946_v5 = vpop.f32.mrf.mxu0 }
 0x879   :  { %v7519_v60 = vadd.f32 %v11946_v5, %v7432_v43  ;;  %v11979_v47 = vpop.f32.mrf.mxu1 }
 0x87a   :  { %v7511_v32 = vpop.f32.mrf.mxu0 }
 0x87b   :  { %v7512_v34 = vadd.f32 %v7511_v32, %v7426_v44  ;;  %v7604_v9 = vadd.f32 %v11957_v49, %v7519_v60  ;;  %v7767_v13 = vpop.f32.mrf.mxu1 }
 0x87d   :  { %v7596_v21 = vadd.f32 %v7595_v42, %v7512_v34 }
 0x882   :  { %v11968_v6 = vpop.f32.mrf.mxu0 }
 0x883   :  { %v7693_v28 = vadd.f32 %v11968_v6, %v7604_v9  ;;  %v12001_v48 = vpop.f32.mrf.mxu1 }
 0x884   :  { %v7686_v41 = vpop.f32.mrf.mxu0 }
 0x885   :  { %v7687_v25 = vadd.f32 %v7686_v41, %v7596_v21  ;;  %v7774_v51 = vadd.f32 %v11979_v47, %v7693_v28  ;;  %v7958_v31 = vpop.f32.mrf.mxu1 }
 0x887   :  { %v7768_v58 = vadd.f32 %v7767_v13, %v7687_v25 }
 0x88c   :  { %v11990_v22 = vpop.f32.mrf.mxu0 }
 0x88d   :  { %v7868_v46 = vadd.f32 %v11990_v22, %v7774_v51  ;;  %v12023_v37 = vpop.f32.mrf.mxu1 }
 0x88e   :  { %v7857_v16 = vpop.f32.mrf.mxu0 }
 0x88f   :  { %v7858_v53 = vadd.f32 %v7857_v16, %v7768_v58  ;;  %v7965_v23 = vadd.f32 %v12001_v48, %v7868_v46  ;;  %v8128_v7 = vpop.f32.mrf.mxu1 }
 0x891   :  { %v7959_v27 = vadd.f32 %v7958_v31, %v7858_v53  ;;  %v8863_v31 = vld [vmem:[%s14763_s5 + $0x8] sm:$0xf] }
 0x896   :  { %v12012_v54 = vpop.f32.mrf.mxu0 }
 0x897   :  { %v8052_v33 = vadd.f32 %v12012_v54, %v7965_v23  ;;  %v12045_v45 = vpop.f32.mrf.mxu1  ;;  %v8862_v54 = vld [vmem:[%s14763_s5] sm:$0xff] }
 0x898   :  { %v8044_v17 = vpop.f32.mrf.mxu0 }
 0x899   :  { %v8045_v2 = vadd.f32 %v8044_v17, %v7959_v27  ;;  %v8137_v12 = vadd.f32 %v12023_v37, %v8052_v33  ;;  %v8300_v1 = vpop.f32.mrf.mxu1 }
 0x89b   :  { %v8129_v14 = vadd.f32 %v8128_v7, %v8045_v2 }
 0x89f   :  { %v12034_v11 = vpop.f32.mrf.mxu0 }
 0x8a0   :  { %v8226_v19 = vadd.f32 %v12034_v11, %v8137_v12 }
 0x8a1   :  { %v8219_v50 = vpop.f32.mrf.mxu0 }
 0x8a2   :  { %v8307_v15 = vadd.f32 %v12045_v45, %v8226_v19  ;;  %v8220_v63 = vadd.f32 %v8219_v50, %v8129_v14  ;;  %v10043_v45 = vld [vmem:[%s14764_s6] ss:$0 sm:$0xff] }
 0x8a4   :  { %v8316_v24 = vadd.f32 %v10041_v57, %v8307_v15  ;;  %v8301_v36 = vadd.f32 %v8300_v1, %v8220_v63 }
 0x8a6   :  { %v8318_v59 = vmax.f32 %v8316_v24, 0.0  ;;  %v8315_v18 = vadd.f32 %v10041_v57, %v8301_v36 }
 0x8a8   :  { %v8332_v0 = vsel %vm2578_vm15, %v8318_v59, 0  ;;  %v8317_v55 = vmax.f32 %v8315_v18, 0.0 }
 0x8a9   :  { %v8413_v40 = vand.u32 4294901760, %v8332_v0 }
 0x8aa   :  { %v8329_v26 = vsel %vm2578_vm15, %v8317_v55, 0 }
 0x8ab   :  { %v8414_v5 = vsub.f32 %v8332_v0, %v8413_v40  ;;  %v8403_v4 = vand.u32 4294901760, %v8329_v26 }
 0x8ad   :  { %12065 = vmatprep.mubr.f32.mxu1 %v8403_v4  ;;  %v8404_v43 = vsub.f32 %v8329_v26, %v8403_v4  ;;  %v8415_v49 = vand.u32 4294901760, %v8414_v5 }
 0x8ae   :  { %12066 = vmatmul.mubr.f32.vlgmr.msra.gmra.mxu1 %v8413_v40 }
 0x8af   :  { %12080 = vmatpush3.msra.mxu1 %v14562_v29  ;;  %v8405_v32 = vand.u32 4294901760, %v8404_v43  ;;  %v8416_v60 = vsub.f32 %v8414_v5, %v8415_v49 }
 0x8b0   :  { %12081 = vmatprep.subr.mxu1 %v14570_v52 }
 0x8b1   :  { %12082 = vmatpush3.msra.mxu1 %v14570_v52  ;;  %12087 = vmatprep.mubr.f32.mxu1 %v8405_v32  ;;  %v8406_v44 = vsub.f32 %v8404_v43, %v8405_v32  ;;  %v8417_v34 = vand.u32 4294901760, %v8416_v60 }
 0x8b2   :  { %12083 = vmatprep.subr.mxu1 %v14583_v38 }
 0x8b3   :  { %12084 = vmatpush3.msra.mxu1 %v14583_v38  ;;  %v8407_v6 = vand.u32 4294901760, %v8406_v44 }
 0x8b4   :  { %12085 = vmatprep.subr.mxu1 %v14598_v10 }
 0x8b5   :  { %12086 = vmatpush3.msra.mxu1 %v14598_v10  ;;  %12054 = vmatprep.mubr.f32.mxu0 %v8407_v6 }
 0x8b6   :  { %12088 = vmatmul.mubr.f32.vlgmr.msra.gmra.mxu1 %v8415_v49  ;;  %12101 = vmatprep.subr.mxu1 %v14562_v29 }
 0x8b7   :  { %12055 = vmatmul.mubr.f32.vlgmr.msra.gmra.mxu0 %v8417_v34  ;;  %12102 = vmatpush3.msra.mxu1 %v14562_v29 }
 0x8b8   :  { %12069 = vmatpush3.msra.mxu0 %v14568_v39  ;;  %12109 = vmatprep.mubr.f32.mxu1 %v8403_v4  ;;  %v10042_v39 = vld [vmem:[%s14761_s10 + $0x5] ss:$0 sm:$0xff] }
 0x8b9   :  { %12070 = vmatprep.subr.mxu0 %v14581_v62  ;;  %12076 = vmatprep.mubr.f32.mxu0 %v8404_v43 }
 0x8ba   :  { %12103 = vmatprep.subr.mxu1 %v14570_v52  ;;  %12071 = vmatpush3.msra.mxu0 %v14581_v62 }
 0x8bb   :  { %12104 = vmatpush3.msra.mxu1 %v14570_v52  ;;  %12072 = vmatprep.subr.mxu0 %v14596_v20 }
 0x8bc   :  { %12105 = vmatprep.subr.mxu1 %v14583_v38  ;;  %12073 = vmatpush3.msra.mxu0 %v14596_v20 }
 0x8bd   :  { %12106 = vmatpush3.msra.mxu1 %v14583_v38  ;;  %12074 = vmatprep.subr.mxu0 %v14608_v61 }
 0x8be   :  { %12107 = vmatprep.subr.mxu1 %v14598_v10  ;;  %12075 = vmatpush3.msra.mxu0 %v14608_v61 }
 0x8bf   :  { %12108 = vmatpush3.msra.mxu1 %v14598_v10  ;;  %12077 = vmatmul.mubr.f32.vlgmr.msra.gmra.mxu0 %v8414_v5 }
 0x8c0   :  { %12090 = vmatprep.subr.mxu0 %v14578_v30  ;;  %12110 = vmatmul.mubr.f32.vlgmr.msra.gmra.mxu1 %v8413_v40 }
 0x8c1   :  { %12091 = vmatpush3.msra.mxu0 %v14578_v30  ;;  %12098 = vmatprep.mubr.f32.mxu0 %v8403_v4 }
 0x8c2   :  { %12092 = vmatprep.subr.mxu0 %v14593_v8 }
 0x8c3   :  { %12093 = vmatpush3.msra.mxu0 %v14593_v8 }
 0x8c4   :  { %12094 = vmatprep.subr.mxu0 %v14605_v56 }
 0x8c5   :  { %12095 = vmatpush3.msra.mxu0 %v14605_v56 }
 0x8c6   :  { %12096 = vmatprep.subr.mxu0 %v14615_v3 }
 0x8c7   :  { %12097 = vmatpush3.msra.mxu0 %v14615_v3 }
 0x8c8   :  { %12099 = vmatmul.mubr.f32.vlgmr.msra.gmra.mxu0 %v8413_v40 }
 0x96e   :  { %v12067_v52 = vpop.f32.mrf.mxu1 }
 0x970   :  { %v8510_v8 = vpop.f32.mrf.mxu1 }
 0x976   :  { %v12089_v61 = vpop.f32.mrf.mxu1 }
 0x977   :  { %v12056_v29 = vpop.f32.mrf.mxu0 }
 0x978   :  { %v8420_v62 = vadd.f32 %v12056_v29, %v10042_v39  ;;  %v8680_v41 = vpop.f32.mrf.mxu1 }
 0x979   :  { %v8409_v30 = vpop.f32.mrf.mxu0 }
 0x97a   :  { %v8410_v38 = vadd.f32 %v10042_v39, %v8409_v30  ;;  %v8517_v10 = vadd.f32 %v12067_v52, %v8420_v62 }
 0x97c   :  { %v8511_v9 = vadd.f32 %v8510_v8, %v8410_v38 }
 0x97f   :  { %v12078_v20 = vpop.f32.mrf.mxu0 }
 0x980   :  { %v8604_v56 = vadd.f32 %v12078_v20, %v8517_v10  ;;  %v12111_v28 = vpop.f32.mrf.mxu1 }
 0x981   :  { %v8596_v42 = vpop.f32.mrf.mxu0 }
 0x982   :  { %v8597_v47 = vadd.f32 %v8596_v42, %v8511_v9  ;;  %v8689_v3 = vadd.f32 %v12089_v61, %v8604_v56  ;;  %v8852_v16 = vpop.f32.mrf.mxu1 }
 0x984   :  { %v8681_v25 = vadd.f32 %v8680_v41, %v8597_v47 }
 0x988   :  { %v12100_v21 = vpop.f32.mrf.mxu0 }
 0x989   :  { %v8778_v22 = vadd.f32 %v12100_v21, %v8689_v3 }
 0x98a   :  { %v8771_v13 = vpop.f32.mrf.mxu0 }
 0x98b   :  { %v14659_v51 = vadd.f32 %v12111_v28, %v8778_v22  ;;  %v8772_v48 = vadd.f32 %v8771_v13, %v8681_v25 }
 0x98d   :  { %v14661_v46 = vadd.f32 %v8852_v16, %v8772_v48  ;;  %v8885_v58 = vsel %vm8884_vm9, %v14659_v51, 0.0  ;;  %v8889_v23 = vmul.f32 %v14659_v51, %v14659_v51 }
 0x98e   :  { %8886 = vadd.xlane.f32.xlu1 %v8885_v58 }
 0x98f   :  { %v8881_v53 = vsel %vm2578_vm15, %v14661_v46, 0.0  ;;  %v8888_v37 = vmul.f32 %v14661_v46, %v14661_v46  ;;  %v8893_v17 = vsel %vm8884_vm9, %v8889_v23, 0.0 }
 0x990   :  { %8882 = vadd.xlane.f32.xlu0 %v8881_v53 }
 0x991   :  { %v8890_v33 = vsel %vm2578_vm15, %v8888_v37, 0.0 }
 0x99f   :  { %8866 = vperm.xlu1 %12216, %v8862_v54  }
 0x9a6   :  { %8869 = vperm.xlu0 %12215, %v8863_v31  }
 0x9c3   :  { %8894 = vadd.xlane.f32.xlu1 %v8893_v17 }
 0x9c5   :  { %8891 = vadd.xlane.f32.xlu0 %v8890_v33 }
 0xa17   :  { %v8887_v27 = vpop.xlane.xlu1 %8886 }
 0xa18   :  { %v8903_v2 = vsel %vm1467_vm11, %v8887_v27, 0 }
 0xa19   :  { %v8934_v7 = vand.u32 4294901760, %v8903_v2  ;;  %v8883_v12 = vpop.xlane.xlu0 %8882 }
 0xa1a   :  { %v8937_v11 = vand.u32 4294901760, %v8883_v12 }
 0xa1b   :  { %v9022_v19 = vsub.f32 %v8903_v2, %v8934_v7  ;;  %12112 = vmatprep.subr.mxu0 %v8934_v7  ;;  %v8867_v14 = vpop.permute.xlu1 %8866 }
 0xa1c   :  { %v9029_v57 = vsub.f32 %v8883_v12, %v8937_v11  ;;  %vm8875_vm10 = vcmp.eq.s32.totalorder %v8867_v14, %v10043_v45  ;;  %12113 = vmatpush3.msra.mxu0 %v8934_v7 }
 0xa1d   :  { %v14684_v50 = vsel %vm8875_vm10, 1.0, %v14785_v35  ;;  %12114 = vmatprep.subr.mxu0 %v8937_v11  ;;  %v9023_v15 = vand.u32 4294901760, %v9022_v19 }
 0xa1e   :  { %12115 = vmatpush3.msra.mxu0 %v8937_v11  ;;  %12123 = vmatprep.mubr.msk.f32.mxu1 %vm1457_vm8, %v14684_v50  ;;  %v9912_v63 = vsel %vm1457_vm8, %v14684_v50, 0.0  ;;  %v9030_v1 = vand.u32 4294901760, %v9029_v57  ;;  %v8897_v24 = vsel %vm1457_vm8, %v14684_v50, 0 }
 0xa1f   :  { %9913 = vadd.xlane.f32.xlu1 %v9912_v63  ;;  %12126 = vmatprep.subr.mxu0 %v9022_v19  ;;  %v9024_v36 = vsub.f32 %v9022_v19, %v9023_v15  ;;  %v14692_v59 = vsub.f32 %v8897_v24, %v8897_v24 }
 0xa20   :  { %v9031_v18 = vsub.f32 %v9029_v57, %v9030_v1 }
 0xa21   :  { %v8870_v0 = vpop.permute.xlu0 %8869  ;;  %v9025_v55 = vand.u32 4294901760, %v9024_v36  ;;  %v14695_v40 = vand.u32 4294901760, %v14692_v59 }
 0xa22   :  { %vm8876_vm13 = vcmp.eq.s32.totalorder %v8870_v0, %v10043_v45  ;;  %v9032_v26 = vand.u32 4294901760, %v9031_v18 }
 0xa23   :  { %v14698_v5 = vsel %vm8876_vm13, 1.0, %v14785_v35  ;;  %12119 = vmatprep.subr.mxu1 %v9025_v55  ;;  %v8975_v4 = vsub.f32 %v14692_v59, %v14695_v40 }
 0xa24   :  { %v8900_v43 = vsel %vm1457_vm8, %v14698_v5, 0  ;;  %12120 = vmatpush3.msra.mxu1 %v9025_v55  ;;  %v9916_v49 = vsel %vm9915_vm12, %v14698_v5, 0.0 }
 0xa25   :  { %v8983_v32 = vsub.f32 %v8900_v43, %v8900_v43  ;;  %12121 = vmatprep.subr.mxu1 %v9032_v26  ;;  %9917 = vadd.xlane.f32.xlu0 %v9916_v49  ;;  %v8976_v44 = vand.u32 4294901760, %v8975_v4 }
 0xa26   :  { %12122 = vmatpush3.msra.mxu1 %v9032_v26 }
 0xa27   :  { %12116 = vmatprep.mubr.f32.mxu0 %v8976_v44  ;;  %12124 = vmatmul.mubr.msk.f32.vlgmr.msra.gmra.mxu1 %vm1457_vm8, %v14698_v5  ;;  %v14707_v35 = vand.u32 4294901760, %v8983_v32 }
 0xa28   :  { %12133 = vmatprep.subr.mxu1 %v8934_v7  ;;  %12137 = vmatprep.mubr.f32.mxu1 %v14695_v40 }
 0xa29   :  { %12134 = vmatpush3.msra.mxu1 %v8934_v7  ;;  %v8985_v60 = vsub.f32 %v8983_v32, %v14707_v35 }
 0xa2a   :  { %12135 = vmatprep.subr.mxu1 %v8937_v11 }
 0xa2b   :  { %12136 = vmatpush3.msra.mxu1 %v8937_v11  ;;  %v8986_v6 = vand.u32 4294901760, %v8985_v60 }
 0xa2c   :  { %12138 = vmatmul.mubr.f32.vlgmr.msra.gmra.mxu1 %v14707_v35  ;;  %12147 = vmatprep.subr.mxu1 %v8934_v7 }
 0xa2d   :  { %12148 = vmatpush3.msra.mxu1 %v8934_v7  ;;  %12151 = vmatprep.mubr.msk.f32.mxu1 %vm1457_vm8, %v14684_v50 }
 0xa2e   :  { %12117 = vmatmul.mubr.f32.vlgmr.msra.gmra.mxu0 %v8986_v6  ;;  %12149 = vmatprep.subr.mxu1 %v8937_v11 }
 0xa2f   :  { %12127 = vmatpush3.msra.mxu0 %v9022_v19  ;;  %12130 = vmatprep.mubr.f32.mxu0 %v14692_v59 }
 0xa30   :  { %12128 = vmatprep.subr.mxu0 %v9029_v57  ;;  %12150 = vmatpush3.msra.mxu1 %v8937_v11 }
 0xa31   :  { %12129 = vmatpush3.msra.mxu0 %v9029_v57  ;;  %12152 = vmatmul.mubr.msk.f32.vlgmr.msra.gmra.mxu1 %vm1457_vm8, %v14698_v5 }
 0xa32   :  { %12140 = vmatprep.subr.mxu0 %v9023_v15  ;;  %12165 = vmatprep.mubr.msk.f32.mxu1 %vm1457_vm8, %v14684_v50 }
 0xa33   :  { %12131 = vmatmul.mubr.f32.vlgmr.msra.gmra.mxu0 %v8983_v32 }
 0xa34   :  { %12141 = vmatpush3.msra.mxu0 %v9023_v15  ;;  %12144 = vmatprep.mubr.msk.f32.mxu0 %vm1457_vm8, %v14684_v50 }
 0xa35   :  { %12142 = vmatprep.subr.mxu0 %v9030_v1 }
 0xa36   :  { %12143 = vmatpush3.msra.mxu0 %v9030_v1 }
 0xa37   :  { %12145 = vmatmul.mubr.msk.f32.vlgmr.msra.gmra.mxu0 %vm1457_vm8, %v14698_v5 }
 0xa38   :  { %12158 = vmatprep.mubr.f32.mxu0 %v8976_v44 }
 0xa4c   :  { %v8895_v34 = vpop.xlane.xlu1 %8894 }
 0xa4d   :  { %v9408_v29 = vsel %vm1467_vm11, %v8895_v34, 0 }
 0xa4e   :  { %v9439_v39 = vand.u32 4294901760, %v9408_v29  ;;  %v8892_v52 = vpop.xlane.xlu0 %8891 }
 0xa4f   :  { %v9442_v30 = vand.u32 4294901760, %v8892_v52 }
 0xa50   :  { %v9527_v62 = vsub.f32 %v9408_v29, %v9439_v39  ;;  %12154 = vmatprep.subr.mxu0 %v9439_v39 }
 0xa51   :  { %v9534_v38 = vsub.f32 %v8892_v52, %v9442_v30  ;;  %12155 = vmatpush3.msra.mxu0 %v9439_v39 }
 0xa52   :  { %12156 = vmatprep.subr.mxu0 %v9442_v30  ;;  %v9528_v20 = vand.u32 4294901760, %v9527_v62 }
 0xa53   :  { %12157 = vmatpush3.msra.mxu0 %v9442_v30  ;;  %v9535_v8 = vand.u32 4294901760, %v9534_v38 }
 0xa54   :  { %12159 = vmatmul.mubr.f32.vlgmr.msra.gmra.mxu0 %v8986_v6  ;;  %12168 = vmatprep.subr.mxu0 %v9527_v62  ;;  %v9529_v10 = vsub.f32 %v9527_v62, %v9528_v20 }
 0xa55   :  { %12169 = vmatpush3.msra.mxu0 %v9527_v62  ;;  %12172 = vmatprep.mubr.f32.mxu0 %v14692_v59  ;;  %v9536_v61 = vsub.f32 %v9534_v38, %v9535_v8 }
 0xa56   :  { %12170 = vmatprep.subr.mxu0 %v9534_v38  ;;  %v9530_v42 = vand.u32 4294901760, %v9529_v10 }
 0xa57   :  { %12171 = vmatpush3.msra.mxu0 %v9534_v38  ;;  %v9537_v56 = vand.u32 4294901760, %v9536_v61 }
 0xa58   :  { %12161 = vmatprep.subr.mxu1 %v9530_v42  ;;  %12173 = vmatmul.mubr.f32.vlgmr.msra.gmra.mxu0 %v8983_v32 }
 0xa59   :  { %12182 = vmatprep.subr.mxu0 %v9528_v20  ;;  %12162 = vmatpush3.msra.mxu1 %v9530_v42 }
 0xa5a   :  { %12183 = vmatpush3.msra.mxu0 %v9528_v20  ;;  %12186 = vmatprep.mubr.msk.f32.mxu0 %vm1457_vm8, %v14684_v50 }
 0xa5b   :  { %12163 = vmatprep.subr.mxu1 %v9537_v56  ;;  %12184 = vmatprep.subr.mxu0 %v9535_v8 }
 0xa5c   :  { %12164 = vmatpush3.msra.mxu1 %v9537_v56  ;;  %12185 = vmatpush3.msra.mxu0 %v9535_v8 }
 0xa5d   :  { %12166 = vmatmul.mubr.msk.f32.vlgmr.msra.gmra.mxu1 %vm1457_vm8, %v14698_v5  ;;  %12175 = vmatprep.subr.mxu1 %v9439_v39 }
 0xa5e   :  { %12187 = vmatmul.mubr.msk.f32.vlgmr.msra.gmra.mxu0 %vm1457_vm8, %v14698_v5  ;;  %12176 = vmatpush3.msra.mxu1 %v9439_v39 }
 0xa5f   :  { %12179 = vmatprep.mubr.f32.mxu1 %v14695_v40  ;;  %12177 = vmatprep.subr.mxu1 %v9442_v30 }
 0xa60   :  { %12178 = vmatpush3.msra.mxu1 %v9442_v30 }
 0xa61   :  { %12180 = vmatmul.mubr.f32.vlgmr.msra.gmra.mxu1 %v14707_v35  ;;  %12189 = vmatprep.subr.mxu1 %v9439_v39 }
 0xa62   :  { %12190 = vmatpush3.msra.mxu1 %v9439_v39  ;;  %12193 = vmatprep.mubr.msk.f32.mxu1 %vm1457_vm8, %v14684_v50 }
 0xa63   :  { %12191 = vmatprep.subr.mxu1 %v9442_v30 }
 0xa64   :  { %12192 = vmatpush3.msra.mxu1 %v9442_v30 }
 0xa65   :  { %12194 = vmatmul.mubr.msk.f32.vlgmr.msra.gmra.mxu1 %vm1457_vm8, %v14698_v5 }
 0xaa8   :  { %v9914_v41 = vpop.xlane.xlu1 %9913 }
 0xaa9   :  { %v9919_v21 = vmul.f32 32.0, %v9914_v41 }
 0xaae   :  { %v9918_v9 = vpop.xlane.xlu0 %9917 }
 0xaaf   :  { %v9920_v3 = vmul.f32 32.0, %v9918_v9 }
 0xab1   :  { %12221 = vrcp.f32 %v9920_v3  ;;  %v10058_v3 = vld [vmem:[%s14761_s10 + $0x6] ss:$0 sm:$0xff] }
 0xab2   :  { %12223 = vrcp.f32 %v9919_v21 }
 0xabe   :  { %v12222_v11 = vpop.eup %12221 }
 0xabf   :  { %v12224_v50 = vpop.eup %12223 }
 0xae7   :  { %v12125_v47 = vpop.f32.mrf.mxu1 }
 0xae9   :  { %v9069_v28 = vpop.f32.mrf.mxu1 }
 0xaec   :  { %v12139_v25 = vpop.f32.mrf.mxu1 }
 0xaee   :  { %v12118_v22 = vpop.f32.mrf.mxu0  ;;  %v9233_v16 = vpop.f32.mrf.mxu1 }
 0xaef   :  { %v9076_v48 = vadd.f32 %v12125_v47, %v12118_v22  ;;  %v10059_v22 = vld [vmem:[%s14761_s10 + $0x7] ss:$0 sm:$0xff] }
 0xaf0   :  { %v8978_v13 = vpop.f32.mrf.mxu0 }
 0xaf1   :  { %v9070_v53 = vadd.f32 %v9069_v28, %v8978_v13  ;;  %v12153_v17 = vpop.f32.mrf.mxu1 }
 0xaf3   :  { %v12132_v58 = vpop.f32.mrf.mxu0  ;;  %v9397_v19 = vpop.f32.mrf.mxu1 }
 0xaf4   :  { %v9159_v54 = vadd.f32 %v12132_v58, %v9076_v48 }
 0xaf5   :  { %v9151_v31 = vpop.f32.mrf.mxu0 }
 0xaf6   :  { %v9152_v23 = vadd.f32 %v9151_v31, %v9070_v53  ;;  %v9242_v37 = vadd.f32 %v12139_v25, %v9159_v54 }
 0xaf7   :  { %v12146_v33 = vpop.f32.mrf.mxu0 }
 0xaf8   :  { %v9325_v27 = vadd.f32 %v12146_v33, %v9242_v37  ;;  %v9234_v2 = vadd.f32 %v9233_v16, %v9152_v23 }
 0xaf9   :  { %v9318_v7 = vpop.f32.mrf.mxu0 }
 0xafa   :  { %v9404_v12 = vadd.f32 %v12153_v17, %v9325_v27  ;;  %v9319_v45 = vadd.f32 %v9318_v7, %v9234_v2 }
 0xafc   :  { %v9398_v14 = vadd.f32 %v9397_v19, %v9319_v45  ;;  %v9926_v57 = vmul.f32 %v12222_v11, %v9404_v12 }
 0xafe   :  { %9940 = vperm.xlu0 %12215, %v9926_v57   ;;  %v9925_v15 = vmul.f32 %v12224_v50, %v9398_v14  ;;  %v9930_v30 = vmul.f32 %v9926_v57, %v9926_v57 }
 0xb00   :  { %9935 = vperm.xlu1 %12216, %v9925_v15   ;;  %v9929_v62 = vmul.f32 %v9925_v15, %v9925_v15 }
 0xb14   :  { %v12160_v63 = vpop.f32.mrf.mxu0 }
 0xb16   :  { %v9483_v1 = vpop.f32.mrf.mxu0 }
 0xb18   :  { %v12174_v24 = vpop.f32.mrf.mxu0 }
 0xb1a   :  { %v9656_v36 = vpop.f32.mrf.mxu0 }
 0xb1d   :  { %v12167_v59 = vpop.f32.mrf.mxu1 }
 0xb1e   :  { %v9581_v18 = vadd.f32 %v12167_v59, %v12160_v63  ;;  %v12188_v26 = vpop.f32.mrf.mxu0 }
 0xb1f   :  { %v9574_v0 = vpop.f32.mrf.mxu1 }
 0xb20   :  { %v9575_v55 = vadd.f32 %v9574_v0, %v9483_v1  ;;  %v9664_v40 = vadd.f32 %v12174_v24, %v9581_v18  ;;  %v9823_v35 = vpop.f32.mrf.mxu0 }
 0xb21   :  { %v12181_v5 = vpop.f32.mrf.mxu1 }
 0xb22   :  { %v9747_v4 = vadd.f32 %v12181_v5, %v9664_v40  ;;  %v9657_v43 = vadd.f32 %v9656_v36, %v9575_v55 }
 0xb23   :  { %v9738_v49 = vpop.f32.mrf.mxu1 }
 0xb24   :  { %v9739_v32 = vadd.f32 %v9738_v49, %v9657_v43  ;;  %v9830_v44 = vadd.f32 %v12188_v26, %v9747_v4 }
 0xb25   :  { %v12195_v60 = vpop.f32.mrf.mxu1 }
 0xb26   :  { %v9909_v6 = vadd.f32 %v12195_v60, %v9830_v44  ;;  %v9824_v34 = vadd.f32 %v9823_v35, %v9739_v32 }
 0xb27   :  { %v9902_v29 = vpop.f32.mrf.mxu1 }
 0xb28   :  { %v9928_v39 = vmul.f32 %v12222_v11, %v9909_v6  ;;  %v9903_v52 = vadd.f32 %v9902_v29, %v9824_v34 }
 0xb2a   :  { %v9927_v38 = vmul.f32 %v12224_v50, %v9903_v52  ;;  %v9932_v20 = vsub.f32 %v9928_v39, %v9930_v30 }
 0xb2c   :  { %v9931_v8 = vsub.f32 %v9927_v38, %v9929_v62  ;;  %v9946_v61 = vadd.f32 1e-05, %v9932_v20 }
 0xb2e   :  { %v9945_v10 = vadd.f32 1e-05, %v9931_v8 }
 0xb30   :  { %12225 = vrsqrt.f32 %v9945_v10 }
 0xb31   :  { %12227 = vrsqrt.f32 %v9946_v61 }
 0xb3d   :  { %v12226_v42 = vpop.eup %12225 }
 0xb3e   :  { %9951 = vperm.xlu1 %12216, %v12226_v42   ;;  %v12228_v56 = vpop.eup %12227 }
 0xb42   :  { %9956 = vperm.xlu1 %12216, %v12228_v56  }
 0xb79   :  { %v9941_v41 = vpop.permute.xlu0 %9940 }
 0xb7a   :  { %v9944_v25 = vsub.f32 %v14659_v51, %v9941_v41 }
 0xb7b   :  { %v9936_v9 = vpop.permute.xlu1 %9935 }
 0xb7c   :  { %v9943_v47 = vsub.f32 %v14661_v46, %v9936_v9 }
 0xbb9   :  { %v9952_v28 = vpop.permute.xlu1 %9951 }
 0xbba   :  { %v9959_v21 = vmul.f32 %v9952_v28, %v9943_v47 }
 0xbbc   :  { %v9966_v13 = vmul.f32 %v10058_v3, %v9959_v21 }
 0xbbd   :  { %v9957_v48 = vpop.permute.xlu1 %9956 }
 0xbbe   :  { %v9973_v16 = vadd.f32 %v10059_v22, %v9966_v13  ;;  %v9960_v58 = vmul.f32 %v9957_v48, %v9944_v25 }
 0xbc0   :  { %9975 = vst.msk [vmem:[%s14762_s11] sm:$0xff] %vm2578_vm15, %v9973_v16  ;;  %v9967_v46 = vmul.f32 %v10058_v3, %v9960_v58 }
 0xbc2   :  { %v9974_v53 = vadd.f32 %v10059_v22, %v9967_v46 }
 0xbc4   :  { %9976 = vst.msk [vmem:[%s14762_s11 + $0x8] sm:$0xf] %vm8884_vm9, %v9974_v53 }

</bundles_post_ra>
